<compile_context>
chip_gen: v5e
topology: v5e:2x2
jax: 0.10.0
libtpu: 0.0.40
codegen_flags: <defaults>
</compile_context>

<pallas_src>
import functools
import math

import jax
import jax.numpy as jnp
import numpy as np
from jax.experimental import pallas as pl
from jax.experimental.pallas import tpu as pltpu


def _round_up(v, m):
    return -(-v // m) * m


def _largest_divisor_leq(m, k):
    k = max(1, min(m, k))
    for d in range(k, 0, -1):
        if m % d == 0:
            return d
    return 1


def _dot_nt(a, b):
    """a: (M, K), b: (N, K) -> (M, N); contract last dims, no transpose materialized."""
    return jax.lax.dot_general(
        a, b, (((1,), (1,)), ((), ())), preferred_element_type=jnp.float32
    )


def _bispectral_kernel(x_ref, wz_ref, ww_ref, wcat_ref, wreci_ref, rep_ref, tile_ref,
                       br_ref, bi_ref, ssq_ref, rr_ref, ri_ref,
                       *, ch, group_lanes):
    c = pl.program_id(1)                      # pair-chunk index (reduction-ish axis)
    tb = x_ref.shape[0]
    gl = group_lanes

    x = x_ref[...]                            # (TB, N); may be bf16 (p-matmul path)
    xz = x.astype(jnp.float32)                # z / recon path stays f32

    # ---- fused complex linear: zcat = [zr | zi] = x @ [Wr; Wi]^T  (one MXU push)
    wcat = wcat_ref[...]                      # (2*Hp, N)
    zcat = _dot_nt(xz, wcat)                  # (TB, 2*Hp)
    # this chunk's z_i columns via the chunk-blocked weight slice (no dynamic
    # lane slicing of zcat needed): (TB, 2*n_i) = [z_i real | z_i imag]
    zchunk = _dot_nt(xz, wz_ref[0])

    # ---- lane-dense expansion of z onto the pair grid.  rep/tile are fixed
    # Hp-periodic 0/1 replication operators (NOT per-pair one-hot selectors):
    # they let the MXU do the lane replication so all VPU math and beta stores
    # run at full vreg width; their cost is a few % of the p-matmul at any hdim
    # and they add no per-pair HBM traffic.
    acat = jnp.dot(zchunk, rep_ref[...], preferred_element_type=jnp.float32)   # (TB, 2*CH)
    btile = jnp.dot(zcat, tile_ref[...], preferred_element_type=jnp.float32)   # (TB, 2*GL)
    btr = btile[:, :gl]                       # j-tiled z (real), 128-aligned slice
    bti = btile[:, gl:]

    # ---- fused p matmul: (TB, 2*CH) = [p real | p imag]; halves are 128-aligned
    pcat = _dot_nt(x, ww_ref[0])

    ssq_acc = jnp.zeros((tb, 1), jnp.float32)
    # TODO(synk): convert to lax.fori_loop for very large chunk/group counts;
    # trip count here is ch // group_lanes (<= ~32), a static unroll is fine.
    for g in range(ch // gl):
        lo = g * gl
        ar = acat[:, lo:lo + gl]              # i-broadcast z (real), 128-aligned
        ai = acat[:, ch + lo:ch + lo + gl]
        zzr = ar * btr - ai * bti             # z_i * z_j, full-width VPU
        zzi = ar * bti + ai * btr
        pr_g = pcat[:, lo:lo + gl]
        pi_g = pcat[:, ch + lo:ch + lo + gl]
        bre = zzr * pr_g + zzi * pi_g         # beta = zz * conj(p)
        bim = zzi * pr_g - zzr * pi_g
        br_ref[:, lo:lo + gl] = bre           # unmasked, 128-aligned full-width stores
        bi_ref[:, lo:lo + gl] = bim
        ssq_acc = ssq_acc + jnp.sum(bre * bre + bim * bim, axis=-1, keepdims=True)

    # ---- RowNorm statistics: accumulate ||beta||^2 across pair chunks directly
    # in the resident output block (no full-row read-back).  1/sqrt is applied in
    # the wrapper with the triu gather, so zero-padded batch rows never see a
    # divide-by-zero and no NaN is written to HBM.
    @pl.when(c == 0)
    def _():
        ssq_ref[...] = jnp.zeros_like(ssq_ref)
    ssq_ref[...] += ssq_acc

    # ---- recon = z @ conj(W): two stacked-K matmuls; pair-chunk invariant, so
    # emit once per batch tile (output block stays resident across the chunk axis).
    @pl.when(c == pl.num_programs(1) - 1)
    def _():
        rr_ref[...] = jnp.dot(zcat, wcat, preferred_element_type=jnp.float32)
        ri_ref[...] = jnp.dot(zcat, wreci_ref[...], preferred_element_type=jnp.float32)


def prepare_bispectral_weights(Wr, Wi, *, max_chunk_cols=2048, use_bf16_mxu=False):
    """Weight-only preprocessing, hoisted off the per-forward critical path.
    Call once per weight update."""
    H, N = Wr.shape
    Hp = _round_up(H, 16)                     # Hp*Hp is a multiple of 128 (lane-dense pairs)
    HH = Hp * Hp
    group_lanes = Hp * 128 // math.gcd(Hp, 128)   # smallest 128-aligned whole-i span
    # pair-axis chunk: multiple of group_lanes that divides HH (keeps WW + beta
    # staging inside v7x's 64 MiB VMEM at non-toy hdim)
    d = _largest_divisor_leq(HH // group_lanes, max(1, max_chunk_cols // group_lanes))
    CH = d * group_lanes
    num_chunks = HH // CH
    n_i = CH // Hp                            # i indices handled per chunk

    iu, ju = np.triu_indices(H)               # row-major == torch.triu_indices order
    flat_idx = jnp.asarray((iu * Hp + ju).astype(np.int32))

    Wr_p = jnp.zeros((Hp, N), jnp.float32).at[:H].set(Wr.astype(jnp.float32))
    Wi_p = jnp.zeros((Hp, N), jnp.float32).at[:H].set(Wi.astype(jnp.float32))

    # stacked-K weights: zcat / recon-real use [Wr; Wi], recon-imag uses [-Wi; Wr]
    Wcat = jnp.concatenate([Wr_p, Wi_p], axis=0)             # (2*Hp, N)
    Wrec_i = jnp.concatenate([-Wi_p, Wr_p], axis=0)          # (2*Hp, N)
    # chunked view of W rows: chunk c needs z columns [c*n_i, (c+1)*n_i)
    Wz = jnp.concatenate([Wr_p.reshape(num_chunks, n_i, N),
                          Wi_p.reshape(num_chunks, n_i, N)], axis=1)   # (C, 2*n_i, N)

    # Hadamard products of weight-row pairs scattered into the full Hp*Hp grid;
    # non-upper-tri / padded rows stay zero => those beta columns are exactly 0,
    # so the in-kernel ||beta||^2 equals the norm over the P triu pairs.
    wwr = Wr[iu] * Wr[ju] - Wi[iu] * Wi[ju]                  # (P, N)
    wwi = Wr[iu] * Wi[ju] + Wi[iu] * Wr[ju]
    WWr = jnp.zeros((HH, N), jnp.float32).at[flat_idx].set(wwr)
    WWi = jnp.zeros((HH, N), jnp.float32).at[flat_idx].set(wwi)
    WW = jnp.concatenate([WWr.reshape(num_chunks, CH, N),
                          WWi.reshape(num_chunks, CH, N)], axis=1)     # (C, 2*CH, N)
    mxu_dtype = jnp.bfloat16 if use_bf16_mxu else jnp.float32
    WW = WW.astype(mxu_dtype)

    # fixed Hp-periodic replication operators (block-diag for the real|imag halves)
    rep = np.zeros((n_i, CH), np.float32)
    rep[np.arange(CH) // Hp, np.arange(CH)] = 1.0            # i-broadcast operator
    tile = np.zeros((Hp, group_lanes), np.float32)
    tile[np.arange(group_lanes) % Hp, np.arange(group_lanes)] = 1.0    # j-tile operator
    rep2 = np.zeros((2 * n_i, 2 * CH), np.float32)
    rep2[:n_i, :CH] = rep
    rep2[n_i:, CH:] = rep
    tile2 = np.zeros((2 * Hp, 2 * group_lanes), np.float32)
    tile2[:Hp, :group_lanes] = tile
    tile2[Hp:, group_lanes:] = tile

    return dict(H=H, N=N, Hp=Hp, HH=HH, CH=CH, num_chunks=num_chunks, n_i=n_i,
                group_lanes=group_lanes, flat_idx=flat_idx, mxu_dtype=mxu_dtype,
                Wcat=Wcat, Wrec_i=Wrec_i, Wz=Wz, WW=WW,
                rep2=jnp.asarray(rep2), tile2=jnp.asarray(tile2))


def bispectral_embedding_forward(x, weights, *, tb_target=512):
    """x: (B, size_in) f32.  Returns (out c64 (B, P), recon c64 (B, size_in))."""
    B, N = x.shape
    Hp, HH, CH = weights["Hp"], weights["HH"], weights["CH"]
    n_i, num_chunks = weights["n_i"], weights["num_chunks"]
    group_lanes = weights["group_lanes"]
    mxu_dtype = weights["mxu_dtype"]
    esz = jnp.dtype(mxu_dtype).itemsize

    # ---- generation-aware batch tile (v5e/v6e: 128 MiB VMEM, v7x: 64 MiB) ----
    try:
        vmem_cap = int(pltpu.get_tpu_info().vmem_capacity_bytes)
    except Exception:
        vmem_cap = 64 * 1024 * 1024
    budget = vmem_cap // 2
    fixed = (2 * (2 * CH * N) * esz           # WW chunk, double-buffered
             + 2 * (2 * n_i * N) * 4          # Wz chunk, double-buffered
             + 2 * (2 * Hp * N) * 4           # Wcat + Wrec_i (VMEM-resident)
             + (2 * n_i) * (2 * CH) * 4       # rep2
             + (2 * Hp) * (2 * group_lanes) * 4)
    per_row = 2 * (N * esz + 2 * CH * 4 + 2 * N * 4 + 4)   # x + (br,bi) + (rr,ri) + ssq
    TB = min(tb_target, max(8, (budget - fixed) // per_row))
    TB = min(TB, _round_up(B, 8))
    TB = max(8, (TB // 8) * 8)
    if B > 8 and -(-B // TB) < 2:
        TB = max(8, _round_up(-(-B // 2), 8))   # >=2 tiles so both v7x TCs get work
    num_btiles = -(-B // TB)
    B_pad = num_btiles * TB

    xk = x.astype(mxu_dtype)
    if B_pad != B:
        xk = jnp.pad(xk, ((0, B_pad - B), (0, 0)))

    kernel = functools.partial(_bispectral_kernel, ch=CH, group_lanes=group_lanes)

    grid = (num_btiles, num_chunks)
    out_shape = (jax.ShapeDtypeStruct((B_pad, HH), jnp.float32),
                 jax.ShapeDtypeStruct((B_pad, HH), jnp.float32),
                 jax.ShapeDtypeStruct((B_pad, 1), jnp.float32),
                 jax.ShapeDtypeStruct((B_pad, N), jnp.float32),
                 jax.ShapeDtypeStruct((B_pad, N), jnp.float32))
    out_specs = (pl.BlockSpec((TB, CH), lambda b, c: (b, c)),
                 pl.BlockSpec((TB, CH), lambda b, c: (b, c)),
                 pl.BlockSpec((TB, 1), lambda b, c: (b, 0)),
                 pl.BlockSpec((TB, N), lambda b, c: (b, 0)),
                 pl.BlockSpec((TB, N), lambda b, c: (b, 0)))

    mm_flops = B_pad * (4 * N * HH + 4 * n_i * HH + 8 * Hp * group_lanes
                        + num_chunks * (4 * N * Hp + 4 * N * n_i) + 8 * Hp * N)
    cost = pl.CostEstimate(
        flops=int(mm_flops + 14 * B_pad * HH),
        transcendentals=0,
        bytes_accessed=int(4 * (2 * B_pad * HH + 3 * B_pad * N + B_pad)
                           + num_btiles * 2 * HH * N * esz))
    vmem_limit = max(32 << 20, min(vmem_cap * 3 // 4, 112 << 20))

    def _call(vmem_resident_weights):
        if vmem_resident_weights:
            # grid-invariant weight stacks: whole array resident in VMEM once
            # (no per-grid-step double-buffering)
            wspec = pl.BlockSpec(memory_space=pltpu.MemorySpace.VMEM)
            wcat_spec = wrec_spec = rep_spec = tile_spec = wspec
        else:
            wcat_spec = pl.BlockSpec((2 * Hp, N), lambda b, c: (0, 0))
            wrec_spec = pl.BlockSpec((2 * Hp, N), lambda b, c: (0, 0))
            rep_spec = pl.BlockSpec((2 * n_i, 2 * CH), lambda b, c: (0, 0))
            tile_spec = pl.BlockSpec((2 * Hp, 2 * group_lanes), lambda b, c: (0, 0))
        in_specs = [pl.BlockSpec((TB, N), lambda b, c: (b, 0)),
                    pl.BlockSpec((1, 2 * n_i, N), lambda b, c: (c, 0, 0)),
                    pl.BlockSpec((1, 2 * CH, N), lambda b, c: (c, 0, 0)),
                    wcat_spec, wrec_spec, rep_spec, tile_spec]
        return pl.pallas_call(
            kernel,
            out_shape=out_shape,
            grid=grid,
            in_specs=in_specs,
            out_specs=out_specs,
            compiler_params=pltpu.CompilerParams(
                dimension_semantics=("parallel", "arbitrary"),
                vmem_limit_bytes=int(vmem_limit)),
            cost_estimate=cost,
        )(xk, weights["Wz"], weights["WW"], weights["Wcat"], weights["Wrec_i"],
          weights["rep2"], weights["tile2"])

    try:
        br, bi, ssq, rr, ri = _call(True)
    except Exception:
        # fallback: plain (double-buffered) blocked specs for the small weight stacks
        br, bi, ssq, rr, ri = _call(False)

    # CplxToComplex + RowNorm (1/||.|| folded into the triu gather; norm is only
    # evaluated on real rows, so padded rows never divide by zero) + triu gather.
    flat_idx = weights["flat_idx"]
    norm = jnp.sqrt(ssq[:B])
    out = (br[:B] + 1j * bi[:B])[:, flat_idx] / norm          # (B, P) complex64
    recon = rr[:B] + 1j * ri[:B]                              # (B, size_in) complex64
    return out, recon


def reference(x, Wr, Wi):
    """Pure-JAX reference of the same forward (for correctness check)."""
    W = (Wr + 1j * Wi).astype(jnp.complex64)
    xc = x.astype(jnp.complex64)
    z = xc @ W.T
    iu, ju = np.triu_indices(W.shape[0])
    zz = z[:, iu] * z[:, ju]
    ww = W[iu] * W[ju]
    p = xc @ ww.T
    out = zz * jnp.conj(p)
    out = out / jnp.linalg.norm(out, axis=-1, keepdims=True)
    recon = z @ jnp.conj(W)
    return out, recon


if __name__ == "__main__":
    key = jax.random.PRNGKey(0)
    # B=256 gives a 2-step "parallel" batch grid (TB=128); size_in=hdim=16 keeps the
    # per-row problem tiny (P=136) while still exercising the grouped pair layout.
    B, size_in, hdim = 256, 16, 16
    kx, kr, ki = jax.random.split(key, 3)

    x = jax.random.normal(kx, (B, size_in), dtype=jnp.float32)
    # TODO(synk): cplx_trabelsi_independent_ (semi-unitary complex init) replaced by a
    # deterministic scaled complex Gaussian; only the init distribution differs, not
    # the forward-pass math.
    scale = 1.0 / np.sqrt(size_in)
    Wr = scale * jax.random.normal(kr, (hdim, size_in), dtype=jnp.float32)
    Wi = scale * jax.random.normal(ki, (hdim, size_in), dtype=jnp.float32)

    weights = prepare_bispectral_weights(Wr, Wi)      # once per weight update
    out, recon = bispectral_embedding_forward(x, weights)
    jax.block_until_ready((out, recon))

    ref_out, ref_recon = reference(x, Wr, Wi)
    np.testing.assert_allclose(np.asarray(out), np.asarray(ref_out), rtol=5e-4, atol=5e-4)
    np.testing.assert_allclose(np.asarray(recon), np.asarray(ref_recon), rtol=5e-4, atol=5e-4)

    print("KERNEL_OK")
</pallas_src>

<mosaic_0001>
module attributes {stable_mosaic.version = 11 : i64} {
  func.func @_bispectral_kernel(%arg0: i32, %arg1: i32, %arg2: memref<128x16xf32, #tpu.memory_space<vmem>>, %arg3: memref<1x32x16xf32, #tpu.memory_space<vmem>>, %arg4: memref<1x512x16xf32, #tpu.memory_space<vmem>>, %arg5: memref<32x16xf32, #tpu.memory_space<vmem>>, %arg6: memref<32x16xf32, #tpu.memory_space<vmem>>, %arg7: memref<32x512xf32, #tpu.memory_space<vmem>>, %arg8: memref<32x256xf32, #tpu.memory_space<vmem>>, %arg9: memref<128x256xf32, #tpu.memory_space<vmem>>, %arg10: memref<128x256xf32, #tpu.memory_space<vmem>>, %arg11: memref<128x1xf32, #tpu.memory_space<vmem>>, %arg12: memref<128x16xf32, #tpu.memory_space<vmem>>, %arg13: memref<128x16xf32, #tpu.memory_space<vmem>>) attributes {dimension_semantics = [#tpu.dimension_semantics<parallel>, #tpu.dimension_semantics<arbitrary>], iteration_bounds = array<i64: 2, 1>, scalar_prefetch = 0 : i64, scratch_operands = 0 : i64, tpu.core_type = #tpu.core_type<tc>, window_params = [{transform_indices = @transform_0, window_bounds = array<i64: 128, 16>}, {transform_indices = @transform_1, window_bounds = array<i64: 1, 32, 16>}, {transform_indices = @transform_2, window_bounds = array<i64: 1, 512, 16>}, {pipeline_mode = #tpu.pipeline_mode<synchronous>, transform_indices = @transform_3, window_bounds = array<i64: 32, 16>}, {pipeline_mode = #tpu.pipeline_mode<synchronous>, transform_indices = @transform_4, window_bounds = array<i64: 32, 16>}, {pipeline_mode = #tpu.pipeline_mode<synchronous>, transform_indices = @transform_5, window_bounds = array<i64: 32, 512>}, {pipeline_mode = #tpu.pipeline_mode<synchronous>, transform_indices = @transform_6, window_bounds = array<i64: 32, 256>}, {transform_indices = @transform_7, window_bounds = array<i64: 128, 256>}, {transform_indices = @transform_8, window_bounds = array<i64: 128, 256>}, {transform_indices = @transform_9, window_bounds = array<i64: 128, 1>}, {transform_indices = @transform_10, window_bounds = array<i64: 128, 16>}, {transform_indices = @transform_11, window_bounds = array<i64: 128, 16>}]} {
    %c0 = arith.constant 0 : index
    %c0_0 = arith.constant 0 : index
    %0 = vector.load %arg2[%c0, %c0_0] : memref<128x16xf32, #tpu.memory_space<vmem>>, vector<128x16xf32>
    %c0_1 = arith.constant 0 : index
    %c0_2 = arith.constant 0 : index
    %1 = vector.load %arg5[%c0_1, %c0_2] : memref<32x16xf32, #tpu.memory_space<vmem>>, vector<32x16xf32>
    %cst = arith.constant dense<0.000000e+00> : vector<128x32xf32>
    %2 = tpu.matmul %0, %1, %cst {dimension_numbers = #tpu.dot_dimension_numbers<[1], [1], [0], [0], [0, 0, 1, 0], [], []>} : vector<128x16xf32>, vector<32x16xf32>, vector<128x32xf32> -> vector<128x32xf32>
    %c0_3 = arith.constant 0 : index
    %c0_4 = arith.constant 0 : index
    %c0_5 = arith.constant 0 : index
    %3 = vector.load %arg3[%c0_3, %c0_4, %c0_5] : memref<1x32x16xf32, #tpu.memory_space<vmem>>, vector<1x32x16xf32>
    %4 = vector.shape_cast %3 : vector<1x32x16xf32> to vector<32x16xf32>
    %cst_6 = arith.constant dense<0.000000e+00> : vector<128x32xf32>
    %5 = tpu.matmul %0, %4, %cst_6 {dimension_numbers = #tpu.dot_dimension_numbers<[1], [1], [0], [0], [0, 0, 1, 0], [], []>} : vector<128x16xf32>, vector<32x16xf32>, vector<128x32xf32> -> vector<128x32xf32>
    %c0_7 = arith.constant 0 : index
    %c0_8 = arith.constant 0 : index
    %6 = vector.load %arg7[%c0_7, %c0_8] : memref<32x512xf32, #tpu.memory_space<vmem>>, vector<32x512xf32>
    %cst_9 = arith.constant dense<0.000000e+00> : vector<128x512xf32>
    %7 = tpu.matmul %5, %6, %cst_9 {dimension_numbers = #tpu.dot_dimension_numbers<[1], [0], [0], [1], [0, 0, 1, 1], [], []>} : vector<128x32xf32>, vector<32x512xf32>, vector<128x512xf32> -> vector<128x512xf32>
    %c0_10 = arith.constant 0 : index
    %c0_11 = arith.constant 0 : index
    %8 = vector.load %arg8[%c0_10, %c0_11] : memref<32x256xf32, #tpu.memory_space<vmem>>, vector<32x256xf32>
    %cst_12 = arith.constant dense<0.000000e+00> : vector<128x256xf32>
    %9 = tpu.matmul %2, %8, %cst_12 {dimension_numbers = #tpu.dot_dimension_numbers<[1], [0], [0], [1], [0, 0, 1, 1], [], []>} : vector<128x32xf32>, vector<32x256xf32>, vector<128x256xf32> -> vector<128x256xf32>
    %10 = vector.extract_strided_slice %9 {offsets = [0, 0], sizes = [128, 128], strides = [1, 1]} : vector<128x256xf32> to vector<128x128xf32>
    %11 = vector.extract_strided_slice %9 {offsets = [0, 128], sizes = [128, 128], strides = [1, 1]} : vector<128x256xf32> to vector<128x128xf32>
    %c0_13 = arith.constant 0 : index
    %c0_14 = arith.constant 0 : index
    %c0_15 = arith.constant 0 : index
    %12 = vector.load %arg4[%c0_13, %c0_14, %c0_15] : memref<1x512x16xf32, #tpu.memory_space<vmem>>, vector<1x512x16xf32>
    %13 = vector.shape_cast %12 : vector<1x512x16xf32> to vector<512x16xf32>
    %cst_16 = arith.constant dense<0.000000e+00> : vector<128x512xf32>
    %14 = tpu.matmul %0, %13, %cst_16 {dimension_numbers = #tpu.dot_dimension_numbers<[1], [1], [0], [0], [0, 0, 1, 0], [], []>} : vector<128x16xf32>, vector<512x16xf32>, vector<128x512xf32> -> vector<128x512xf32>
    %cst_17 = arith.constant 0.000000e+00 : f32
    %15 = vector.broadcast %cst_17 : f32 to vector<128x1xf32>
    %16 = vector.extract_strided_slice %7 {offsets = [0, 0], sizes = [128, 128], strides = [1, 1]} : vector<128x512xf32> to vector<128x128xf32>
    %17 = vector.extract_strided_slice %7 {offsets = [0, 256], sizes = [128, 128], strides = [1, 1]} : vector<128x512xf32> to vector<128x128xf32>
    %18 = arith.mulf %16, %10 : vector<128x128xf32>
    %19 = arith.mulf %17, %11 : vector<128x128xf32>
    %20 = arith.subf %18, %19 : vector<128x128xf32>
    %21 = arith.mulf %16, %11 : vector<128x128xf32>
    %22 = arith.mulf %17, %10 : vector<128x128xf32>
    %23 = arith.addf %21, %22 : vector<128x128xf32>
    %24 = vector.extract_strided_slice %14 {offsets = [0, 0], sizes = [128, 128], strides = [1, 1]} : vector<128x512xf32> to vector<128x128xf32>
    %25 = vector.extract_strided_slice %14 {offsets = [0, 256], sizes = [128, 128], strides = [1, 1]} : vector<128x512xf32> to vector<128x128xf32>
    %26 = arith.mulf %20, %24 : vector<128x128xf32>
    %27 = arith.mulf %23, %25 : vector<128x128xf32>
    %28 = arith.addf %26, %27 : vector<128x128xf32>
    %29 = arith.mulf %23, %24 : vector<128x128xf32>
    %30 = arith.mulf %20, %25 : vector<128x128xf32>
    %31 = arith.subf %29, %30 : vector<128x128xf32>
    %c0_18 = arith.constant 0 : index
    %c0_19 = arith.constant 0 : index
    %32 = vector.load %arg9[%c0_18, %c0_19] : memref<128x256xf32, #tpu.memory_space<vmem>>, vector<128x128xf32>
    tpu.vector_store %arg9[%c0_18, %c0_19], %28 {strides = array<i32>} : memref<128x256xf32, #tpu.memory_space<vmem>>, vector<128x128xf32>,
    %c0_20 = arith.constant 0 : index
    %c0_21 = arith.constant 0 : index
    %33 = vector.load %arg10[%c0_20, %c0_21] : memref<128x256xf32, #tpu.memory_space<vmem>>, vector<128x128xf32>
    tpu.vector_store %arg10[%c0_20, %c0_21], %31 {strides = array<i32>} : memref<128x256xf32, #tpu.memory_space<vmem>>, vector<128x128xf32>,
    %34 = arith.mulf %28, %28 : vector<128x128xf32>
    %35 = arith.mulf %31, %31 : vector<128x128xf32>
    %36 = arith.addf %34, %35 : vector<128x128xf32>
    %cst_22 = arith.constant dense<0.000000e+00> : vector<128xf32>
    %37 = vector.multi_reduction <add>, %36, %cst_22 [1] : vector<128x128xf32> to vector<128xf32>
    %38 = vector.shape_cast %37 : vector<128xf32> to vector<128x1xf32>
    %39 = arith.addf %15, %38 : vector<128x1xf32>
    %40 = vector.extract_strided_slice %7 {offsets = [0, 128], sizes = [128, 128], strides = [1, 1]} : vector<128x512xf32> to vector<128x128xf32>
    %41 = vector.extract_strided_slice %7 {offsets = [0, 384], sizes = [128, 128], strides = [1, 1]} : vector<128x512xf32> to vector<128x128xf32>
    %42 = arith.mulf %40, %10 : vector<128x128xf32>
    %43 = arith.mulf %41, %11 : vector<128x128xf32>
    %44 = arith.subf %42, %43 : vector<128x128xf32>
    %45 = arith.mulf %40, %11 : vector<128x128xf32>
    %46 = arith.mulf %41, %10 : vector<128x128xf32>
    %47 = arith.addf %45, %46 : vector<128x128xf32>
    %48 = vector.extract_strided_slice %14 {offsets = [0, 128], sizes = [128, 128], strides = [1, 1]} : vector<128x512xf32> to vector<128x128xf32>
    %49 = vector.extract_strided_slice %14 {offsets = [0, 384], sizes = [128, 128], strides = [1, 1]} : vector<128x512xf32> to vector<128x128xf32>
    %50 = arith.mulf %44, %48 : vector<128x128xf32>
    %51 = arith.mulf %47, %49 : vector<128x128xf32>
    %52 = arith.addf %50, %51 : vector<128x128xf32>
    %53 = arith.mulf %47, %48 : vector<128x128xf32>
    %54 = arith.mulf %44, %49 : vector<128x128xf32>
    %55 = arith.subf %53, %54 : vector<128x128xf32>
    %c0_23 = arith.constant 0 : index
    %c128 = arith.constant 128 : index
    %56 = vector.load %arg9[%c0_23, %c128] : memref<128x256xf32, #tpu.memory_space<vmem>>, vector<128x128xf32>
    tpu.vector_store %arg9[%c0_23, %c128], %52 {strides = array<i32>} : memref<128x256xf32, #tpu.memory_space<vmem>>, vector<128x128xf32>,
    %c0_24 = arith.constant 0 : index
    %c128_25 = arith.constant 128 : index
    %57 = vector.load %arg10[%c0_24, %c128_25] : memref<128x256xf32, #tpu.memory_space<vmem>>, vector<128x128xf32>
    tpu.vector_store %arg10[%c0_24, %c128_25], %55 {strides = array<i32>} : memref<128x256xf32, #tpu.memory_space<vmem>>, vector<128x128xf32>,
    %58 = arith.mulf %52, %52 : vector<128x128xf32>
    %59 = arith.mulf %55, %55 : vector<128x128xf32>
    %60 = arith.addf %58, %59 : vector<128x128xf32>
    %cst_26 = arith.constant dense<0.000000e+00> : vector<128xf32>
    %61 = vector.multi_reduction <add>, %60, %cst_26 [1] : vector<128x128xf32> to vector<128xf32>
    %62 = vector.shape_cast %61 : vector<128xf32> to vector<128x1xf32>
    %63 = arith.addf %39, %62 : vector<128x1xf32>
    %c0_i32 = arith.constant 0 : i32
    %64 = arith.cmpi eq, %arg1, %c0_i32 : i32
    %65 = arith.extui %64 : i1 to i32
    %c0_i32_27 = arith.constant 0 : i32
    %66 = arith.cmpi ne, %65, %c0_i32_27 : i32
    scf.if %66 {
      %cst_34 = arith.constant 0.000000e+00 : f32
      %73 = vector.broadcast %cst_34 : f32 to vector<128x1xf32>
      %c0_35 = arith.constant 0 : index
      %c0_36 = arith.constant 0 : index
      %74 = vector.load %arg11[%c0_35, %c0_36] : memref<128x1xf32, #tpu.memory_space<vmem>>, vector<128x1xf32>
      tpu.vector_store %arg11[%c0_35, %c0_36], %73 {strides = array<i32>} : memref<128x1xf32, #tpu.memory_space<vmem>>, vector<128x1xf32>,
    } else {
    }
    %c0_28 = arith.constant 0 : index
    %c0_29 = arith.constant 0 : index
    %67 = vector.load %arg11[%c0_28, %c0_29] : memref<128x1xf32, #tpu.memory_space<vmem>>, vector<128x1xf32>
    %68 = arith.addf %67, %63 : vector<128x1xf32>
    %c0_30 = arith.constant 0 : index
    %c0_31 = arith.constant 0 : index
    %69 = vector.load %arg11[%c0_30, %c0_31] : memref<128x1xf32, #tpu.memory_space<vmem>>, vector<128x1xf32>
    tpu.vector_store %arg11[%c0_30, %c0_31], %68 {strides = array<i32>} : memref<128x1xf32, #tpu.memory_space<vmem>>, vector<128x1xf32>,
    %c0_i32_32 = arith.constant 0 : i32
    %70 = arith.cmpi eq, %arg1, %c0_i32_32 : i32
    %71 = arith.extui %70 : i1 to i32
    %c0_i32_33 = arith.constant 0 : i32
    %72 = arith.cmpi ne, %71, %c0_i32_33 : i32
    scf.if %72 {
      %cst_34 = arith.constant dense<0.000000e+00> : vector<128x16xf32>
      %73 = tpu.matmul %2, %1, %cst_34 {dimension_numbers = #tpu.dot_dimension_numbers<[1], [0], [0], [1], [0, 0, 1, 1], [], []>} : vector<128x32xf32>, vector<32x16xf32>, vector<128x16xf32> -> vector<128x16xf32>
      %c0_35 = arith.constant 0 : index
      %c0_36 = arith.constant 0 : index
      %74 = vector.load %arg12[%c0_35, %c0_36] : memref<128x16xf32, #tpu.memory_space<vmem>>, vector<128x16xf32>
      tpu.vector_store %arg12[%c0_35, %c0_36], %73 {strides = array<i32>} : memref<128x16xf32, #tpu.memory_space<vmem>>, vector<128x16xf32>,
      %c0_37 = arith.constant 0 : index
      %c0_38 = arith.constant 0 : index
      %75 = vector.load %arg6[%c0_37, %c0_38] : memref<32x16xf32, #tpu.memory_space<vmem>>, vector<32x16xf32>
      %cst_39 = arith.constant dense<0.000000e+00> : vector<128x16xf32>
      %76 = tpu.matmul %2, %75, %cst_39 {dimension_numbers = #tpu.dot_dimension_numbers<[1], [0], [0], [1], [0, 0, 1, 1], [], []>} : vector<128x32xf32>, vector<32x16xf32>, vector<128x16xf32> -> vector<128x16xf32>
      %c0_40 = arith.constant 0 : index
      %c0_41 = arith.constant 0 : index
      %77 = vector.load %arg13[%c0_40, %c0_41] : memref<128x16xf32, #tpu.memory_space<vmem>>, vector<128x16xf32>
      tpu.vector_store %arg13[%c0_40, %c0_41], %76 {strides = array<i32>} : memref<128x16xf32, #tpu.memory_space<vmem>>, vector<128x16xf32>,
    } else {
    }
    return
  }
  func.func @transform_0(%arg0: i32, %arg1: i32) -> (i32, i32) {
    %c0_i32 = arith.constant 0 : i32
    %c0_i32_0 = arith.constant 0 : i32
    return %arg0, %c0_i32 : i32, i32
  }
  func.func @transform_1(%arg0: i32, %arg1: i32) -> (i32, i32, i32) {
    %c0_i32 = arith.constant 0 : i32
    %c0_i32_0 = arith.constant 0 : i32
    %c0_i32_1 = arith.constant 0 : i32
    return %arg1, %c0_i32, %c0_i32_0 : i32, i32, i32
  }
  func.func @transform_2(%arg0: i32, %arg1: i32) -> (i32, i32, i32) {
    %c0_i32 = arith.constant 0 : i32
    %c0_i32_0 = arith.constant 0 : i32
    %c0_i32_1 = arith.constant 0 : i32
    return %arg1, %c0_i32, %c0_i32_0 : i32, i32, i32
  }
  func.func @transform_3(%arg0: i32, %arg1: i32) -> (i32, i32) {
    %c0_i32 = arith.constant 0 : i32
    %c0_i32_0 = arith.constant 0 : i32
    %c0_i32_1 = arith.constant 0 : i32
    return %c0_i32, %c0_i32_0 : i32, i32
  }
  func.func @transform_4(%arg0: i32, %arg1: i32) -> (i32, i32) {
    %c0_i32 = arith.constant 0 : i32
    %c0_i32_0 = arith.constant 0 : i32
    %c0_i32_1 = arith.constant 0 : i32
    return %c0_i32, %c0_i32_0 : i32, i32
  }
  func.func @transform_5(%arg0: i32, %arg1: i32) -> (i32, i32) {
    %c0_i32 = arith.constant 0 : i32
    %c0_i32_0 = arith.constant 0 : i32
    %c0_i32_1 = arith.constant 0 : i32
    return %c0_i32, %c0_i32_0 : i32, i32
  }
  func.func @transform_6(%arg0: i32, %arg1: i32) -> (i32, i32) {
    %c0_i32 = arith.constant 0 : i32
    %c0_i32_0 = arith.constant 0 : i32
    %c0_i32_1 = arith.constant 0 : i32
    return %c0_i32, %c0_i32_0 : i32, i32
  }
  func.func @transform_7(%arg0: i32, %arg1: i32) -> (i32, i32) {
    %c0_i32 = arith.constant 0 : i32
    return %arg0, %arg1 : i32, i32
  }
  func.func @transform_8(%arg0: i32, %arg1: i32) -> (i32, i32) {
    %c0_i32 = arith.constant 0 : i32
    return %arg0, %arg1 : i32, i32
  }
  func.func @transform_9(%arg0: i32, %arg1: i32) -> (i32, i32) {
    %c0_i32 = arith.constant 0 : i32
    %c0_i32_0 = arith.constant 0 : i32
    return %arg0, %c0_i32 : i32, i32
  }
  func.func @transform_10(%arg0: i32, %arg1: i32) -> (i32, i32) {
    %c0_i32 = arith.constant 0 : i32
    %c0_i32_0 = arith.constant 0 : i32
    return %arg0, %c0_i32 : i32, i32
  }
  func.func @transform_11(%arg0: i32, %arg1: i32) -> (i32, i32) {
    %c0_i32 = arith.constant 0 : i32
    %c0_i32_0 = arith.constant 0 : i32
    return %arg0, %c0_i32 : i32, i32
  }
}

module attributes {stable_mosaic.version = 11 : i64} {
  func.func @_bispectral_kernel(%arg0: i32, %arg1: i32, %arg2: memref<128x16xf32, #tpu.memory_space<vmem>>, %arg3: memref<1x32x16xf32, #tpu.memory_space<vmem>>, %arg4: memref<1x512x16xf32, #tpu.memory_space<vmem>>, %arg5: memref<32x16xf32, #tpu.memory_space<vmem>>, %arg6: memref<32x16xf32, #tpu.memory_space<vmem>>, %arg7: memref<32x512xf32, #tpu.memory_space<vmem>>, %arg8: memref<32x256xf32, #tpu.memory_space<vmem>>, %arg9: memref<128x256xf32, #tpu.memory_space<vmem>>, %arg10: memref<128x256xf32, #tpu.memory_space<vmem>>, %arg11: memref<128x1xf32, #tpu.memory_space<vmem>>, %arg12: memref<128x16xf32, #tpu.memory_space<vmem>>, %arg13: memref<128x16xf32, #tpu.memory_space<vmem>>) attributes {dimension_semantics = [#tpu.dimension_semantics<parallel>, #tpu.dimension_semantics<arbitrary>], iteration_bounds = array<i64: 2, 1>, scalar_prefetch = 0 : i64, scratch_operands = 0 : i64, tpu.core_type = #tpu.core_type<tc>, window_params = [{transform_indices = @transform_0, window_bounds = array<i64: 128, 16>}, {transform_indices = @transform_1, window_bounds = array<i64: 1, 32, 16>}, {transform_indices = @transform_2, window_bounds = array<i64: 1, 512, 16>}, {pipeline_mode = #tpu.pipeline_mode<synchronous>, transform_indices = @transform_3, window_bounds = array<i64: 32, 16>}, {pipeline_mode = #tpu.pipeline_mode<synchronous>, transform_indices = @transform_4, window_bounds = array<i64: 32, 16>}, {pipeline_mode = #tpu.pipeline_mode<synchronous>, transform_indices = @transform_5, window_bounds = array<i64: 32, 512>}, {pipeline_mode = #tpu.pipeline_mode<synchronous>, transform_indices = @transform_6, window_bounds = array<i64: 32, 256>}, {transform_indices = @transform_7, window_bounds = array<i64: 128, 256>}, {transform_indices = @transform_8, window_bounds = array<i64: 128, 256>}, {transform_indices = @transform_9, window_bounds = array<i64: 128, 1>}, {transform_indices = @transform_10, window_bounds = array<i64: 128, 16>}, {transform_indices = @transform_11, window_bounds = array<i64: 128, 16>}]} {
    %c0 = arith.constant 0 : index
    %c0_0 = arith.constant 0 : index
    %0 = vector.load %arg2[%c0, %c0_0] : memref<128x16xf32, #tpu.memory_space<vmem>>, vector<128x16xf32>
    %c0_1 = arith.constant 0 : index
    %c0_2 = arith.constant 0 : index
    %1 = vector.load %arg5[%c0_1, %c0_2] : memref<32x16xf32, #tpu.memory_space<vmem>>, vector<32x16xf32>
    %cst = arith.constant dense<0.000000e+00> : vector<128x32xf32>
    %2 = tpu.matmul %0, %1, %cst {dimension_numbers = #tpu.dot_dimension_numbers<[1], [1], [0], [0], [0, 0, 1, 0], [], []>} : vector<128x16xf32>, vector<32x16xf32>, vector<128x32xf32> -> vector<128x32xf32>
    %c0_3 = arith.constant 0 : index
    %c0_4 = arith.constant 0 : index
    %c0_5 = arith.constant 0 : index
    %3 = vector.load %arg3[%c0_3, %c0_4, %c0_5] : memref<1x32x16xf32, #tpu.memory_space<vmem>>, vector<1x32x16xf32>
    %4 = vector.shape_cast %3 : vector<1x32x16xf32> to vector<32x16xf32>
    %cst_6 = arith.constant dense<0.000000e+00> : vector<128x32xf32>
    %5 = tpu.matmul %0, %4, %cst_6 {dimension_numbers = #tpu.dot_dimension_numbers<[1], [1], [0], [0], [0, 0, 1, 0], [], []>} : vector<128x16xf32>, vector<32x16xf32>, vector<128x32xf32> -> vector<128x32xf32>
    %c0_7 = arith.constant 0 : index
    %c0_8 = arith.constant 0 : index
    %6 = vector.load %arg7[%c0_7, %c0_8] : memref<32x512xf32, #tpu.memory_space<vmem>>, vector<32x512xf32>
    %cst_9 = arith.constant dense<0.000000e+00> : vector<128x512xf32>
    %7 = tpu.matmul %5, %6, %cst_9 {dimension_numbers = #tpu.dot_dimension_numbers<[1], [0], [0], [1], [0, 0, 1, 1], [], []>} : vector<128x32xf32>, vector<32x512xf32>, vector<128x512xf32> -> vector<128x512xf32>
    %c0_10 = arith.constant 0 : index
    %c0_11 = arith.constant 0 : index
    %8 = vector.load %arg8[%c0_10, %c0_11] : memref<32x256xf32, #tpu.memory_space<vmem>>, vector<32x256xf32>
    %cst_12 = arith.constant dense<0.000000e+00> : vector<128x256xf32>
    %9 = tpu.matmul %2, %8, %cst_12 {dimension_numbers = #tpu.dot_dimension_numbers<[1], [0], [0], [1], [0, 0, 1, 1], [], []>} : vector<128x32xf32>, vector<32x256xf32>, vector<128x256xf32> -> vector<128x256xf32>
    %10 = vector.extract_strided_slice %9 {offsets = [0, 0], sizes = [128, 128], strides = [1, 1]} : vector<128x256xf32> to vector<128x128xf32>
    %11 = vector.extract_strided_slice %9 {offsets = [0, 128], sizes = [128, 128], strides = [1, 1]} : vector<128x256xf32> to vector<128x128xf32>
    %c0_13 = arith.constant 0 : index
    %c0_14 = arith.constant 0 : index
    %c0_15 = arith.constant 0 : index
    %12 = vector.load %arg4[%c0_13, %c0_14, %c0_15] : memref<1x512x16xf32, #tpu.memory_space<vmem>>, vector<1x512x16xf32>
    %13 = vector.shape_cast %12 : vector<1x512x16xf32> to vector<512x16xf32>
    %cst_16 = arith.constant dense<0.000000e+00> : vector<128x512xf32>
    %14 = tpu.matmul %0, %13, %cst_16 {dimension_numbers = #tpu.dot_dimension_numbers<[1], [1], [0], [0], [0, 0, 1, 0], [], []>} : vector<128x16xf32>, vector<512x16xf32>, vector<128x512xf32> -> vector<128x512xf32>
    %cst_17 = arith.constant 0.000000e+00 : f32
    %15 = vector.broadcast %cst_17 : f32 to vector<128x1xf32>
    %16 = vector.extract_strided_slice %7 {offsets = [0, 0], sizes = [128, 128], strides = [1, 1]} : vector<128x512xf32> to vector<128x128xf32>
    %17 = vector.extract_strided_slice %7 {offsets = [0, 256], sizes = [128, 128], strides = [1, 1]} : vector<128x512xf32> to vector<128x128xf32>
    %18 = arith.mulf %16, %10 : vector<128x128xf32>
    %19 = arith.mulf %17, %11 : vector<128x128xf32>
    %20 = arith.subf %18, %19 : vector<128x128xf32>
    %21 = arith.mulf %16, %11 : vector<128x128xf32>
    %22 = arith.mulf %17, %10 : vector<128x128xf32>
    %23 = arith.addf %21, %22 : vector<128x128xf32>
    %24 = vector.extract_strided_slice %14 {offsets = [0, 0], sizes = [128, 128], strides = [1, 1]} : vector<128x512xf32> to vector<128x128xf32>
    %25 = vector.extract_strided_slice %14 {offsets = [0, 256], sizes = [128, 128], strides = [1, 1]} : vector<128x512xf32> to vector<128x128xf32>
    %26 = arith.mulf %20, %24 : vector<128x128xf32>
    %27 = arith.mulf %23, %25 : vector<128x128xf32>
    %28 = arith.addf %26, %27 : vector<128x128xf32>
    %29 = arith.mulf %23, %24 : vector<128x128xf32>
    %30 = arith.mulf %20, %25 : vector<128x128xf32>
    %31 = arith.subf %29, %30 : vector<128x128xf32>
    %c0_18 = arith.constant 0 : index
    %c0_19 = arith.constant 0 : index
    %32 = vector.load %arg9[%c0_18, %c0_19] : memref<128x256xf32, #tpu.memory_space<vmem>>, vector<128x128xf32>
    tpu.vector_store %arg9[%c0_18, %c0_19], %28 {strides = array<i32>} : memref<128x256xf32, #tpu.memory_space<vmem>>, vector<128x128xf32>,
    %c0_20 = arith.constant 0 : index
    %c0_21 = arith.constant 0 : index
    %33 = vector.load %arg10[%c0_20, %c0_21] : memref<128x256xf32, #tpu.memory_space<vmem>>, vector<128x128xf32>
    tpu.vector_store %arg10[%c0_20, %c0_21], %31 {strides = array<i32>} : memref<128x256xf32, #tpu.memory_space<vmem>>, vector<128x128xf32>,
    %34 = arith.mulf %28, %28 : vector<128x128xf32>
    %35 = arith.mulf %31, %31 : vector<128x128xf32>
    %36 = arith.addf %34, %35 : vector<128x128xf32>
    %cst_22 = arith.constant dense<0.000000e+00> : vector<128xf32>
    %37 = vector.multi_reduction <add>, %36, %cst_22 [1] : vector<128x128xf32> to vector<128xf32>
    %38 = vector.shape_cast %37 : vector<128xf32> to vector<128x1xf32>
    %39 = arith.addf %15, %38 : vector<128x1xf32>
    %40 = vector.extract_strided_slice %7 {offsets = [0, 128], sizes = [128, 128], strides = [1, 1]} : vector<128x512xf32> to vector<128x128xf32>
    %41 = vector.extract_strided_slice %7 {offsets = [0, 384], sizes = [128, 128], strides = [1, 1]} : vector<128x512xf32> to vector<128x128xf32>
    %42 = arith.mulf %40, %10 : vector<128x128xf32>
    %43 = arith.mulf %41, %11 : vector<128x128xf32>
    %44 = arith.subf %42, %43 : vector<128x128xf32>
    %45 = arith.mulf %40, %11 : vector<128x128xf32>
    %46 = arith.mulf %41, %10 : vector<128x128xf32>
    %47 = arith.addf %45, %46 : vector<128x128xf32>
    %48 = vector.extract_strided_slice %14 {offsets = [0, 128], sizes = [128, 128], strides = [1, 1]} : vector<128x512xf32> to vector<128x128xf32>
    %49 = vector.extract_strided_slice %14 {offsets = [0, 384], sizes = [128, 128], strides = [1, 1]} : vector<128x512xf32> to vector<128x128xf32>
    %50 = arith.mulf %44, %48 : vector<128x128xf32>
    %51 = arith.mulf %47, %49 : vector<128x128xf32>
    %52 = arith.addf %50, %51 : vector<128x128xf32>
    %53 = arith.mulf %47, %48 : vector<128x128xf32>
    %54 = arith.mulf %44, %49 : vector<128x128xf32>
    %55 = arith.subf %53, %54 : vector<128x128xf32>
    %c0_23 = arith.constant 0 : index
    %c128 = arith.constant 128 : index
    %56 = vector.load %arg9[%c0_23, %c128] : memref<128x256xf32, #tpu.memory_space<vmem>>, vector<128x128xf32>
    tpu.vector_store %arg9[%c0_23, %c128], %52 {strides = array<i32>} : memref<128x256xf32, #tpu.memory_space<vmem>>, vector<128x128xf32>,
    %c0_24 = arith.constant 0 : index
    %c128_25 = arith.constant 128 : index
    %57 = vector.load %arg10[%c0_24, %c128_25] : memref<128x256xf32, #tpu.memory_space<vmem>>, vector<128x128xf32>
    tpu.vector_store %arg10[%c0_24, %c128_25], %55 {strides = array<i32>} : memref<128x256xf32, #tpu.memory_space<vmem>>, vector<128x128xf32>,
    %58 = arith.mulf %52, %52 : vector<128x128xf32>
    %59 = arith.mulf %55, %55 : vector<128x128xf32>
    %60 = arith.addf %58, %59 : vector<128x128xf32>
    %cst_26 = arith.constant dense<0.000000e+00> : vector<128xf32>
    %61 = vector.multi_reduction <add>, %60, %cst_26 [1] : vector<128x128xf32> to vector<128xf32>
    %62 = vector.shape_cast %61 : vector<128xf32> to vector<128x1xf32>
    %63 = arith.addf %39, %62 : vector<128x1xf32>
    %c0_i32 = arith.constant 0 : i32
    %64 = arith.cmpi eq, %arg1, %c0_i32 : i32
    %65 = arith.extui %64 : i1 to i32
    %c0_i32_27 = arith.constant 0 : i32
    %66 = arith.cmpi ne, %65, %c0_i32_27 : i32
    scf.if %66 {
      %cst_34 = arith.constant 0.000000e+00 : f32
      %73 = vector.broadcast %cst_34 : f32 to vector<128x1xf32>
      %c0_35 = arith.constant 0 : index
      %c0_36 = arith.constant 0 : index
      %74 = vector.load %arg11[%c0_35, %c0_36] : memref<128x1xf32, #tpu.memory_space<vmem>>, vector<128x1xf32>
      tpu.vector_store %arg11[%c0_35, %c0_36], %73 {strides = array<i32>} : memref<128x1xf32, #tpu.memory_space<vmem>>, vector<128x1xf32>,
    } else {
    }
    %c0_28 = arith.constant 0 : index
    %c0_29 = arith.constant 0 : index
    %67 = vector.load %arg11[%c0_28, %c0_29] : memref<128x1xf32, #tpu.memory_space<vmem>>, vector<128x1xf32>
    %68 = arith.addf %67, %63 : vector<128x1xf32>
    %c0_30 = arith.constant 0 : index
    %c0_31 = arith.constant 0 : index
    %69 = vector.load %arg11[%c0_30, %c0_31] : memref<128x1xf32, #tpu.memory_space<vmem>>, vector<128x1xf32>
    tpu.vector_store %arg11[%c0_30, %c0_31], %68 {strides = array<i32>} : memref<128x1xf32, #tpu.memory_space<vmem>>, vector<128x1xf32>,
    %c0_i32_32 = arith.constant 0 : i32
    %70 = arith.cmpi eq, %arg1, %c0_i32_32 : i32
    %71 = arith.extui %70 : i1 to i32
    %c0_i32_33 = arith.constant 0 : i32
    %72 = arith.cmpi ne, %71, %c0_i32_33 : i32
    scf.if %72 {
      %cst_34 = arith.constant dense<0.000000e+00> : vector<128x16xf32>
      %73 = tpu.matmul %2, %1, %cst_34 {dimension_numbers = #tpu.dot_dimension_numbers<[1], [0], [0], [1], [0, 0, 1, 1], [], []>} : vector<128x32xf32>, vector<32x16xf32>, vector<128x16xf32> -> vector<128x16xf32>
      %c0_35 = arith.constant 0 : index
      %c0_36 = arith.constant 0 : index
      %74 = vector.load %arg12[%c0_35, %c0_36] : memref<128x16xf32, #tpu.memory_space<vmem>>, vector<128x16xf32>
      tpu.vector_store %arg12[%c0_35, %c0_36], %73 {strides = array<i32>} : memref<128x16xf32, #tpu.memory_space<vmem>>, vector<128x16xf32>,
      %c0_37 = arith.constant 0 : index
      %c0_38 = arith.constant 0 : index
      %75 = vector.load %arg6[%c0_37, %c0_38] : memref<32x16xf32, #tpu.memory_space<vmem>>, vector<32x16xf32>
      %cst_39 = arith.constant dense<0.000000e+00> : vector<128x16xf32>
      %76 = tpu.matmul %2, %75, %cst_39 {dimension_numbers = #tpu.dot_dimension_numbers<[1], [0], [0], [1], [0, 0, 1, 1], [], []>} : vector<128x32xf32>, vector<32x16xf32>, vector<128x16xf32> -> vector<128x16xf32>
      %c0_40 = arith.constant 0 : index
      %c0_41 = arith.constant 0 : index
      %77 = vector.load %arg13[%c0_40, %c0_41] : memref<128x16xf32, #tpu.memory_space<vmem>>, vector<128x16xf32>
      tpu.vector_store %arg13[%c0_40, %c0_41], %76 {strides = array<i32>} : memref<128x16xf32, #tpu.memory_space<vmem>>, vector<128x16xf32>,
    } else {
    }
    return
  }
  func.func @transform_0(%arg0: i32, %arg1: i32) -> (i32, i32) {
    %c0_i32 = arith.constant 0 : i32
    %c0_i32_0 = arith.constant 0 : i32
    return %arg0, %c0_i32 : i32, i32
  }
  func.func @transform_1(%arg0: i32, %arg1: i32) -> (i32, i32, i32) {
    %c0_i32 = arith.constant 0 : i32
    %c0_i32_0 = arith.constant 0 : i32
    %c0_i32_1 = arith.constant 0 : i32
    return %arg1, %c0_i32, %c0_i32_0 : i32, i32, i32
  }
  func.func @transform_2(%arg0: i32, %arg1: i32) -> (i32, i32, i32) {
    %c0_i32 = arith.constant 0 : i32
    %c0_i32_0 = arith.constant 0 : i32
    %c0_i32_1 = arith.constant 0 : i32
    return %arg1, %c0_i32, %c0_i32_0 : i32, i32, i32
  }
  func.func @transform_3(%arg0: i32, %arg1: i32) -> (i32, i32) {
    %c0_i32 = arith.constant 0 : i32
    %c0_i32_0 = arith.constant 0 : i32
    %c0_i32_1 = arith.constant 0 : i32
    return %c0_i32, %c0_i32_0 : i32, i32
  }
  func.func @transform_4(%arg0: i32, %arg1: i32) -> (i32, i32) {
    %c0_i32 = arith.constant 0 : i32
    %c0_i32_0 = arith.constant 0 : i32
    %c0_i32_1 = arith.constant 0 : i32
    return %c0_i32, %c0_i32_0 : i32, i32
  }
  func.func @transform_5(%arg0: i32, %arg1: i32) -> (i32, i32) {
    %c0_i32 = arith.constant 0 : i32
    %c0_i32_0 = arith.constant 0 : i32
    %c0_i32_1 = arith.constant 0 : i32
    return %c0_i32, %c0_i32_0 : i32, i32
  }
  func.func @transform_6(%arg0: i32, %arg1: i32) -> (i32, i32) {
    %c0_i32 = arith.constant 0 : i32
    %c0_i32_0 = arith.constant 0 : i32
    %c0_i32_1 = arith.constant 0 : i32
    return %c0_i32, %c0_i32_0 : i32, i32
  }
  func.func @transform_7(%arg0: i32, %arg1: i32) -> (i32, i32) {
    %c0_i32 = arith.constant 0 : i32
    return %arg0, %arg1 : i32, i32
  }
  func.func @transform_8(%arg0: i32, %arg1: i32) -> (i32, i32) {
    %c0_i32 = arith.constant 0 : i32
    return %arg0, %arg1 : i32, i32
  }
  func.func @transform_9(%arg0: i32, %arg1: i32) -> (i32, i32) {
    %c0_i32 = arith.constant 0 : i32
    %c0_i32_0 = arith.constant 0 : i32
    return %arg0, %c0_i32 : i32, i32
  }
  func.func @transform_10(%arg0: i32, %arg1: i32) -> (i32, i32) {
    %c0_i32 = arith.constant 0 : i32
    %c0_i32_0 = arith.constant 0 : i32
    return %arg0, %c0_i32 : i32, i32
  }
  func.func @transform_11(%arg0: i32, %arg1: i32) -> (i32, i32) {
    %c0_i32 = arith.constant 0 : i32
    %c0_i32_0 = arith.constant 0 : i32
    return %arg0, %c0_i32 : i32, i32
  }
}

</mosaic_0001>

<bundles_post_ra>
// kernel: tpu_custom_call.1
= control target key start
LH: loop header
LB: loop body
LE: loop exit
PB: predicated region body
PF: predicated region fallthrough
CT: control target
= control target key end

     0   :  { %s5467_s0 = inlined_call_operand.vmem [shape: f32[256,16], index: 0, kind: input, shape index: {}]   ;;  %s5468_s1 = inlined_call_operand.vmem [shape: f32[1,32,16], index: 1, kind: input, shape index: {}]   ;;  %s5469_s2 = inlined_call_operand.vmem [shape: f32[1,512,16], index: 2, kind: input, shape index: {}]   ;;  %s5470_s3 = inlined_call_operand.vmem [shape: f32[32,16], index: 3, kind: input, shape index: {}]   ;;  %s5471_s4 = inlined_call_operand.vmem [shape: f32[32,16], index: 4, kind: input, shape index: {}]   ;;  %s5472_s5 = inlined_call_operand.vmem [shape: f32[32,512], index: 5, kind: input, shape index: {}]   ;;  %s5473_s6 = inlined_call_operand.vmem [shape: f32[32,256], index: 6, kind: input, shape index: {}]   ;;  %s5474_s7 = inlined_call_operand.hbm [shape: f32[256,256], index: 7, kind: output, shape index: {0}]   ;;  %s5475_s8 = inlined_call_operand.hbm [shape: f32[256,256], index: 8, kind: output, shape index: {1}]   ;;  %s5476_s9 = inlined_call_operand.vmem [shape: f32[256,1], index: 9, kind: output, shape index: {2}]   ;;  %s5477_s10 = inlined_call_operand.vmem [shape: f32[256,16], index: 10, kind: output, shape index: {3}]   ;;  %s5478_s11 = inlined_call_operand.vmem [shape: f32[256,16], index: 11, kind: output, shape index: {4}]  }
   0x1   :  { %5541 = sst [smem:[#allocation47_spill]] %s5467_s0 }
   0x2   :  { %5542 = sst [smem:[#allocation48_spill]] %s5468_s1 }
   0x3   :  { %5543 = sst [smem:[#allocation49_spill]] %s5469_s2 }
   0x4   :  { %5544 = sst [smem:[#allocation50_spill]] %s5470_s3 }
   0x5   :  { %5545 = sst [smem:[#allocation51_spill]] %s5471_s4 }
   0x6   :  { %5546 = sst [smem:[#allocation52_spill]] %s5472_s5 }
   0x7   :  { %5547 = sst [smem:[#allocation53_spill]] %s5473_s6 }
   0x8   :  { %5548 = sst [smem:[#allocation54_spill]] %s5476_s9 }
   0x9   :  { %17 = vsyncpa [#allocation3], 0 }
   0xa   :  { %19 = vsyncpa [#allocation3 + $0x1], 0 }
   0xb   :  { %20 = vsyncpa [#allocation5], 0 }
   0xc   :  { %22 = vsyncpa [#allocation5 + $0x1], 0  ;;  %s3499_s17 = smov 0   ;;  %s3501_s18 = smov 0  }
   0xd   :  { %s3503_s19 = smov 0   ;;  %s3505_s20 = smov 0  }
   0xe   :  { %s3507_s21 = smov 0   ;;  %s3509_s22 = smov 0  }
   0xf LB: > { %s2915_s23 = sadd.s32 4294967295, %s3434_s22   ;;  %s2916_s24 = sadd.s32 4294967294, %s3434_s22   ;;  %s3434_s22 = sphi %s3509_s22, %s28_s22   ;;  %s3430_s21 = sphi %s3507_s21, %s5654_s21   ;;  %s3426_s20 = sphi %s3505_s20, %s5653_s20   ;;  %s3422_s19 = sphi %s3503_s19, %s5652_s19   ;;  %s3418_s18 = sphi %s3501_s18, %s5651_s18   ;;  %s3414_s17 = sphi %s3499_s17, %s5650_s17  }
  0x10   : > { %s40_s25 = sadd.s32 1, %s3430_s21  ;;  %s211_s26 = sadd.s32 1, %s3422_s19 }
  0x11   : > { %p42_p0 = scmp.ge.s32.totalorder %s40_s25, 2  ;;  %p221_p1 = scmp.ne.s32.totalorder %s3422_s19, %s3418_s18 }
  0x12   : > { %p222_p2 = scmp.eq.s32.totalorder %s2915_s23, 1  ;;  %p227_p3 = scmp.ne.s32.totalorder %s3418_s18, %s3414_s17 }
  0x13   : > { %s5656_s25 = smov (%p42_p0, %s40_s25), 0  ;;  %p228_p5 = scmp.eq.s32.totalorder %s2916_s24, 1 }
  0x14   : > { %p3539_p4 = por %p222_p2, %p221_p1  ;;  %s206_s28 = ssub.s32 %s3430_s21, %s5656_s25 }
  0x15   : > { %p2921_p6 = scmp.ge.s32.totalorder %s3434_s22, 1  ;;  %p209_p7 = scmp.eq.s32.totalorder %s206_s28, 0 }
  0x16   : > { %p3546_p8 = por %p228_p5, %p227_p3  ;;  %p389_p9 = scmp.lt.s32.totalorder %s3434_s22, 3 }
  0x17   : > { %s3552_s30 = scalar_select %p209_p7, %s3422_s19, %s211_s26  }
  0x18   : > { %p390_p10 = pnand %p2921_p6, %p389_p9 }
  0x1a   : > { %393 = sbr.rel (%p390_p10) target bundleno = 826 (0x33a), region = 48 }
  0x1f   : > { %s5551_s3 = sld [smem:[#allocation50_spill]]  ;;  %vm517_vm0 = vcmask 130048   ;;  %s2924_s16 = sshll.u32 %s3426_s20, 4  ;;  %vm740_vm1 = vcmask 261120   ;;  %vm2395_vm2 = vcmask 7168  }
  0x20   : > { %s5552_s1 = sld [smem:[#allocation48_spill]]  ;;  %p460_p11 = scmp.lt.s32.totalorder %s2924_s16, 31 }
  0x21   : > { %s5553_s0 = sld [smem:[#allocation47_spill]]  ;;  %s5540_s26 = sshll.u32 %s3426_s20, 8 }
  0x22   : > { %s5658_s16 = smov (!%p460_p11, %s2924_s16), 31  ;;  %s5554_s5 = sld [smem:[#allocation52_spill]] }
  0x23   : > { %s3585_s23 = sshll.u32 %s5658_s16, 3  ;;  %s5558_s6 = sld [smem:[#allocation53_spill]] }
  0x24   : > { %s5568_s2 = sld [smem:[#allocation49_spill]]  ;;  %s5288_s24 = scalar_lea.vmem %s5478_s11, %s3585_s23 }
  0x25   : > { %v3557_v0 = vld [vmem:[%s5551_s3 + $0x18] sm:$0xff]  ;;  %v3569_v2 = vld [vmem:[%s5551_s3 + $0x10] sm:$0xff]  ;;  %v3580_v4 = vld [vmem:[%s5551_s3 + $0x8] sm:$0xff]  ;;  %s5573_s4 = sld [smem:[#allocation51_spill]]  ;;  %s2665_s13 = scalar_lea.hbm %s5474_s7, %s5540_s26 }
  0x26   : > { %v646_v1 = vld [vmem:[%s5552_s1 + $0x18] sm:$0xff]  ;;  %2932 = vmatpush.xpose.msk.msra.mxu0 %vm517_vm0, %v3557_v0  ;;  %v645_v3 = vld [vmem:[%s5552_s1 + $0x10] sm:$0xff]  ;;  %v644_v5 = vld [vmem:[%s5552_s1 + $0x8] sm:$0xff]  ;;  %s5630_s9 = sld [smem:[#allocation54_spill]] }
  0x27   : > { %2952 = vmatpush.xpose.msk.msra.mxu1 %vm517_vm0, %v646_v1  ;;  %v3593_v6 = vld [vmem:[%s5551_s3] sm:$0xff]  ;;  %s3602_s16 = scalar_lea.vmem %s5553_s0, %s3585_s23 }
  0x28   : > { %v643_v7 = vld [vmem:[%s5552_s1] sm:$0xff]  ;;  %v3615_v9 = vld [vmem:[%s3602_s16 + $0x8] sm:$0xff]  ;;  %v3622_v10 = vld [vmem:[%s3602_s16 + $0x10] sm:$0xff]  ;;  %s5280_s1 = scalar_lea.vmem %s5477_s10, %s3585_s23 }
  0x29   : > { %v3608_v8 = vld [vmem:[%s3602_s16] sm:$0xff]  ;;  %v3629_v11 = vld [vmem:[%s3602_s16 + $0x18] sm:$0xff]  ;;  %v3643_v13 = vld [vmem:[%s3602_s16 + $0x28] sm:$0xff] }
  0x2a   : > { %2933 = vmatpush.xpose.msk.msra.mxu0 %vm517_vm0, %v3569_v2  ;;  %v3636_v12 = vld [vmem:[%s3602_s16 + $0x20] sm:$0xff]  ;;  %v3653_v15 = vld [vmem:[%s3602_s16 + $0x30] sm:$0xff]  ;;  %v737_v16 = vld [vmem:[%s5554_s5 + $0x68] sm:$0xff] }
  0x2b   : > { %2953 = vmatpush.xpose.msk.msra.mxu1 %vm517_vm0, %v645_v3  ;;  %v736_v14 = vld [vmem:[%s5554_s5 + $0x60] sm:$0xff]  ;;  %3246 = vmatpush.msra.mxu3 %v737_v16  ;;  %v3663_v17 = vld [vmem:[%s3602_s16 + $0x38] sm:$0xff]  ;;  %v3677_v19 = vld [vmem:[%s3602_s16 + $0x48] sm:$0xff] }
  0x2c   : > { %3242 = vmatpush.msra.mxu2 %v736_v14  ;;  %v3670_v18 = vld [vmem:[%s3602_s16 + $0x40] sm:$0xff]  ;;  %v3687_v21 = vld [vmem:[%s3602_s16 + $0x50] sm:$0xff]  ;;  %v733_v22 = vld [vmem:[%s5554_s5 + $0x48] sm:$0xff]  ;;  %s5150_s28 = scalar_lea.vmem %s5630_s9, %s3585_s23  ;;  %s3344_s23 = scalar_lea.hbm %s5474_s7, 512 }
  0x2d   : > { %v732_v20 = vld [vmem:[%s5554_s5 + $0x40] sm:$0xff]  ;;  %3247 = vmatpush.msra.mxu3 %v733_v22  ;;  %v3697_v23 = vld [vmem:[%s3602_s16 + $0x58] sm:$0xff]  ;;  %v729_v25 = vld [vmem:[%s5554_s5 + $0x28] sm:$0xff] }
  0x2e   : > { %2934 = vmatpush.xpose.msk.msra.mxu0 %vm517_vm0, %v3580_v4  ;;  %3243 = vmatpush.msra.mxu2 %v732_v20  ;;  %v728_v24 = vld [vmem:[%s5554_s5 + $0x20] sm:$0xff]  ;;  %v725_v28 = vld [vmem:[%s5554_s5 + $0x8] sm:$0xff]  ;;  %v3730_v30 = vld [vmem:[%s3602_s16 + $0x70] sm:$0xff] }
  0x2f   : > { %2954 = vmatpush.xpose.msk.msra.mxu1 %vm517_vm0, %v644_v5  ;;  %v3710_v26 = vld [vmem:[%s3602_s16 + $0x60] sm:$0xff]  ;;  %3248 = vmatpush.msra.mxu3 %v729_v25  ;;  %v3723_v29 = vld [vmem:[%s3602_s16 + $0x68] sm:$0xff]  ;;  %v3737_v31 = vld [vmem:[%s3602_s16 + $0x78] sm:$0xff] }
  0x30   : > { %v724_v27 = vld [vmem:[%s5554_s5] sm:$0xff]  ;;  %3244 = vmatpush.msra.mxu2 %v728_v24  ;;  %v1055_v38 = vld [vmem:[%s5558_s6 + $0x30] sm:$0xff]  ;;  %v1056_v39 = vld [vmem:[%s5558_s6 + $0x38] sm:$0xff] }
  0x31   : > { %3249 = vmatpush.msra.mxu3 %v725_v28  ;;  %v1053_v40 = vld [vmem:[%s5558_s6 + $0x20] sm:$0xff]  ;;  %v1054_v41 = vld [vmem:[%s5558_s6 + $0x28] sm:$0xff]  ;;  %v1051_v42 = vld [vmem:[%s5558_s6 + $0x10] sm:$0xff] }
  0x32   : > { %2935 = vmatpush.xpose.msk.msra.mxu0 %vm517_vm0, %v3593_v6  ;;  %3245 = vmatpush.msra.mxu2 %v724_v27  ;;  %v1052_v43 = vld [vmem:[%s5558_s6 + $0x18] sm:$0xff]  ;;  %v738_v46 = vld [vmem:[%s5554_s5 + $0x70] sm:$0xff]  ;;  %v1049_v47 = vld [vmem:[%s5558_s6] sm:$0xff] }
  0x33   : > { %2955 = vmatpush.xpose.msk.msra.mxu1 %vm517_vm0, %v643_v7  ;;  %v1050_v48 = vld [vmem:[%s5558_s6 + $0x8] sm:$0xff]  ;;  %v739_v51 = vld [vmem:[%s5554_s5 + $0x78] sm:$0xff]  ;;  %v734_v54 = vld [vmem:[%s5554_s5 + $0x50] sm:$0xff] }
  0x34   : > { %931 = vmatpush.msrb.mxu2 %v738_v46  ;;  %996 = vmatpush.msrb.mxu3 %v739_v51  ;;  %v735_v57 = vld [vmem:[%s5554_s5 + $0x58] sm:$0xff]  ;;  %v730_v60 = vld [vmem:[%s5554_s5 + $0x30] sm:$0xff]  ;;  %v1295_v46 = vld [vmem:[%s5568_s2 + $0x1e0] sm:$0xff] }
  0x35   : > { %2936 = vmatmul.msk.f32.vlgmr.msra.gmra.mxu0 %vm517_vm0, %v3608_v8  ;;  %v731_v63 = vld [vmem:[%s5554_s5 + $0x38] sm:$0xff]  ;;  %v726_v5 = vld [vmem:[%s5554_s5 + $0x10] sm:$0xff] }
  0x36   : > { %2956 = vmatmul.msk.f32.vlgmr.msra.gmra.mxu1 %vm517_vm0, %v3608_v8  ;;  %801 = vmatpush.msrb.mxu0 %v736_v14  ;;  %v1249_v51 = vld [vmem:[%s5568_s2 + $0x70] sm:$0xff] }
  0x37   : > { %866 = vmatpush.msrb.mxu1 %v737_v16  ;;  %932 = vmatpush.msrb.mxu2 %v734_v54  ;;  %v727_v16 = vld [vmem:[%s5554_s5 + $0x18] sm:$0xff] }
  0x38   : > { %802 = vmatpush.msrb.mxu0 %v732_v20  ;;  %997 = vmatpush.msrb.mxu3 %v735_v57  ;;  %v1266_v54 = vld [vmem:[%s5568_s2 + $0xf8] sm:$0xff] }
  0x39   : > { %867 = vmatpush.msrb.mxu1 %v733_v22  ;;  %933 = vmatpush.msrb.mxu2 %v730_v60  ;;  %v1278_v57 = vld [vmem:[%s5568_s2 + $0x158] sm:$0xff] }
  0x3a   : > { %803 = vmatpush.msrb.mxu0 %v728_v24  ;;  %998 = vmatpush.msrb.mxu3 %v731_v63  ;;  %v1282_v24 = vld [vmem:[%s5568_s2 + $0x178] sm:$0xff]  ;;  %v1277_v63 = vld [vmem:[%s5568_s2 + $0x150] sm:$0xff] }
  0x3b   : > { %868 = vmatpush.msrb.mxu1 %v729_v25  ;;  %934 = vmatpush.msrb.mxu2 %v726_v5  ;;  %v1298_v25 = vld [vmem:[%s5568_s2 + $0x1f8] sm:$0xff]  ;;  %v1293_v5 = vld [vmem:[%s5568_s2 + $0x1d0] sm:$0xff] }
  0x3c   : > { %804 = vmatpush.msrb.mxu0 %v724_v27  ;;  %999 = vmatpush.msrb.mxu3 %v727_v16  ;;  %v1281_v27 = vld [vmem:[%s5568_s2 + $0x170] sm:$0xff]  ;;  %v1294_v60 = vld [vmem:[%s5568_s2 + $0x1d8] sm:$0xff] }
  0x3d   : > { %2937 = vmatmul.msk.f32.gmra.mxu0 %vm517_vm0, %v3615_v9  ;;  %869 = vmatpush.msrb.mxu1 %v725_v28  ;;  %v1297_v28 = vld [vmem:[%s5568_s2 + $0x1f0] sm:$0xff] }
  0x3e   : > { %2957 = vmatmul.msk.f32.gmra.mxu1 %vm517_vm0, %v3615_v9  ;;  %1117 = vmatpush.msra.mxu0 %v1055_v38 }
  0x3f   : > { %1182 = vmatpush.msra.mxu1 %v1056_v39 }
  0x40   : > { %1118 = vmatpush.msra.mxu0 %v1053_v40  ;;  %v1250_v40 = vld [vmem:[%s5568_s2 + $0x78] sm:$0xff] }
  0x41   : > { %1183 = vmatpush.msra.mxu1 %v1054_v41  ;;  %v1280_v41 = vld [vmem:[%s5568_s2 + $0x168] sm:$0xff] }
  0x42   : > { %1119 = vmatpush.msra.mxu0 %v1051_v42  ;;  %v1296_v42 = vld [vmem:[%s5568_s2 + $0x1e8] sm:$0xff] }
  0x43   : > { %1184 = vmatpush.msra.mxu1 %v1052_v43  ;;  %v1279_v43 = vld [vmem:[%s5568_s2 + $0x160] sm:$0xff] }
  0x44   : > { %1120 = vmatpush.msra.mxu0 %v1049_v47 }
  0x45   : > { %2938 = vmatmul.msk.f32.gmra.mxu0 %vm517_vm0, %v3622_v10  ;;  %1185 = vmatpush.msra.mxu1 %v1050_v48 }
  0x46   : > { %2958 = vmatmul.msk.f32.gmra.mxu1 %vm517_vm0, %v3622_v10 }
  0x4d   : > { %2939 = vmatmul.msk.f32.gmra.mxu0 %vm517_vm0, %v3629_v11 }
  0x4e   : > { %2959 = vmatmul.msk.f32.gmra.mxu1 %vm517_vm0, %v3629_v11 }
  0x55   : > { %2940 = vmatmul.msk.f32.gmra.mxu0 %vm517_vm0, %v3636_v12 }
  0x56   : > { %2960 = vmatmul.msk.f32.gmra.mxu1 %vm517_vm0, %v3636_v12 }
  0x5d   : > { %2941 = vmatmul.msk.f32.gmra.mxu0 %vm517_vm0, %v3643_v13 }
  0x5e   : > { %2961 = vmatmul.msk.f32.gmra.mxu1 %vm517_vm0, %v3643_v13 }
  0x65   : > { %2942 = vmatmul.msk.f32.gmra.mxu0 %vm517_vm0, %v3653_v15 }
  0x66   : > { %2962 = vmatmul.msk.f32.gmra.mxu1 %vm517_vm0, %v3653_v15 }
  0x6d   : > { %2943 = vmatmul.msk.f32.gmra.mxu0 %vm517_vm0, %v3663_v17 }
  0x6e   : > { %2963 = vmatmul.msk.f32.gmra.mxu1 %vm517_vm0, %v3663_v17 }
  0x75   : > { %2944 = vmatmul.msk.f32.gmra.mxu0 %vm517_vm0, %v3670_v18 }
  0x76   : > { %2964 = vmatmul.msk.f32.gmra.mxu1 %vm517_vm0, %v3670_v18 }
  0x7d   : > { %2945 = vmatmul.msk.f32.gmra.mxu0 %vm517_vm0, %v3677_v19 }
  0x7e   : > { %2965 = vmatmul.msk.f32.gmra.mxu1 %vm517_vm0, %v3677_v19 }
  0x85   : > { %2946 = vmatmul.msk.f32.gmra.mxu0 %vm517_vm0, %v3687_v21 }
  0x86   : > { %2966 = vmatmul.msk.f32.gmra.mxu1 %vm517_vm0, %v3687_v21 }
  0x8d   : > { %2947 = vmatmul.msk.f32.gmra.mxu0 %vm517_vm0, %v3697_v23 }
  0x8e   : > { %2967 = vmatmul.msk.f32.gmra.mxu1 %vm517_vm0, %v3697_v23 }
  0x95   : > { %2948 = vmatmul.msk.f32.gmra.mxu0 %vm517_vm0, %v3710_v26 }
  0x96   : > { %2968 = vmatmul.msk.f32.gmra.mxu1 %vm517_vm0, %v3710_v26 }
  0x9d   : > { %2949 = vmatmul.msk.f32.gmra.mxu0 %vm517_vm0, %v3723_v29 }
  0x9e   : > { %2969 = vmatmul.msk.f32.gmra.mxu1 %vm517_vm0, %v3723_v29 }
  0xa5   : > { %2950 = vmatmul.msk.f32.gmra.mxu0 %vm517_vm0, %v3730_v30 }
  0xa6   : > { %2970 = vmatmul.msk.f32.gmra.mxu1 %vm517_vm0, %v3730_v30 }
  0xad   : > { %2951 = vmatmul.msk.f32.gmra.mxu0 %vm517_vm0, %v3737_v31 }
  0xae   : > { %2971 = vmatmul.msk.f32.gmra.mxu1 %vm517_vm0, %v3737_v31 }
  0xb2   : > { %v3743_v32 = vpop.f32.mrf.mxu0 }
  0xb3   : > { %5555 = vst [vmem:[#allocation8_spill] sm:$0xff] %v3743_v32  ;;  %v3745_v33 = vpop.f32.mrf.mxu1 }
  0xb5   : > { %2972 = vmatmul.msk.f32.vlgmr.msrb.gmra.mxu0 %vm740_vm1, %v3745_v33 }
  0xb6   : > { %2988 = vmatmul.msk.f32.vlgmr.msrb.gmra.mxu1 %vm740_vm1, %v3745_v33  ;;  %3132 = vmatpush.xpose.msk.msrb.mxu0 %vm517_vm0, %v1282_v24 }
  0xb7   : > { %3164 = vmatpush.xpose.msk.msrb.mxu1 %vm517_vm0, %v1298_v25  ;;  %v1248_v25 = vld [vmem:[%s5568_s2 + $0x68] sm:$0xff] }
  0xba   : > { %v3751_v34 = vpop.f32.mrf.mxu0  ;;  %3133 = vmatpush.xpose.msk.msrb.mxu0 %vm517_vm0, %v1281_v27  ;;  %v1265_v27 = vld [vmem:[%s5568_s2 + $0xf0] sm:$0xff] }
  0xbb   : > { %5556 = vst [vmem:[#allocation9_spill] sm:$0xff] %v3751_v34  ;;  %v3753_v35 = vpop.f32.mrf.mxu1  ;;  %3165 = vmatpush.xpose.msk.msrb.mxu1 %vm517_vm0, %v1297_v28  ;;  %v1276_v28 = vld [vmem:[%s5568_s2 + $0x148] sm:$0xff] }
  0xbd   : > { %2973 = vmatmul.msk.f32.gmra.mxu0 %vm740_vm1, %v3753_v35 }
  0xbe   : > { %2989 = vmatmul.msk.f32.gmra.mxu1 %vm740_vm1, %v3753_v35  ;;  %3134 = vmatpush.xpose.msk.msrb.mxu0 %vm517_vm0, %v1280_v41  ;;  %v1275_v41 = vld [vmem:[%s5568_s2 + $0x140] sm:$0xff] }
  0xbf   : > { %3166 = vmatpush.xpose.msk.msrb.mxu1 %vm517_vm0, %v1296_v42  ;;  %v1291_v42 = vld [vmem:[%s5568_s2 + $0x1c0] sm:$0xff] }
  0xc2   : > { %v3759_v36 = vpop.f32.mrf.mxu0  ;;  %3135 = vmatpush.xpose.msk.msrb.mxu0 %vm517_vm0, %v1279_v43 }
  0xc3   : > { %5557 = vst [vmem:[#allocation10_spill] sm:$0xff] %v3759_v36  ;;  %v3761_v37 = vpop.f32.mrf.mxu1  ;;  %3167 = vmatpush.xpose.msk.msrb.mxu1 %vm517_vm0, %v1295_v46 }
  0xc5   : > { %2974 = vmatmul.msk.f32.gmra.mxu0 %vm740_vm1, %v3761_v37 }
  0xc6   : > { %2990 = vmatmul.msk.f32.gmra.mxu1 %vm740_vm1, %v3761_v37  ;;  %3136 = vmatpush.xpose.msk.msrb.mxu0 %vm517_vm0, %v1278_v57  ;;  %v1274_v57 = vld [vmem:[%s5568_s2 + $0x138] sm:$0xff] }
  0xc7   : > { %3168 = vmatpush.xpose.msk.msrb.mxu1 %vm517_vm0, %v1294_v60  ;;  %v1290_v60 = vld [vmem:[%s5568_s2 + $0x1b8] sm:$0xff] }
  0xca   : > { %v3785_v44 = vpop.f32.mrf.mxu0  ;;  %3137 = vmatpush.xpose.msk.msrb.mxu0 %vm517_vm0, %v1277_v63  ;;  %v1273_v63 = vld [vmem:[%s5568_s2 + $0x130] sm:$0xff] }
  0xcb   : > { %5559 = vst [vmem:[#allocation11_spill] sm:$0xff] %v3785_v44  ;;  %v3787_v45 = vpop.f32.mrf.mxu1  ;;  %3169 = vmatpush.xpose.msk.msrb.mxu1 %vm517_vm0, %v1293_v5  ;;  %v1289_v5 = vld [vmem:[%s5568_s2 + $0x1b0] sm:$0xff] }
  0xcd   : > { %2975 = vmatmul.msk.f32.gmra.mxu0 %vm740_vm1, %v3787_v45 }
  0xce   : > { %2991 = vmatmul.msk.f32.gmra.mxu1 %vm740_vm1, %v3787_v45  ;;  %3138 = vmatpush.xpose.msk.msrb.mxu0 %vm517_vm0, %v1276_v28  ;;  %v1246_v28 = vld [vmem:[%s5568_s2 + $0x58] sm:$0xff] }
  0xd2   : > { %v3802_v49 = vpop.f32.mrf.mxu0  ;;  %3139 = vmatpush.xpose.msk.msrb.mxu0 %vm517_vm0, %v1275_v41  ;;  %v1288_v41 = vld [vmem:[%s5568_s2 + $0x1a8] sm:$0xff] }
  0xd3   : > { %5560 = vst [vmem:[#allocation12_spill] sm:$0xff] %v3802_v49  ;;  %v3804_v50 = vpop.f32.mrf.mxu1 }
  0xd5   : > { %2976 = vmatmul.msk.f32.gmra.mxu0 %vm740_vm1, %v3804_v50 }
  0xd6   : > { %2992 = vmatmul.msk.f32.gmra.mxu1 %vm740_vm1, %v3804_v50  ;;  %3140 = vmatpush.xpose.msk.msrb.mxu0 %vm517_vm0, %v1274_v57 }
  0xda   : > { %v3813_v52 = vpop.f32.mrf.mxu0  ;;  %3141 = vmatpush.xpose.msk.msrb.mxu0 %vm517_vm0, %v1273_v63  ;;  %v1262_v63 = vld [vmem:[%s5568_s2 + $0xd8] sm:$0xff] }
  0xdb   : > { %5561 = vst [vmem:[#allocation13_spill] sm:$0xff] %v3813_v52  ;;  %v3815_v53 = vpop.f32.mrf.mxu1 }
  0xdd   : > { %2977 = vmatmul.msk.f32.gmra.mxu0 %vm740_vm1, %v3815_v53 }
  0xde   : > { %2993 = vmatmul.msk.f32.gmra.mxu1 %vm740_vm1, %v3815_v53 }
  0xe2   : > { %v3824_v55 = vpop.f32.mrf.mxu0 }
  0xe3   : > { %5562 = vst [vmem:[#allocation14_spill] sm:$0xff] %v3824_v55  ;;  %v3826_v56 = vpop.f32.mrf.mxu1 }
  0xe5   : > { %2978 = vmatmul.msk.f32.gmra.mxu0 %vm740_vm1, %v3826_v56 }
  0xe6   : > { %2994 = vmatmul.msk.f32.gmra.mxu1 %vm740_vm1, %v3826_v56 }
  0xea   : > { %v3835_v58 = vpop.f32.mrf.mxu0 }
  0xeb   : > { %5563 = vst [vmem:[#allocation15_spill] sm:$0xff] %v3835_v58  ;;  %v3837_v59 = vpop.f32.mrf.mxu1 }
  0xec   : > { %2979 = vmatmul.msk.f32.vlgmr.msra.gmra.mxu2 %vm740_vm1, %v3837_v59  ;;  %2995 = vmatmul.msk.f32.vlgmr.msra.gmra.mxu3 %vm740_vm1, %v3837_v59 }
  0xed   : > { %3036 = vmatmul.msk.f32.vlgmr.msra.gmra.mxu0 %vm740_vm1, %v3743_v32  ;;  %3068 = vmatpush.xpose.msk.msra.mxu2 %vm517_vm0, %v1250_v40  ;;  %v1292_v40 = vld [vmem:[%s5568_s2 + $0x1c8] sm:$0xff] }
  0xee   : > { %3052 = vmatmul.msk.f32.vlgmr.msra.gmra.mxu1 %vm740_vm1, %v3743_v32  ;;  %3100 = vmatpush.xpose.msk.msra.mxu3 %vm517_vm0, %v1266_v54  ;;  %v1264_v54 = vld [vmem:[%s5568_s2 + $0xe8] sm:$0xff] }
  0xef   : > { %3170 = vmatpush.xpose.msk.msrb.mxu1 %vm517_vm0, %v1292_v40  ;;  %v1263_v40 = vld [vmem:[%s5568_s2 + $0xe0] sm:$0xff] }
  0xf1   : > { %3069 = vmatpush.xpose.msk.msra.mxu2 %vm517_vm0, %v1249_v51  ;;  %v1247_v51 = vld [vmem:[%s5568_s2 + $0x60] sm:$0xff] }
  0xf2   : > { %v3850_v61 = vpop.f32.mrf.mxu0  ;;  %3101 = vmatpush.xpose.msk.msra.mxu3 %vm517_vm0, %v1265_v27 }
  0xf3   : > { %5564 = vst [vmem:[#allocation16_spill] sm:$0xff] %v3850_v61  ;;  %v3852_v62 = vpop.f32.mrf.mxu1  ;;  %3171 = vmatpush.xpose.msk.msrb.mxu1 %vm517_vm0, %v1291_v42  ;;  %v1271_v42 = vld [vmem:[%s5568_s2 + $0x120] sm:$0xff] }
  0xf4   : > { %2980 = vmatmul.msk.f32.gmra.mxu2 %vm740_vm1, %v3852_v62  ;;  %2996 = vmatmul.msk.f32.gmra.mxu3 %vm740_vm1, %v3852_v62 }
  0xf5   : > { %3037 = vmatmul.msk.f32.gmra.mxu0 %vm740_vm1, %v3751_v34  ;;  %3070 = vmatpush.xpose.msk.msra.mxu2 %vm517_vm0, %v1248_v25 }
  0xf6   : > { %3053 = vmatmul.msk.f32.gmra.mxu1 %vm740_vm1, %v3751_v34  ;;  %3102 = vmatpush.xpose.msk.msra.mxu3 %vm517_vm0, %v1264_v54 }
  0xf7   : > { %3172 = vmatpush.xpose.msk.msrb.mxu1 %vm517_vm0, %v1290_v60  ;;  %v1245_v60 = vld [vmem:[%s5568_s2 + $0x50] sm:$0xff] }
  0xf9   : > { %3071 = vmatpush.xpose.msk.msra.mxu2 %vm517_vm0, %v1247_v51  ;;  %v1287_v51 = vld [vmem:[%s5568_s2 + $0x1a0] sm:$0xff] }
  0xfa   : > { %v3865_v1 = vpop.f32.mrf.mxu0  ;;  %3103 = vmatpush.xpose.msk.msra.mxu3 %vm517_vm0, %v1263_v40  ;;  %v1285_v40 = vld [vmem:[%s5568_s2 + $0x190] sm:$0xff] }
  0xfb   : > { %5565 = vst [vmem:[#allocation17_spill] sm:$0xff] %v3865_v1  ;;  %v3867_v3 = vpop.f32.mrf.mxu1  ;;  %3173 = vmatpush.xpose.msk.msrb.mxu1 %vm517_vm0, %v1289_v5  ;;  %v1286_v5 = vld [vmem:[%s5568_s2 + $0x198] sm:$0xff] }
  0xfc   : > { %2981 = vmatmul.msk.f32.gmra.mxu2 %vm740_vm1, %v3867_v3  ;;  %2997 = vmatmul.msk.f32.gmra.mxu3 %vm740_vm1, %v3867_v3 }
  0xfd   : > { %3038 = vmatmul.msk.f32.gmra.mxu0 %vm740_vm1, %v3759_v36  ;;  %3072 = vmatpush.xpose.msk.msra.mxu2 %vm517_vm0, %v1246_v28  ;;  %v1269_v28 = vld [vmem:[%s5568_s2 + $0x110] sm:$0xff] }
  0xfe   : > { %3054 = vmatmul.msk.f32.gmra.mxu1 %vm740_vm1, %v3759_v36  ;;  %3104 = vmatpush.xpose.msk.msra.mxu3 %vm517_vm0, %v1262_v63  ;;  %v1267_v63 = vld [vmem:[%s5568_s2 + $0x100] sm:$0xff] }
  0xff   : > { %3174 = vmatpush.xpose.msk.msrb.mxu1 %vm517_vm0, %v1288_v41  ;;  %v1244_v41 = vld [vmem:[%s5568_s2 + $0x48] sm:$0xff] }
 0x101   : > { %3073 = vmatpush.xpose.msk.msra.mxu2 %vm517_vm0, %v1245_v60  ;;  %v1284_v60 = vld [vmem:[%s5568_s2 + $0x188] sm:$0xff] }
 0x102   : > { %v3880_v7 = vpop.f32.mrf.mxu0 }
 0x103   : > { %5566 = vst [vmem:[#allocation18_spill] sm:$0xff] %v3880_v7  ;;  %v3882_v14 = vpop.f32.mrf.mxu1  ;;  %3175 = vmatpush.xpose.msk.msrb.mxu1 %vm517_vm0, %v1287_v51 }
 0x104   : > { %2982 = vmatmul.msk.f32.gmra.mxu2 %vm740_vm1, %v3882_v14  ;;  %2998 = vmatmul.msk.f32.gmra.mxu3 %vm740_vm1, %v3882_v14 }
 0x105   : > { %3039 = vmatmul.msk.f32.gmra.mxu0 %vm740_vm1, %v3785_v44  ;;  %3074 = vmatpush.xpose.msk.msra.mxu2 %vm517_vm0, %v1244_v41  ;;  %v1242_v41 = vld [vmem:[%s5568_s2 + $0x38] sm:$0xff] }
 0x106   : > { %3055 = vmatmul.msk.f32.gmra.mxu1 %vm740_vm1, %v3785_v44 }
 0x107   : > { %3176 = vmatpush.xpose.msk.msrb.mxu1 %vm517_vm0, %v1286_v5  ;;  %v1243_v5 = vld [vmem:[%s5568_s2 + $0x40] sm:$0xff] }
 0x109   : > { %3075 = vmatpush.xpose.msk.msra.mxu2 %vm517_vm0, %v1243_v5  ;;  %v1240_v5 = vld [vmem:[%s5568_s2 + $0x28] sm:$0xff] }
 0x10a   : > { %v3895_v20 = vpop.f32.mrf.mxu0 }
 0x10b   : > { %5567 = vst [vmem:[#allocation19_spill] sm:$0xff] %v3895_v20  ;;  %v3897_v22 = vpop.f32.mrf.mxu1  ;;  %3177 = vmatpush.xpose.msk.msrb.mxu1 %vm517_vm0, %v1285_v40 }
 0x10c   : > { %2983 = vmatmul.msk.f32.gmra.mxu2 %vm740_vm1, %v3897_v22  ;;  %2999 = vmatmul.msk.f32.gmra.mxu3 %vm740_vm1, %v3897_v22 }
 0x10d   : > { %3040 = vmatmul.msk.f32.gmra.mxu0 %vm740_vm1, %v3802_v49  ;;  %3076 = vmatpush.xpose.msk.msra.mxu2 %vm517_vm0, %v1242_v41 }
 0x10e   : > { %3056 = vmatmul.msk.f32.gmra.mxu1 %vm740_vm1, %v3802_v49 }
 0x10f   : > { %3178 = vmatpush.xpose.msk.msrb.mxu1 %vm517_vm0, %v1284_v60  ;;  %v1241_v60 = vld [vmem:[%s5568_s2 + $0x30] sm:$0xff] }
 0x111   : > { %3077 = vmatpush.xpose.msk.msra.mxu2 %vm517_vm0, %v1241_v60 }
 0x112   : > { %v3921_v38 = vpop.f32.mrf.mxu0 }
 0x113   : > { %5569 = vst [vmem:[#allocation20_spill] sm:$0xff] %v3921_v38  ;;  %v3923_v39 = vpop.f32.mrf.mxu1 }
 0x114   : > { %2984 = vmatmul.msk.f32.gmra.mxu2 %vm740_vm1, %v3923_v39  ;;  %3000 = vmatmul.msk.f32.gmra.mxu3 %vm740_vm1, %v3923_v39 }
 0x115   : > { %3041 = vmatmul.msk.f32.gmra.mxu0 %vm740_vm1, %v3813_v52  ;;  %3078 = vmatpush.xpose.msk.msra.mxu2 %vm517_vm0, %v1240_v5  ;;  %v1238_v5 = vld [vmem:[%s5568_s2 + $0x18] sm:$0xff] }
 0x116   : > { %3057 = vmatmul.msk.f32.gmra.mxu1 %vm740_vm1, %v3813_v52 }
 0x11a   : > { %v3953_v47 = vpop.f32.mrf.mxu0 }
 0x11b   : > { %5570 = vst [vmem:[#allocation21_spill] sm:$0xff] %v3953_v47  ;;  %v3955_v48 = vpop.f32.mrf.mxu1 }
 0x11c   : > { %2985 = vmatmul.msk.f32.gmra.mxu2 %vm740_vm1, %v3955_v48  ;;  %3001 = vmatmul.msk.f32.gmra.mxu3 %vm740_vm1, %v3955_v48 }
 0x11d   : > { %3042 = vmatmul.msk.f32.gmra.mxu0 %vm740_vm1, %v3824_v55 }
 0x11e   : > { %3058 = vmatmul.msk.f32.gmra.mxu1 %vm740_vm1, %v3824_v55 }
 0x122   : > { %v3989_v16 = vpop.f32.mrf.mxu0 }
 0x123   : > { %5571 = vst [vmem:[#allocation22_spill] sm:$0xff] %v3989_v16  ;;  %v3991_v24 = vpop.f32.mrf.mxu1 }
 0x124   : > { %2986 = vmatmul.msk.f32.gmra.mxu2 %vm740_vm1, %v3991_v24  ;;  %3002 = vmatmul.msk.f32.gmra.mxu3 %vm740_vm1, %v3991_v24 }
 0x125   : > { %3043 = vmatmul.msk.f32.gmra.mxu0 %vm740_vm1, %v3835_v58 }
 0x126   : > { %3059 = vmatmul.msk.f32.gmra.mxu1 %vm740_vm1, %v3835_v58  ;;  %v1251_v58 = vld [vmem:[%s5568_s2 + $0x80] sm:$0xff] }
 0x12a   : > { %v4025_v43 = vpop.f32.mrf.mxu0 }
 0x12b   : > { %5572 = vst [vmem:[#allocation23_spill] sm:$0xff] %v4025_v43  ;;  %v4027_v46 = vpop.f32.mrf.mxu1 }
 0x12c   : > { %2987 = vmatmul.msk.f32.gmra.mxu2 %vm740_vm1, %v4027_v46  ;;  %3003 = vmatmul.msk.f32.gmra.mxu3 %vm740_vm1, %v4027_v46 }
 0x12d   : > { %3044 = vmatmul.msk.f32.gmra.mxu0 %vm740_vm1, %v3850_v61 }
 0x12e   : > { %3060 = vmatmul.msk.f32.gmra.mxu1 %vm740_vm1, %v3850_v61 }
 0x132   : > { %v4061_v25 = vpop.f32.mrf.mxu0 }
 0x133   : > { %v4063_v27 = vpop.f32.mrf.mxu1 }
 0x134   : > { %3004 = vmatmul.msk.f32.vlgmr.msrb.gmra.mxu2 %vm740_vm1, %v3745_v33  ;;  %3020 = vmatmul.msk.f32.vlgmr.msrb.gmra.mxu3 %vm740_vm1, %v3745_v33  ;;  %v1272_v33 = vld [vmem:[%s5568_s2 + $0x128] sm:$0xff] }
 0x135   : > { %3045 = vmatmul.msk.f32.gmra.mxu0 %vm740_vm1, %v3865_v1 }
 0x136   : > { %3061 = vmatmul.msk.f32.gmra.mxu1 %vm740_vm1, %v3865_v1  ;;  %3142 = vmatpush.xpose.msk.msrb.mxu0 %vm517_vm0, %v1272_v33 }
 0x13a   : > { %v4097_v54 = vpop.f32.mrf.mxu0  ;;  %3143 = vmatpush.xpose.msk.msrb.mxu0 %vm517_vm0, %v1271_v42  ;;  %v1261_v42 = vld [vmem:[%s5568_s2 + $0xd0] sm:$0xff] }
 0x13b   : > { %v4101_v57 = vpop.f32.mrf.mxu1  ;;  %3105 = vmatpush.xpose.msk.msra.mxu3 %vm517_vm0, %v1261_v42  ;;  %v1259_v42 = vld [vmem:[%s5568_s2 + $0xc0] sm:$0xff] }
 0x13c   : > { %3005 = vmatmul.msk.f32.gmra.mxu2 %vm740_vm1, %v3753_v35  ;;  %3021 = vmatmul.msk.f32.gmra.mxu3 %vm740_vm1, %v3753_v35  ;;  %v1270_v35 = vld [vmem:[%s5568_s2 + $0x118] sm:$0xff] }
 0x13d   : > { %3046 = vmatmul.msk.f32.gmra.mxu0 %vm740_vm1, %v3880_v7 }
 0x13e   : > { %3062 = vmatmul.msk.f32.gmra.mxu1 %vm740_vm1, %v3880_v7  ;;  %3144 = vmatpush.xpose.msk.msrb.mxu0 %vm517_vm0, %v1270_v35  ;;  %v1283_v35 = vld [vmem:[%s5568_s2 + $0x180] sm:$0xff] }
 0x13f   : > { %3179 = vmatpush.xpose.msk.msrb.mxu1 %vm517_vm0, %v1283_v35 }
 0x142   : > { %3145 = vmatpush.xpose.msk.msrb.mxu0 %vm517_vm0, %v1269_v28  ;;  %v4135_v33 = vpop.f32.mrf.mxu0  ;;  %v1260_v28 = vld [vmem:[%s5568_s2 + $0xc8] sm:$0xff] }
 0x143   : > { %v4149_v51 = vpop.f32.mrf.mxu1  ;;  %3106 = vmatpush.xpose.msk.msra.mxu3 %vm517_vm0, %v1260_v28  ;;  %v1257_v28 = vld [vmem:[%s5568_s2 + $0xb0] sm:$0xff] }
 0x144   : > { %3006 = vmatmul.msk.f32.gmra.mxu2 %vm740_vm1, %v3761_v37  ;;  %3022 = vmatmul.msk.f32.gmra.mxu3 %vm740_vm1, %v3761_v37  ;;  %v1268_v37 = vld [vmem:[%s5568_s2 + $0x108] sm:$0xff] }
 0x145   : > { %3047 = vmatmul.msk.f32.gmra.mxu0 %vm740_vm1, %v3895_v20 }
 0x146   : > { %3063 = vmatmul.msk.f32.gmra.mxu1 %vm740_vm1, %v3895_v20  ;;  %3146 = vmatpush.xpose.msk.msrb.mxu0 %vm517_vm0, %v1268_v37 }
 0x147   : > { %3107 = vmatpush.xpose.msk.msra.mxu3 %vm517_vm0, %v1259_v42  ;;  %v1256_v42 = vld [vmem:[%s5568_s2 + $0xa8] sm:$0xff] }
 0x14a   : > { %3147 = vmatpush.xpose.msk.msrb.mxu0 %vm517_vm0, %v1267_v63  ;;  %v4183_v40 = vpop.f32.mrf.mxu0  ;;  %v1258_v63 = vld [vmem:[%s5568_s2 + $0xb8] sm:$0xff] }
 0x14b   : > { %3108 = vmatpush.xpose.msk.msra.mxu3 %vm517_vm0, %v1258_v63 }
 0x14c   : > { %3007 = vmatmul.msk.f32.gmra.mxu2 %vm740_vm1, %v3787_v45  ;;  %3023 = vmatmul.msk.f32.gmra.mxu3 %vm740_vm1, %v3787_v45  ;;  %v4189_v45 = vpop.f32.mrf.mxu1 }
 0x14d   : > { %3048 = vmatmul.msk.f32.gmra.mxu0 %vm740_vm1, %v3921_v38 }
 0x14e   : > { %3064 = vmatmul.msk.f32.gmra.mxu1 %vm740_vm1, %v3921_v38 }
 0x14f   : > { %3109 = vmatpush.xpose.msk.msra.mxu3 %vm517_vm0, %v1257_v28  ;;  %v1255_v28 = vld [vmem:[%s5568_s2 + $0xa0] sm:$0xff] }
 0x152   : > { %v4207_v37 = vpop.f32.mrf.mxu0 }
 0x153   : > { %3110 = vmatpush.xpose.msk.msra.mxu3 %vm517_vm0, %v1256_v42 }
 0x154   : > { %3008 = vmatmul.msk.f32.gmra.mxu2 %vm740_vm1, %v3804_v50  ;;  %3024 = vmatmul.msk.f32.gmra.mxu3 %vm740_vm1, %v3804_v50  ;;  %v4209_v50 = vpop.f32.mrf.mxu1 }
 0x155   : > { %3049 = vmatmul.msk.f32.gmra.mxu0 %vm740_vm1, %v3953_v47 }
 0x156   : > { %3065 = vmatmul.msk.f32.gmra.mxu1 %vm740_vm1, %v3953_v47 }
 0x157   : > { %3111 = vmatpush.xpose.msk.msra.mxu3 %vm517_vm0, %v1255_v28  ;;  %v1254_v28 = vld [vmem:[%s5568_s2 + $0x98] sm:$0xff] }
 0x15a   : > { %v4227_v35 = vpop.f32.mrf.mxu0 }
 0x15b   : > { %3112 = vmatpush.xpose.msk.msra.mxu3 %vm517_vm0, %v1254_v28  ;;  %v1253_v28 = vld [vmem:[%s5568_s2 + $0x90] sm:$0xff] }
 0x15c   : > { %3009 = vmatmul.msk.f32.gmra.mxu2 %vm740_vm1, %v3815_v53  ;;  %3025 = vmatmul.msk.f32.gmra.mxu3 %vm740_vm1, %v3815_v53  ;;  %v4229_v53 = vpop.f32.mrf.mxu1 }
 0x15d   : > { %3050 = vmatmul.msk.f32.gmra.mxu0 %vm740_vm1, %v3989_v16 }
 0x15e   : > { %3066 = vmatmul.msk.f32.gmra.mxu1 %vm740_vm1, %v3989_v16 }
 0x15f   : > { %3113 = vmatpush.xpose.msk.msra.mxu3 %vm517_vm0, %v1253_v28  ;;  %v1252_v28 = vld [vmem:[%s5568_s2 + $0x88] sm:$0xff] }
 0x162   : > { %v4247_v41 = vpop.f32.mrf.mxu0 }
 0x163   : > { %3114 = vmatpush.xpose.msk.msra.mxu3 %vm517_vm0, %v1252_v28 }
 0x164   : > { %3010 = vmatmul.msk.f32.gmra.mxu2 %vm740_vm1, %v3826_v56  ;;  %3026 = vmatmul.msk.f32.gmra.mxu3 %vm740_vm1, %v3826_v56  ;;  %v1239_v56 = vld [vmem:[%s5568_s2 + $0x20] sm:$0xff]  ;;  %v4261_v60 = vpop.f32.mrf.mxu1 }
 0x165   : > { %3051 = vmatmul.msk.f32.gmra.mxu0 %vm740_vm1, %v4025_v43  ;;  %3079 = vmatpush.xpose.msk.msra.mxu2 %vm517_vm0, %v1239_v56 }
 0x166   : > { %3067 = vmatmul.msk.f32.gmra.mxu1 %vm740_vm1, %v4025_v43 }
 0x167   : > { %3115 = vmatpush.xpose.msk.msra.mxu3 %vm517_vm0, %v1251_v58 }
 0x169   : > { %3080 = vmatpush.xpose.msk.msra.mxu2 %vm517_vm0, %v1238_v5  ;;  %v1237_v5 = vld [vmem:[%s5568_s2 + $0x10] sm:$0xff] }
 0x16a   : > { %v4283_v56 = vpop.f32.mrf.mxu0 }
 0x16b   : > { %v1751_v44 = vmul.f32 %v4283_v56, %v4061_v25  ;;  %v2071_v34 = vmul.f32 %v4283_v56, %v4063_v27 }
 0x16c   : > { %3011 = vmatmul.msk.f32.gmra.mxu2 %vm740_vm1, %v3837_v59  ;;  %3027 = vmatmul.msk.f32.gmra.mxu3 %vm740_vm1, %v3837_v59  ;;  %v4293_v43 = vpop.f32.mrf.mxu1 }
 0x16d   : > { %3148 = vmatmul.msk.f32.vlgmr.msrb.gmra.mxu0 %vm517_vm0, %v3608_v8  ;;  %3081 = vmatpush.xpose.msk.msra.mxu2 %vm517_vm0, %v1237_v5  ;;  %v1236_v5 = vld [vmem:[%s5568_s2 + $0x8] sm:$0xff]  ;;  %v1799_v36 = vmul.f32 %v4293_v43, %v4061_v25 }
 0x16e   : > { %3180 = vmatmul.msk.f32.vlgmr.msrb.gmra.mxu1 %vm517_vm0, %v3608_v8 }
 0x16f   : > { %v4267_v59 = vpop.f32.mrf.mxu2  ;;  %v4269_v63 = vpop.f32.mrf.mxu3 }
 0x171   : > { %3082 = vmatpush.xpose.msk.msra.mxu2 %vm517_vm0, %v1236_v5  ;;  %v1235_v5 = vld [vmem:[%s5568_s2] sm:$0xff] }
 0x172   : > { %v4315_v47 = vpop.f32.mrf.mxu0 }
 0x174   : > { %3012 = vmatmul.msk.f32.gmra.mxu2 %vm740_vm1, %v3852_v62  ;;  %3028 = vmatmul.msk.f32.gmra.mxu3 %vm740_vm1, %v3852_v62  ;;  %v4317_v38 = vpop.f32.mrf.mxu1 }
 0x175   : > { %3149 = vmatmul.msk.f32.gmra.mxu0 %vm517_vm0, %v3615_v9  ;;  %3083 = vmatpush.xpose.msk.msra.mxu2 %vm517_vm0, %v1235_v5 }
 0x176   : > { %3181 = vmatmul.msk.f32.gmra.mxu1 %vm517_vm0, %v3615_v9 }
 0x177   : > { %v4289_v62 = vpop.f32.mrf.mxu2  ;;  %v4291_v42 = vpop.f32.mrf.mxu3 }
 0x179   : > { %2476 = vmatpush.msrb.mxu2 %v3557_v0 }
 0x17a   : > { %v4339_v7 = vpop.f32.mrf.mxu0 }
 0x17b   : > { %2477 = vmatpush.msrb.mxu2 %v3569_v2 }
 0x17c   : > { %3013 = vmatmul.msk.f32.gmra.mxu2 %vm740_vm1, %v3867_v3  ;;  %3029 = vmatmul.msk.f32.gmra.mxu3 %vm740_vm1, %v3867_v3  ;;  %v4341_v1 = vpop.f32.mrf.mxu1 }
 0x17d   : > { %3150 = vmatmul.msk.f32.gmra.mxu0 %vm517_vm0, %v3622_v10  ;;  %2478 = vmatpush.msrb.mxu2 %v3580_v4  ;;  %v2548_v4 = vld [vmem:[%s5573_s4 + $0x18] sm:$0xff] }
 0x17e   : > { %3182 = vmatmul.msk.f32.gmra.mxu1 %vm517_vm0, %v3622_v10  ;;  %2561 = vmatpush.msrb.mxu3 %v2548_v4 }
 0x17f   : > { %v4311_v16 = vpop.f32.mrf.mxu2  ;;  %v4313_v3 = vpop.f32.mrf.mxu3  ;;  %2479 = vmatpush.msrb.mxu2 %v3593_v6 }
 0x182   : > { %v4370_v5 = vpop.f32.mrf.mxu0 }
 0x184   : > { %3014 = vmatmul.msk.f32.gmra.mxu2 %vm740_vm1, %v3882_v14  ;;  %3030 = vmatmul.msk.f32.gmra.mxu3 %vm740_vm1, %v3882_v14  ;;  %v4377_v28 = vpop.f32.mrf.mxu1 }
 0x185   : > { %3151 = vmatmul.msk.f32.gmra.mxu0 %vm517_vm0, %v3629_v11 }
 0x186   : > { %3183 = vmatmul.msk.f32.gmra.mxu1 %vm517_vm0, %v3629_v11 }
 0x187   : > { %v4335_v20 = vpop.f32.mrf.mxu2  ;;  %v4337_v14 = vpop.f32.mrf.mxu3 }
 0x18a   : > { %v4394_v6 = vpop.f32.mrf.mxu0 }
 0x18c   : > { %3015 = vmatmul.msk.f32.gmra.mxu2 %vm740_vm1, %v3897_v22  ;;  %3031 = vmatmul.msk.f32.gmra.mxu3 %vm740_vm1, %v3897_v22 }
 0x18d   : > { %3152 = vmatmul.msk.f32.gmra.mxu0 %vm517_vm0, %v3636_v12 }
 0x18e   : > { %3184 = vmatmul.msk.f32.gmra.mxu1 %vm517_vm0, %v3636_v12 }
 0x18f   : > { %v4359_v61 = vpop.f32.mrf.mxu2  ;;  %v4361_v22 = vpop.f32.mrf.mxu3 }
 0x192   : > { %v4418_v4 = vpop.f32.mrf.mxu0 }
 0x194   : > { %3016 = vmatmul.msk.f32.gmra.mxu2 %vm740_vm1, %v3923_v39  ;;  %3032 = vmatmul.msk.f32.gmra.mxu3 %vm740_vm1, %v3923_v39  ;;  %v4404_v39 = vpop.f32.mrf.mxu1 }
 0x195   : > { %3153 = vmatmul.msk.f32.gmra.mxu0 %vm517_vm0, %v3643_v13 }
 0x196   : > { %3185 = vmatmul.msk.f32.gmra.mxu1 %vm517_vm0, %v3643_v13 }
 0x197   : > { %v4383_v0 = vpop.f32.mrf.mxu2  ;;  %v4385_v2 = vpop.f32.mrf.mxu3 }
 0x19a   : > { %v4434_v52 = vpop.f32.mrf.mxu0 }
 0x19c   : > { %3017 = vmatmul.msk.f32.gmra.mxu2 %vm740_vm1, %v3955_v48  ;;  %3033 = vmatmul.msk.f32.gmra.mxu3 %vm740_vm1, %v3955_v48  ;;  %v4420_v55 = vpop.f32.mrf.mxu1 }
 0x19d   : > { %3154 = vmatmul.msk.f32.gmra.mxu0 %vm517_vm0, %v3653_v15 }
 0x19e   : > { %3186 = vmatmul.msk.f32.gmra.mxu1 %vm517_vm0, %v3653_v15 }
 0x19f   : > { %v4400_v13 = vpop.f32.mrf.mxu2  ;;  %v4402_v58 = vpop.f32.mrf.mxu3 }
 0x1a0   : > { %5574 = vst [vmem:[#allocation24_spill] sm:$0xff] %v4400_v13 }
 0x1a1   : > { %5575 = vst [vmem:[#allocation25_spill] sm:$0xff] %v4402_v58 }
 0x1a2   : > { %v4466_v13 = vpop.f32.mrf.mxu0 }
 0x1a4   : > { %3018 = vmatmul.msk.f32.gmra.mxu2 %vm740_vm1, %v3991_v24  ;;  %3034 = vmatmul.msk.f32.gmra.mxu3 %vm740_vm1, %v3991_v24  ;;  %v4436_v49 = vpop.f32.mrf.mxu1 }
 0x1a5   : > { %3155 = vmatmul.msk.f32.gmra.mxu0 %vm517_vm0, %v3663_v17 }
 0x1a6   : > { %3187 = vmatmul.msk.f32.gmra.mxu1 %vm517_vm0, %v3663_v17 }
 0x1a7   : > { %v4414_v48 = vpop.f32.mrf.mxu2  ;;  %v4416_v15 = vpop.f32.mrf.mxu3 }
 0x1a8   : > { %5576 = vst [vmem:[#allocation26_spill] sm:$0xff] %v4414_v48 }
 0x1a9   : > { %5577 = vst [vmem:[#allocation27_spill] sm:$0xff] %v4416_v15 }
 0x1ac   : > { %3019 = vmatmul.msk.f32.gmra.mxu2 %vm740_vm1, %v4027_v46  ;;  %3035 = vmatmul.msk.f32.gmra.mxu3 %vm740_vm1, %v4027_v46 }
 0x1ad   : > { %3156 = vmatmul.msk.f32.gmra.mxu0 %vm517_vm0, %v3670_v18 }
 0x1ae   : > { %3188 = vmatmul.msk.f32.gmra.mxu1 %vm517_vm0, %v3670_v18 }
 0x1af   : > { %v4430_v17 = vpop.f32.mrf.mxu2  ;;  %v4432_v24 = vpop.f32.mrf.mxu3 }
 0x1b0   : > { %5578 = vst [vmem:[#allocation28_spill] sm:$0xff] %v4430_v17 }
 0x1b1   : > { %5579 = vst [vmem:[#allocation29_spill] sm:$0xff] %v4432_v24 }
 0x1b4   : > { %3084 = vmatmul.msk.f32.vlgmr.msra.gmra.mxu2 %vm517_vm0, %v3608_v8  ;;  %3116 = vmatmul.msk.f32.vlgmr.msra.gmra.mxu3 %vm517_vm0, %v3608_v8  ;;  %v2119_v8 = vmul.f32 %v4293_v43, %v4063_v27  ;;  %v2072_v27 = vmul.f32 %v4315_v47, %v4101_v57 }
 0x1b5   : > { %3157 = vmatmul.msk.f32.gmra.mxu0 %vm517_vm0, %v3677_v19 }
 0x1b6   : > { %3189 = vmatmul.msk.f32.gmra.mxu1 %vm517_vm0, %v3677_v19 }
 0x1b7   : > { %v936_v18 = vpop.f32.mrf.mxu2  ;;  %v1001_v46 = vpop.f32.mrf.mxu3 }
 0x1b8   : > { %v1767_v32 = vmul.f32 %v4293_v43, %v936_v18  ;;  %v1815_v24 = vmul.f32 %v4283_v56, %v936_v18  ;;  %v2087_v19 = vmul.f32 %v4293_v43, %v1001_v46  ;;  %v2135_v17 = vmul.f32 %v4283_v56, %v1001_v46  ;;  %v2547_v43 = vld [vmem:[%s5573_s4 + $0x10] sm:$0xff] }
 0x1b9   : > { %2562 = vmatpush.msrb.mxu3 %v2547_v43  ;;  %v2120_v56 = vmul.f32 %v4317_v38, %v4101_v57  ;;  %v4505_v57 = vpop.f32.mrf.mxu0  ;;  %v1753_v43 = vmul.f32 %v4339_v7, %v4135_v33 }
 0x1ba   : > { %v4458_v15 = vsub.f32 %v1751_v44, %v1767_v32  ;;  %v4460_v48 = vadd.f32 %v1815_v24, %v1799_v36  ;;  %v4462_v58 = vsub.f32 %v2071_v34, %v2087_v19  ;;  %v4464_v25 = vadd.f32 %v2135_v17, %v2119_v8  ;;  %v4475_v32 = vpop.f32.mrf.mxu1 }
 0x1bb   : > { %v1752_v44 = vmul.f32 %v4315_v47, %v4097_v54 }
 0x1bc   : > { %3085 = vmatmul.msk.f32.gmra.mxu2 %vm517_vm0, %v3615_v9  ;;  %3117 = vmatmul.msk.f32.gmra.mxu3 %vm517_vm0, %v3615_v9  ;;  %v1800_v9 = vmul.f32 %v4317_v38, %v4097_v54 }
 0x1bd   : > { %3158 = vmatmul.msk.f32.gmra.mxu0 %vm517_vm0, %v3687_v21 }
 0x1be   : > { %3190 = vmatmul.msk.f32.gmra.mxu1 %vm517_vm0, %v3687_v21 }
 0x1bf   : > { %v939_v34 = vpop.f32.mrf.mxu2  ;;  %v1004_v36 = vpop.f32.mrf.mxu3 }
 0x1c0   : > { %v1768_v17 = vmul.f32 %v4317_v38, %v939_v34  ;;  %v1816_v24 = vmul.f32 %v4315_v47, %v939_v34  ;;  %v2088_v21 = vmul.f32 %v4317_v38, %v1004_v36  ;;  %v2136_v18 = vmul.f32 %v4315_v47, %v1004_v36 }
 0x1c1   : > { %v1801_v34 = vmul.f32 %v4341_v1, %v4135_v33  ;;  %v2073_v36 = vmul.f32 %v4339_v7, %v4149_v51 }
 0x1c2   : > { %v4493_v46 = vsub.f32 %v1752_v44, %v1768_v17  ;;  %v4495_v8 = vadd.f32 %v1816_v24, %v1800_v9  ;;  %v4497_v19 = vsub.f32 %v2072_v27, %v2088_v21  ;;  %v4499_v54 = vadd.f32 %v2136_v18, %v2120_v56  ;;  %v4519_v44 = vpop.f32.mrf.mxu1 }
 0x1c3   : > { %v1802_v18 = vmul.f32 %v4377_v28, %v4183_v40 }
 0x1c4   : > { %3086 = vmatmul.msk.f32.gmra.mxu2 %vm517_vm0, %v3622_v10  ;;  %3118 = vmatmul.msk.f32.gmra.mxu3 %vm517_vm0, %v3622_v10  ;;  %v2121_v10 = vmul.f32 %v4341_v1, %v4149_v51  ;;  %v1754_v51 = vmul.f32 %v4370_v5, %v4183_v40 }
 0x1c5   : > { %3159 = vmatmul.msk.f32.gmra.mxu0 %vm517_vm0, %v3697_v23 }
 0x1c6   : > { %3191 = vmatmul.msk.f32.gmra.mxu1 %vm517_vm0, %v3697_v23 }
 0x1c7   : > { %v942_v38 = vpop.f32.mrf.mxu2  ;;  %v1007_v47 = vpop.f32.mrf.mxu3 }
 0x1c8   : > { %v1769_v9 = vmul.f32 %v4341_v1, %v942_v38  ;;  %v1817_v23 = vmul.f32 %v4339_v7, %v942_v38  ;;  %v2089_v27 = vmul.f32 %v4341_v1, %v1007_v47  ;;  %v2137_v56 = vmul.f32 %v4339_v7, %v1007_v47  ;;  %v4549_v47 = vpop.f32.mrf.mxu0 }
 0x1c9   : > { %v2074_v38 = vmul.f32 %v4370_v5, %v4189_v45 }
 0x1ca   : > { %v4525_v17 = vsub.f32 %v1753_v43, %v1769_v9  ;;  %v4527_v24 = vadd.f32 %v1817_v23, %v1801_v34  ;;  %v4529_v33 = vsub.f32 %v2073_v36, %v2089_v27  ;;  %v4531_v21 = vadd.f32 %v2137_v56, %v2121_v10  ;;  %v4555_v10 = vpop.f32.mrf.mxu1 }
 0x1cb   : > { %v1803_v56 = vmul.f32 %v4404_v39, %v4207_v37 }
 0x1cc   : > { %3087 = vmatmul.msk.f32.gmra.mxu2 %vm517_vm0, %v3629_v11  ;;  %3119 = vmatmul.msk.f32.gmra.mxu3 %vm517_vm0, %v3629_v11  ;;  %v2122_v11 = vmul.f32 %v4377_v28, %v4189_v45 }
 0x1cd   : > { %3160 = vmatmul.msk.f32.gmra.mxu0 %vm517_vm0, %v3710_v26 }
 0x1ce   : > { %3192 = vmatmul.msk.f32.gmra.mxu1 %vm517_vm0, %v3710_v26 }
 0x1cf   : > { %v945_v1 = vpop.f32.mrf.mxu2  ;;  %v1010_v7 = vpop.f32.mrf.mxu3 }
 0x1d0   : > { %v1770_v43 = vmul.f32 %v4377_v28, %v945_v1  ;;  %v1818_v26 = vmul.f32 %v4370_v5, %v945_v1  ;;  %v2090_v34 = vmul.f32 %v4377_v28, %v1010_v7  ;;  %v2138_v36 = vmul.f32 %v4370_v5, %v1010_v7 }
 0x1d1   : > { %v1755_v28 = vmul.f32 %v4394_v6, %v4207_v37  ;;  %v2075_v1 = vmul.f32 %v4394_v6, %v4209_v50 }
 0x1d2   : > { %v4557_v9 = vsub.f32 %v1754_v51, %v1770_v43  ;;  %v4559_v40 = vadd.f32 %v1818_v26, %v1802_v18  ;;  %v4561_v23 = vsub.f32 %v2074_v38, %v2090_v34  ;;  %v4563_v27 = vadd.f32 %v2138_v36, %v2122_v11  ;;  %v4585_v38 = vpop.f32.mrf.mxu0  ;;  %v4595_v34 = vpop.f32.mrf.mxu1 }
 0x1d4   : > { %3088 = vmatmul.msk.f32.gmra.mxu2 %vm517_vm0, %v3636_v12  ;;  %3120 = vmatmul.msk.f32.gmra.mxu3 %vm517_vm0, %v3636_v12  ;;  %v2123_v12 = vmul.f32 %v4404_v39, %v4209_v50  ;;  %v3313_v50 = vld [vmem:[%s3602_s16 + $0x28] sm:$0xff] }
 0x1d5   : > { %3161 = vmatmul.msk.f32.gmra.mxu0 %vm517_vm0, %v3723_v29 }
 0x1d6   : > { %3193 = vmatmul.msk.f32.gmra.mxu1 %vm517_vm0, %v3723_v29 }
 0x1d7   : > { %v948_v45 = vpop.f32.mrf.mxu2  ;;  %v1013_v5 = vpop.f32.mrf.mxu3 }
 0x1d8   : > { %v1771_v7 = vmul.f32 %v4404_v39, %v948_v45  ;;  %v1819_v51 = vmul.f32 %v4394_v6, %v948_v45  ;;  %v2091_v29 = vmul.f32 %v4404_v39, %v1013_v5  ;;  %v2139_v18 = vmul.f32 %v4394_v6, %v1013_v5  ;;  %v2546_v6 = vld [vmem:[%s5573_s4 + $0x8] sm:$0xff] }
 0x1d9   : > { %2563 = vmatpush.msrb.mxu3 %v2546_v6  ;;  %v1756_v45 = vmul.f32 %v4418_v4, %v4227_v35  ;;  %v1804_v5 = vmul.f32 %v4420_v55, %v4227_v35  ;;  %v3314_v6 = vld [vmem:[%s3602_s16 + $0x30] sm:$0xff] }
 0x1da   : > { %v4587_v11 = vsub.f32 %v1755_v28, %v1771_v7  ;;  %v4589_v43 = vadd.f32 %v1819_v51, %v1803_v56  ;;  %v4591_v37 = vsub.f32 %v2075_v1, %v2091_v29  ;;  %v4593_v26 = vadd.f32 %v2139_v18, %v2123_v12 }
 0x1db   : > { %v2076_v28 = vmul.f32 %v4418_v4, %v4229_v53  ;;  %v2124_v56 = vmul.f32 %v4420_v55, %v4229_v53  ;;  %v4632_v53 = vpop.f32.mrf.mxu1 }
 0x1dc   : > { %3089 = vmatmul.msk.f32.gmra.mxu2 %vm517_vm0, %v3313_v50  ;;  %3121 = vmatmul.msk.f32.gmra.mxu3 %vm517_vm0, %v3313_v50  ;;  %v4627_v50 = vpop.f32.mrf.mxu0 }
 0x1dd   : > { %3162 = vmatmul.msk.f32.gmra.mxu0 %vm517_vm0, %v3730_v30 }
 0x1de   : > { %3194 = vmatmul.msk.f32.gmra.mxu1 %vm517_vm0, %v3730_v30 }
 0x1df   : > { %v951_v39 = vpop.f32.mrf.mxu2  ;;  %v1016_v36 = vpop.f32.mrf.mxu3 }
 0x1e0   : > { %v1772_v1 = vmul.f32 %v4420_v55, %v951_v39  ;;  %v1820_v30 = vmul.f32 %v4418_v4, %v951_v39  ;;  %v2092_v12 = vmul.f32 %v4420_v55, %v1016_v36  ;;  %v2140_v7 = vmul.f32 %v4418_v4, %v1016_v36 }
 0x1e1   : > { %v1757_v39 = vmul.f32 %v4434_v52, %v4247_v41  ;;  %v1805_v36 = vmul.f32 %v4436_v49, %v4247_v41 }
 0x1e2   : > { %v4619_v51 = vsub.f32 %v1756_v45, %v1772_v1  ;;  %v4621_v29 = vadd.f32 %v1820_v30, %v1804_v5  ;;  %v4623_v18 = vsub.f32 %v2076_v28, %v2092_v12  ;;  %v4625_v35 = vadd.f32 %v2140_v7, %v2124_v56 }
 0x1e3   : > { %v2077_v45 = vmul.f32 %v4434_v52, %v4261_v60  ;;  %v2125_v5 = vmul.f32 %v4436_v49, %v4261_v60 }
 0x1e4   : > { %3090 = vmatmul.msk.f32.gmra.mxu2 %vm517_vm0, %v3314_v6  ;;  %3122 = vmatmul.msk.f32.gmra.mxu3 %vm517_vm0, %v3314_v6  ;;  %v3315_v6 = vld [vmem:[%s3602_s16 + $0x38] sm:$0xff]  ;;  %v4661_v60 = vpop.f32.mrf.mxu0 }
 0x1e5   : > { %3163 = vmatmul.msk.f32.gmra.mxu0 %vm517_vm0, %v3737_v31 }
 0x1e6   : > { %3195 = vmatmul.msk.f32.gmra.mxu1 %vm517_vm0, %v3737_v31 }
 0x1e7   : > { %v954_v55 = vpop.f32.mrf.mxu2  ;;  %v1019_v4 = vpop.f32.mrf.mxu3 }
 0x1e8   : > { %v1773_v28 = vmul.f32 %v4436_v49, %v954_v55  ;;  %v1821_v56 = vmul.f32 %v4434_v52, %v954_v55  ;;  %v2093_v31 = vmul.f32 %v4436_v49, %v1019_v4  ;;  %v2141_v1 = vmul.f32 %v4434_v52, %v1019_v4 }
 0x1e9   : > { %v1758_v52 = vmul.f32 %v4466_v13, %v4267_v59  ;;  %v1806_v4 = vmul.f32 %v4475_v32, %v4267_v59 }
 0x1ea   : > { %v4650_v30 = vsub.f32 %v1757_v39, %v1773_v28  ;;  %v4652_v12 = vadd.f32 %v1821_v56, %v1805_v36  ;;  %v4654_v7 = vsub.f32 %v2077_v45, %v2093_v31  ;;  %v4656_v41 = vadd.f32 %v2141_v1, %v2125_v5  ;;  %v4671_v45 = vpop.f32.mrf.mxu1 }
 0x1eb   : > { %v2078_v39 = vmul.f32 %v4466_v13, %v4269_v63  ;;  %v2126_v36 = vmul.f32 %v4475_v32, %v4269_v63 }
 0x1ec   : > { %5580 = vst [vmem:[#allocation30_spill] sm:$0xff] %v4654_v7  ;;  %3091 = vmatmul.msk.f32.gmra.mxu2 %vm517_vm0, %v3315_v6  ;;  %3123 = vmatmul.msk.f32.gmra.mxu3 %vm517_vm0, %v3315_v6 }
 0x1ed   : > { %5581 = vst [vmem:[#allocation31_spill] sm:$0xff] %v4656_v41  ;;  %v3316_v41 = vld [vmem:[%s3602_s16 + $0x40] sm:$0xff] }
 0x1ef   : > { %v957_v55 = vpop.f32.mrf.mxu2  ;;  %v1022_v49 = vpop.f32.mrf.mxu3 }
 0x1f0   : > { %v1774_v5 = vmul.f32 %v4475_v32, %v957_v55  ;;  %v1822_v28 = vmul.f32 %v4466_v13, %v957_v55  ;;  %v2094_v56 = vmul.f32 %v4475_v32, %v1022_v49  ;;  %v2142_v31 = vmul.f32 %v4466_v13, %v1022_v49 }
 0x1f1   : > { %v1759_v32 = vmul.f32 %v4505_v57, %v4289_v62  ;;  %v1807_v13 = vmul.f32 %v4519_v44, %v4289_v62  ;;  %v2079_v49 = vmul.f32 %v4505_v57, %v4291_v42 }
 0x1f2   : > { %v4677_v1 = vsub.f32 %v1758_v52, %v1774_v5  ;;  %v4679_v6 = vadd.f32 %v1822_v28, %v1806_v4  ;;  %v4681_v59 = vsub.f32 %v2078_v39, %v2094_v56  ;;  %v4683_v7 = vadd.f32 %v2142_v31, %v2126_v36  ;;  %v4696_v4 = vpop.f32.mrf.mxu0  ;;  %v4702_v28 = vpop.f32.mrf.mxu1 }
 0x1f3   : > { %v2127_v52 = vmul.f32 %v4519_v44, %v4291_v42  ;;  %v3317_v42 = vld [vmem:[%s3602_s16 + $0x48] sm:$0xff] }
 0x1f4   : > { %5582 = vst [vmem:[#allocation32_spill] sm:$0xff] %v4681_v59  ;;  %3092 = vmatmul.msk.f32.gmra.mxu2 %vm517_vm0, %v3316_v41  ;;  %3124 = vmatmul.msk.f32.gmra.mxu3 %vm517_vm0, %v3316_v41 }
 0x1f7   : > { %v960_v63 = vpop.f32.mrf.mxu2  ;;  %v1025_v55 = vpop.f32.mrf.mxu3 }
 0x1f8   : > { %v1775_v39 = vmul.f32 %v4519_v44, %v960_v63  ;;  %v1823_v41 = vmul.f32 %v4505_v57, %v960_v63  ;;  %v2095_v36 = vmul.f32 %v4519_v44, %v1025_v55  ;;  %v2143_v5 = vmul.f32 %v4505_v57, %v1025_v55  ;;  %v2545_v44 = vld [vmem:[%s5573_s4] sm:$0xff] }
 0x1f9   : > { %2564 = vmatpush.msrb.mxu3 %v2545_v44  ;;  %v1760_v55 = vmul.f32 %v4549_v47, %v4311_v16 }
 0x1fa   : > { %v4704_v56 = vsub.f32 %v1759_v32, %v1775_v39  ;;  %v4706_v62 = vadd.f32 %v1823_v41, %v1807_v13  ;;  %v4708_v31 = vsub.f32 %v2079_v49, %v2095_v36  ;;  %v4710_v59 = vadd.f32 %v2143_v5, %v2127_v52  ;;  %v4730_v5 = vpop.f32.mrf.mxu0 }
 0x1fb   : > { %v1808_v32 = vmul.f32 %v4555_v10, %v4311_v16  ;;  %v2080_v13 = vmul.f32 %v4549_v47, %v4313_v3  ;;  %v2128_v49 = vmul.f32 %v4555_v10, %v4313_v3  ;;  %v3318_v3 = vld [vmem:[%s3602_s16 + $0x50] sm:$0xff] }
 0x1fc   : > { %5583 = vst [vmem:[#allocation33_spill] sm:$0xff] %v4708_v31  ;;  %3093 = vmatmul.msk.f32.gmra.mxu2 %vm517_vm0, %v3317_v42  ;;  %3125 = vmatmul.msk.f32.gmra.mxu3 %vm517_vm0, %v3317_v42 }
 0x1fd   : > { %5584 = vst [vmem:[#allocation34_spill] sm:$0xff] %v4710_v59  ;;  %v4740_v59 = vpop.f32.mrf.mxu1 }
 0x1ff   : > { %v963_v57 = vpop.f32.mrf.mxu2  ;;  %v1028_v63 = vpop.f32.mrf.mxu3 }
 0x200   : > { %v1776_v52 = vmul.f32 %v4555_v10, %v963_v57  ;;  %v1824_v39 = vmul.f32 %v4549_v47, %v963_v57  ;;  %v2096_v41 = vmul.f32 %v4555_v10, %v1028_v63  ;;  %v2144_v36 = vmul.f32 %v4549_v47, %v1028_v63 }
 0x201   : > { %v1761_v57 = vmul.f32 %v4585_v38, %v4335_v20  ;;  %v1809_v63 = vmul.f32 %v4595_v34, %v4335_v20 }
 0x202   : > { %v4732_v42 = vsub.f32 %v1760_v55, %v1776_v52  ;;  %v4734_v44 = vadd.f32 %v1824_v39, %v1808_v32  ;;  %v4736_v16 = vsub.f32 %v2080_v13, %v2096_v41  ;;  %v4738_v31 = vadd.f32 %v2144_v36, %v2128_v49 }
 0x203   : > { %v2081_v55 = vmul.f32 %v4585_v38, %v4337_v14  ;;  %v2129_v32 = vmul.f32 %v4595_v34, %v4337_v14 }
 0x204   : > { %5585 = vst [vmem:[#allocation35_spill] sm:$0xff] %v4736_v16  ;;  %3094 = vmatmul.msk.f32.gmra.mxu2 %vm517_vm0, %v3318_v3  ;;  %3126 = vmatmul.msk.f32.gmra.mxu3 %vm517_vm0, %v3318_v3  ;;  %v4765_v16 = vpop.f32.mrf.mxu0 }
 0x205   : > { %5586 = vst [vmem:[#allocation36_spill] sm:$0xff] %v4738_v31  ;;  %v3319_v31 = vld [vmem:[%s3602_s16 + $0x58] sm:$0xff]  ;;  %v4770_v14 = vpop.f32.mrf.mxu1 }
 0x207   : > { %v966_v10 = vpop.f32.mrf.mxu2  ;;  %v1031_v47 = vpop.f32.mrf.mxu3 }
 0x208   : > { %v1777_v13 = vmul.f32 %v4595_v34, %v966_v10  ;;  %v1825_v49 = vmul.f32 %v4585_v38, %v966_v10  ;;  %v2097_v52 = vmul.f32 %v4595_v34, %v1031_v47  ;;  %v2145_v39 = vmul.f32 %v4585_v38, %v1031_v47 }
 0x209   : > { %v1762_v10 = vmul.f32 %v4627_v50, %v4359_v61  ;;  %v1810_v47 = vmul.f32 %v4632_v53, %v4359_v61 }
 0x20a   : > { %v4757_v41 = vsub.f32 %v1761_v57, %v1777_v13  ;;  %v4759_v36 = vadd.f32 %v1825_v49, %v1809_v63  ;;  %v4761_v3 = vsub.f32 %v2081_v55, %v2097_v52  ;;  %v4763_v20 = vadd.f32 %v2145_v39, %v2129_v32 }
 0x20b   : > { %v2082_v57 = vmul.f32 %v4627_v50, %v4361_v22  ;;  %v2130_v63 = vmul.f32 %v4632_v53, %v4361_v22 }
 0x20c   : > { %5587 = vst [vmem:[#allocation37_spill] sm:$0xff] %v4761_v3  ;;  %3095 = vmatmul.msk.f32.gmra.mxu2 %vm517_vm0, %v3319_v31  ;;  %3127 = vmatmul.msk.f32.gmra.mxu3 %vm517_vm0, %v3319_v31  ;;  %v3320_v3 = vld [vmem:[%s3602_s16 + $0x60] sm:$0xff]  ;;  %v4795_v22 = vpop.f32.mrf.mxu0 }
 0x20f   : > { %v969_v34 = vpop.f32.mrf.mxu2  ;;  %v1034_v38 = vpop.f32.mrf.mxu3 }
 0x210   : > { %v1778_v55 = vmul.f32 %v4632_v53, %v969_v34  ;;  %v1826_v31 = vmul.f32 %v4627_v50, %v969_v34  ;;  %v2098_v32 = vmul.f32 %v4632_v53, %v1034_v38  ;;  %v2146_v13 = vmul.f32 %v4627_v50, %v1034_v38 }
 0x211   : > { %v1763_v50 = vmul.f32 %v4661_v60, %v4383_v0  ;;  %v1811_v38 = vmul.f32 %v4671_v45, %v4383_v0 }
 0x212   : > { %v4784_v49 = vsub.f32 %v1762_v10, %v1778_v55  ;;  %v4786_v52 = vadd.f32 %v1826_v31, %v1810_v47  ;;  %v4788_v39 = vsub.f32 %v2082_v57, %v2098_v32  ;;  %v4790_v61 = vadd.f32 %v2146_v13, %v2130_v63  ;;  %v4805_v57 = vpop.f32.mrf.mxu1 }
 0x213   : > { %v2083_v10 = vmul.f32 %v4661_v60, %v4385_v2  ;;  %v2131_v47 = vmul.f32 %v4671_v45, %v4385_v2 }
 0x214   : > { %5588 = vst [vmem:[#allocation38_spill] sm:$0xff] %v4784_v49  ;;  %3096 = vmatmul.msk.f32.gmra.mxu2 %vm517_vm0, %v3320_v3  ;;  %3128 = vmatmul.msk.f32.gmra.mxu3 %vm517_vm0, %v3320_v3  ;;  %v5594_v49 = vld [vmem:[#allocation24_spill] sm:$0xff] }
 0x215   : > { %5589 = vst [vmem:[#allocation39_spill] sm:$0xff] %v4788_v39 }
 0x216   : > { %5590 = vst [vmem:[#allocation40_spill] sm:$0xff] %v4790_v61  ;;  %v3321_v61 = vld [vmem:[%s3602_s16 + $0x68] sm:$0xff] }
 0x217   : > { %v972_v34 = vpop.f32.mrf.mxu2  ;;  %v1037_v53 = vpop.f32.mrf.mxu3 }
 0x218   : > { %v1779_v3 = vmul.f32 %v4671_v45, %v972_v34  ;;  %v1827_v63 = vmul.f32 %v4661_v60, %v972_v34  ;;  %v2099_v55 = vmul.f32 %v4671_v45, %v1037_v53  ;;  %v2147_v31 = vmul.f32 %v4661_v60, %v1037_v53  ;;  %v5595_v53 = vld [vmem:[#allocation25_spill] sm:$0xff] }
 0x219   : > { %v1764_v45 = vmul.f32 %v4696_v4, %v5594_v49  ;;  %v1812_v60 = vmul.f32 %v4702_v28, %v5594_v49 }
 0x21a   : > { %v4811_v32 = vsub.f32 %v1763_v50, %v1779_v3  ;;  %v4813_v13 = vadd.f32 %v1827_v63, %v1811_v38  ;;  %v4815_v0 = vsub.f32 %v2083_v10, %v2099_v55  ;;  %v4817_v39 = vadd.f32 %v2147_v31, %v2131_v47  ;;  %v4830_v10 = vpop.f32.mrf.mxu0  ;;  %v4836_v55 = vpop.f32.mrf.mxu1 }
 0x21b   : > { %v2084_v50 = vmul.f32 %v4696_v4, %v5595_v53  ;;  %v2132_v38 = vmul.f32 %v4702_v28, %v5595_v53  ;;  %v3322_v53 = vld [vmem:[%s3602_s16 + $0x70] sm:$0xff] }
 0x21c   : > { %5591 = vst [vmem:[#allocation41_spill] sm:$0xff] %v4811_v32  ;;  %3097 = vmatmul.msk.f32.gmra.mxu2 %vm517_vm0, %v3321_v61  ;;  %3129 = vmatmul.msk.f32.gmra.mxu3 %vm517_vm0, %v3321_v61  ;;  %v5599_v32 = vld [vmem:[#allocation26_spill] sm:$0xff] }
 0x21d   : > { %5592 = vst [vmem:[#allocation42_spill] sm:$0xff] %v4815_v0 }
 0x21e   : > { %5593 = vst [vmem:[#allocation43_spill] sm:$0xff] %v4817_v39 }
 0x21f   : > { %v975_v2 = vpop.f32.mrf.mxu2  ;;  %v1040_v34 = vpop.f32.mrf.mxu3 }
 0x220   : > { %v1780_v47 = vmul.f32 %v4702_v28, %v975_v2  ;;  %v1828_v61 = vmul.f32 %v4696_v4, %v975_v2  ;;  %v2100_v3 = vmul.f32 %v4702_v28, %v1040_v34  ;;  %v2148_v63 = vmul.f32 %v4696_v4, %v1040_v34 }
 0x221   : > { %v1765_v4 = vmul.f32 %v4730_v5, %v5599_v32  ;;  %v1813_v34 = vmul.f32 %v4740_v59, %v5599_v32 }
 0x222   : > { %v4838_v31 = vsub.f32 %v1764_v45, %v1780_v47  ;;  %v4840_v49 = vadd.f32 %v1828_v61, %v1812_v60  ;;  %v4842_v0 = vsub.f32 %v2084_v50, %v2100_v3  ;;  %v4844_v39 = vadd.f32 %v2148_v63, %v2132_v38  ;;  %v5600_v45 = vld [vmem:[#allocation27_spill] sm:$0xff]  ;;  %v4861_v63 = vpop.f32.mrf.mxu0 }
 0x223   : > { %v2085_v60 = vmul.f32 %v4730_v5, %v5600_v45  ;;  %v2133_v50 = vmul.f32 %v4740_v59, %v5600_v45  ;;  %v3323_v45 = vld [vmem:[%s3602_s16 + $0x78] sm:$0xff]  ;;  %s4901_s16 = sand.u32 1, %s3418_s18  }
 0x224   : > { %5596 = vst [vmem:[#allocation24_spill] sm:$0xff] %v4838_v31  ;;  %3098 = vmatmul.msk.f32.gmra.mxu2 %vm517_vm0, %v3322_v53  ;;  %3130 = vmatmul.msk.f32.gmra.mxu3 %vm517_vm0, %v3322_v53  ;;  %v4871_v31 = vpop.f32.mrf.mxu1  ;;  %s2922_s14 = sshll.u32 %s4901_s16, 8  ;;  %s2631_s2 = scalar_lea.sflag [#allocation3], %s4901_s16 }
 0x225   : > { %5597 = vst [vmem:[#allocation25_spill] sm:$0xff] %v4842_v0  ;;  %s4924_s15 = scalar_lea.vmem [#allocation2], %s2922_s14  ;;  %s4931_s0 = scalar_lea.vmem [#allocation4], %s2922_s14 }
 0x226   : > { %5598 = vst [vmem:[#allocation44_spill] sm:$0xff] %v4844_v39  ;;  %s2666_s3 = sshll.u32 %s4924_s15, 4  ;;  %s2668_s14 = sshll.u32 %s2665_s13, 4  ;;  %s2667_s3 = int_to_ptr.vmem [resolvable:$true] %s2666_s3  ;;  %s2669_s14 = int_to_ptr.hbm [resolvable:$true] %s2668_s14 }
 0x227   : > { %v978_v2 = vpop.f32.mrf.mxu2  ;;  %v1043_v28 = vpop.f32.mrf.mxu3  ;;  %s3338_s4 = sshra.s32 %s2669_s14, 4  ;;  %s3339_s4 = int_to_ptr.hbm [resolvable:$true] %s3338_s4 }
 0x228   : > { %v1781_v38 = vmul.f32 %v4740_v59, %v978_v2  ;;  %v1829_v47 = vmul.f32 %v4730_v5, %v978_v2  ;;  %v2101_v61 = vmul.f32 %v4740_v59, %v1043_v28  ;;  %v2149_v3 = vmul.f32 %v4730_v5, %v1043_v28  ;;  %v5605_v2 = vld [vmem:[#allocation28_spill] sm:$0xff]  ;;  %s3340_s5 = scalar_lea.hbm %s3339_s4, 256  ;;  %p3345_p1 = scmp.lt.s32.totalorder %s3339_s4, %s5474_s7 }
 0x229   : > { %v1766_v28 = vmul.f32 %v4765_v16, %v5605_v2  ;;  %p3341_p12 = scmp.ne.s32.totalorder %s3339_s4, %s3340_s5  ;;  %p3346_p2 = scmp.lt.s32.totalorder %s3344_s23, %s3340_s5 }
 0x22a   : > { %v4863_v53 = vsub.f32 %v1765_v4, %v1781_v38  ;;  %v4865_v0 = vadd.f32 %v1829_v47, %v1813_v34  ;;  %v4867_v32 = vsub.f32 %v2085_v60, %v2101_v61  ;;  %v4869_v39 = vadd.f32 %v2149_v3, %v2133_v50  ;;  %v5606_v34 = vld [vmem:[#allocation29_spill] sm:$0xff] }
 0x22b   : > { %v1814_v4 = vmul.f32 %v4770_v14, %v5605_v2  ;;  %v2086_v60 = vmul.f32 %v4765_v16, %v5606_v34  ;;  %v2134_v50 = vmul.f32 %v4770_v14, %v5606_v34  ;;  %p3342_p13 = pnand %p3341_p12, %p3539_p4  ;;  %p3347_p3 = por %p3346_p2, %p3345_p1 }
 0x22c   : > { %5601 = vst [vmem:[#allocation26_spill] sm:$0xff] %v4863_v53  ;;  %3099 = vmatmul.msk.f32.gmra.mxu2 %vm517_vm0, %v3323_v45  ;;  %3131 = vmatmul.msk.f32.gmra.mxu3 %vm517_vm0, %v3323_v45  ;;  %v4896_v53 = vpop.f32.mrf.mxu0 }
 0x22d   : > { %5602 = vst [vmem:[#allocation27_spill] sm:$0xff] %v4865_v0  ;;  %v5609_v0 = vld [vmem:[#allocation8_spill] sm:$0xff]  ;;  %p3343_p0 = pneg %p3342_p13 }
 0x22e   : > { %5603 = vst [vmem:[#allocation45_spill] sm:$0xff] %v4867_v32 }
 0x22f   : > { %5604 = vst [vmem:[#allocation46_spill] sm:$0xff] %v4869_v39  ;;  %v981_v59 = vpop.f32.mrf.mxu2  ;;  %v1046_v5 = vpop.f32.mrf.mxu3  ;;  %p3348_p5 = pnand %p3347_p3, %p3343_p0 }
 0x230   : > { %v1782_v38 = vmul.f32 %v4770_v14, %v981_v59  ;;  %v1830_v47 = vmul.f32 %v4765_v16, %v981_v59  ;;  %v2102_v61 = vmul.f32 %v4770_v14, %v1046_v5  ;;  %v2150_v3 = vmul.f32 %v4765_v16, %v1046_v5  ;;  %v4905_v16 = vpop.f32.mrf.mxu1 }
 0x231   : > { %v1863_v14 = vmul.f32 %v4460_v48, %v4795_v22  ;;  %v1911_v59 = vmul.f32 %v4458_v15, %v4795_v22  ;;  %v2183_v5 = vmul.f32 %v4464_v25, %v4805_v57 }
 0x232   : > { %v4888_v45 = vsub.f32 %v1766_v28, %v1782_v38  ;;  %v4890_v32 = vadd.f32 %v1830_v47, %v1814_v4  ;;  %v4892_v39 = vsub.f32 %v2086_v60, %v2102_v61  ;;  %v4894_v2 = vadd.f32 %v2150_v3, %v2134_v50 }
 0x233   : > { %v2231_v28 = vmul.f32 %v4462_v58, %v4805_v57 }
 0x234   : > { %5607 = vst [vmem:[#allocation28_spill] sm:$0xff] %v4892_v39  ;;  %3196 = vmatmul.msk.f32.vlgmr.msrb.gmra.mxu2 %vm740_vm1, %v5609_v0  ;;  %3212 = vmatmul.msk.f32.vlgmr.msrb.gmra.mxu3 %vm740_vm1, %v5609_v0  ;;  %v5610_v39 = vld [vmem:[#allocation9_spill] sm:$0xff] }
 0x235   : > { %5608 = vst [vmem:[#allocation29_spill] sm:$0xff] %v4894_v2 }
 0x237   : > { %v1508_v4 = vpop.f32.mrf.mxu2  ;;  %v1573_v34 = vpop.f32.mrf.mxu3 }
 0x238   : > { %v1847_v60 = vmul.f32 %v4458_v15, %v1508_v4  ;;  %v1895_v0 = vmul.f32 %v4460_v48, %v1508_v4  ;;  %v2167_v50 = vmul.f32 %v4462_v58, %v1573_v34  ;;  %v2215_v38 = vmul.f32 %v4464_v25, %v1573_v34  ;;  %v4929_v15 = vpop.f32.mrf.mxu0  ;;  %v4941_v34 = vpop.f32.mrf.mxu1 }
 0x239   : > { %v1864_v48 = vmul.f32 %v4495_v8, %v4830_v10 }
 0x23a   : > { %v2199_v47 = vadd.f32 %v2183_v5, %v2167_v50  ;;  %v2247_v61 = vsub.f32 %v2215_v38, %v2231_v28  ;;  %v1879_v22 = vadd.f32 %v1863_v14, %v1847_v60  ;;  %v1927_v3 = vsub.f32 %v1895_v0, %v1911_v59 }
 0x23b   : > { %v2184_v14 = vmul.f32 %v4499_v54, %v4836_v55  ;;  %v2232_v59 = vmul.f32 %v4497_v19, %v4836_v55 }
 0x23c   : > { %3197 = vmatmul.msk.f32.gmra.mxu2 %vm740_vm1, %v5610_v39  ;;  %3213 = vmatmul.msk.f32.gmra.mxu3 %vm740_vm1, %v5610_v39  ;;  %v2295_v57 = vmul.f32 %v2199_v47, %v2199_v47  ;;  %v2311_v2 = vmul.f32 %v2247_v61, %v2247_v61  ;;  %2263 = vst [vmem:[%s4924_s15 + $0x8] sm:$0xff] %v2199_v47 }
 0x23d   : > { %v1975_v58 = vmul.f32 %v1879_v22, %v1879_v22  ;;  %2279 = vst [vmem:[%s4931_s0 + $0x8] sm:$0xff] %v2247_v61  ;;  %v1991_v25 = vmul.f32 %v1927_v3, %v1927_v3  ;;  %v1912_v39 = vmul.f32 %v4493_v46, %v4830_v10 }
 0x23e   : > { %v2327_v4 = vadd.f32 %v2311_v2, %v2295_v57  ;;  %1943 = vst [vmem:[%s4924_s15] sm:$0xff] %v1879_v22  ;;  %v5611_v22 = vld [vmem:[#allocation10_spill] sm:$0xff]  ;;  %v1913_v57 = vmul.f32 %v4525_v17, %v4861_v63 }
 0x23f   : > { %v1511_v5 = vpop.f32.mrf.mxu2  ;;  %v1576_v28 = vpop.f32.mrf.mxu3  ;;  %1959 = vst [vmem:[%s4931_s0] sm:$0xff] %v1927_v3  ;;  %v2007_v38 = vadd.f32 %v1991_v25, %v1975_v58  ;;  %v2185_v58 = vmul.f32 %v4531_v21, %v4871_v31 }
 0x240   : > { %v1848_v60 = vmul.f32 %v4493_v46, %v1511_v5  ;;  %v1896_v0 = vmul.f32 %v4495_v8, %v1511_v5  ;;  %v2168_v50 = vmul.f32 %v4497_v19, %v1576_v28  ;;  %v2216_v10 = vmul.f32 %v4499_v54, %v1576_v28  ;;  %2343 = vadd.xlane.f32.xlu1 %v2327_v4 }
 0x241   : > { %2023 = vadd.xlane.f32.xlu0 %v2007_v38  ;;  %v1865_v54 = vmul.f32 %v4527_v24, %v4861_v63 }
 0x242   : > { %v2200_v55 = vadd.f32 %v2184_v14, %v2168_v50  ;;  %v2248_v47 = vsub.f32 %v2216_v10, %v2232_v59  ;;  %v1880_v61 = vadd.f32 %v1864_v48, %v1848_v60  ;;  %v1928_v2 = vsub.f32 %v1896_v0, %v1912_v39  ;;  %v4963_v59 = vpop.f32.mrf.mxu0 }
 0x243   : > { %v2233_v48 = vmul.f32 %v4529_v33, %v4871_v31  ;;  %v4970_v31 = vpop.f32.mrf.mxu1 }
 0x244   : > { %3198 = vmatmul.msk.f32.gmra.mxu2 %vm740_vm1, %v5611_v22  ;;  %3214 = vmatmul.msk.f32.gmra.mxu3 %vm740_vm1, %v5611_v22  ;;  %v2296_v46 = vmul.f32 %v2200_v55, %v2200_v55  ;;  %v2312_v8 = vmul.f32 %v2248_v47, %v2248_v47  ;;  %2264 = vst [vmem:[%s4924_s15 + $0x18] sm:$0xff] %v2200_v55  ;;  %v5612_v55 = vld [vmem:[#allocation11_spill] sm:$0xff] }
 0x245   : > { %v1976_v19 = vmul.f32 %v1880_v61, %v1880_v61  ;;  %2280 = vst [vmem:[%s4931_s0 + $0x18] sm:$0xff] %v2248_v47  ;;  %v1992_v3 = vmul.f32 %v1928_v2, %v1928_v2  ;;  %v2234_v22 = vmul.f32 %v4561_v23, %v4905_v16 }
 0x246   : > { %v2328_v14 = vadd.f32 %v2312_v8, %v2296_v46  ;;  %1944 = vst [vmem:[%s4924_s15 + $0x10] sm:$0xff] %v1880_v61  ;;  %v1914_v61 = vmul.f32 %v4557_v9, %v4896_v53 }
 0x247   : > { %v1514_v25 = vpop.f32.mrf.mxu2  ;;  %v1579_v39 = vpop.f32.mrf.mxu3  ;;  %1960 = vst [vmem:[%s4931_s0 + $0x10] sm:$0xff] %v1928_v2  ;;  %v2008_v60 = vadd.f32 %v1992_v3, %v1976_v19  ;;  %v2186_v2 = vmul.f32 %v4563_v27, %v4905_v16 }
 0x248   : > { %v1849_v5 = vmul.f32 %v4525_v17, %v1514_v25  ;;  %v1897_v28 = vmul.f32 %v4527_v24, %v1514_v25  ;;  %v2169_v4 = vmul.f32 %v4529_v33, %v1579_v39  ;;  %v2217_v63 = vmul.f32 %v4531_v21, %v1579_v39  ;;  %2345 = vadd.xlane.f32.xlu2 %v2328_v14 }
 0x249   : > { %2025 = vadd.xlane.f32.xlu0 %v2008_v60  ;;  %v1866_v21 = vmul.f32 %v4559_v40, %v4896_v53  ;;  %v2187_v60 = vmul.f32 %v4593_v26, %v4941_v34 }
 0x24a   : > { %v2201_v0 = vadd.f32 %v2185_v58, %v2169_v4  ;;  %v2249_v50 = vsub.f32 %v2217_v63, %v2233_v48  ;;  %v1881_v10 = vadd.f32 %v1865_v54, %v1849_v5  ;;  %v1929_v38 = vsub.f32 %v1897_v28, %v1913_v57  ;;  %v4992_v48 = vpop.f32.mrf.mxu0 }
 0x24b   : > { %v4994_v5 = vpop.f32.mrf.mxu1  ;;  %v1867_v28 = vmul.f32 %v4589_v43, %v4929_v15  ;;  %v1915_v63 = vmul.f32 %v4587_v11, %v4929_v15 }
 0x24c   : > { %3199 = vmatmul.msk.f32.gmra.mxu2 %vm740_vm1, %v5612_v55  ;;  %3215 = vmatmul.msk.f32.gmra.mxu3 %vm740_vm1, %v5612_v55  ;;  %v2297_v17 = vmul.f32 %v2201_v0, %v2201_v0  ;;  %v2313_v24 = vmul.f32 %v2249_v50, %v2249_v50  ;;  %2265 = vst [vmem:[%s4924_s15 + $0x28] sm:$0xff] %v2201_v0 }
 0x24d   : > { %v1977_v33 = vmul.f32 %v1881_v10, %v1881_v10  ;;  %2281 = vst [vmem:[%s4931_s0 + $0x28] sm:$0xff] %v2249_v50  ;;  %v1993_v47 = vmul.f32 %v1929_v38, %v1929_v38  ;;  %v2235_v0 = vmul.f32 %v4591_v37, %v4941_v34 }
 0x24e   : > { %v2329_v19 = vadd.f32 %v2313_v24, %v2297_v17  ;;  %1945 = vst [vmem:[%s4924_s15 + $0x20] sm:$0xff] %v1881_v10 }
 0x24f   : > { %v1517_v46 = vpop.f32.mrf.mxu2  ;;  %v1582_v8 = vpop.f32.mrf.mxu3  ;;  %1961 = vst [vmem:[%s4931_s0 + $0x20] sm:$0xff] %v1929_v38  ;;  %v2009_v53 = vadd.f32 %v1993_v47, %v1977_v33 }
 0x250   : > { %v1850_v54 = vmul.f32 %v4557_v9, %v1517_v46  ;;  %v1898_v3 = vmul.f32 %v4559_v40, %v1517_v46  ;;  %v2170_v57 = vmul.f32 %v4561_v23, %v1582_v8  ;;  %v2218_v58 = vmul.f32 %v4563_v27, %v1582_v8  ;;  %v5613_v9 = vld [vmem:[#allocation12_spill] sm:$0xff] }
 0x251   : > { %2347 = vadd.xlane.f32.xlu0 %v2329_v19  ;;  %2027 = vadd.xlane.f32.xlu1 %v2009_v53  ;;  %v1916_v19 = vmul.f32 %v4619_v51, %v4963_v59 }
 0x252   : > { %v1882_v25 = vadd.f32 %v1866_v21, %v1850_v54  ;;  %v1930_v16 = vsub.f32 %v1898_v3, %v1914_v61  ;;  %v2202_v39 = vadd.f32 %v2186_v2, %v2170_v57  ;;  %v2250_v14 = vsub.f32 %v2218_v58, %v2234_v22  ;;  %v5016_v2 = vpop.f32.mrf.mxu0  ;;  %v5614_v22 = vld [vmem:[#allocation13_spill] sm:$0xff] }
 0x253   : > { %v5025_v46 = vpop.f32.mrf.mxu1  ;;  %v2188_v54 = vmul.f32 %v4625_v35, %v4970_v31  ;;  %v2236_v3 = vmul.f32 %v4623_v18, %v4970_v31 }
 0x254   : > { %3200 = vmatmul.msk.f32.gmra.mxu2 %vm740_vm1, %v5613_v9  ;;  %3216 = vmatmul.msk.f32.gmra.mxu3 %vm740_vm1, %v5613_v9  ;;  %v1978_v40 = vmul.f32 %v1882_v25, %v1882_v25  ;;  %v1994_v23 = vmul.f32 %v1930_v16, %v1930_v16  ;;  %1946 = vst [vmem:[%s4924_s15 + $0x30] sm:$0xff] %v1882_v25 }
 0x255   : > { %v2298_v27 = vmul.f32 %v2202_v39, %v2202_v39  ;;  %1962 = vst [vmem:[%s4931_s0 + $0x30] sm:$0xff] %v1930_v16  ;;  %v2314_v4 = vmul.f32 %v2250_v14, %v2250_v14 }
 0x256   : > { %v2010_v38 = vadd.f32 %v1994_v23, %v1978_v40  ;;  %2266 = vst [vmem:[%s4924_s15 + $0x38] sm:$0xff] %v2202_v39 }
 0x257   : > { %v1520_v50 = vpop.f32.mrf.mxu2  ;;  %v1585_v10 = vpop.f32.mrf.mxu3  ;;  %2282 = vst [vmem:[%s4931_s0 + $0x38] sm:$0xff] %v2250_v14  ;;  %v2330_v15 = vadd.f32 %v2314_v4, %v2298_v27  ;;  %v5615_v27 = vld [vmem:[#allocation14_spill] sm:$0xff] }
 0x258   : > { %v1851_v55 = vmul.f32 %v4587_v11, %v1520_v50  ;;  %v1899_v17 = vmul.f32 %v4589_v43, %v1520_v50  ;;  %v2171_v24 = vmul.f32 %v4591_v37, %v1585_v10  ;;  %v2219_v33 = vmul.f32 %v4593_v26, %v1585_v10  ;;  %v5617_v50 = vld [vmem:[#allocation30_spill] sm:$0xff] }
 0x259   : > { %2029 = vadd.xlane.f32.xlu1 %v2010_v38  ;;  %v1868_v26 = vmul.f32 %v4621_v29, %v4963_v59  ;;  %v2237_v10 = vmul.f32 %v5617_v50, %v4994_v5 }
 0x25a   : > { %v1883_v21 = vadd.f32 %v1867_v28, %v1851_v55  ;;  %v1931_v47 = vsub.f32 %v1899_v17, %v1915_v63  ;;  %v2203_v61 = vadd.f32 %v2187_v60, %v2171_v24  ;;  %v2251_v34 = vsub.f32 %v2219_v33, %v2235_v0  ;;  %v5047_v28 = vpop.f32.mrf.mxu0  ;;  %v5616_v60 = vld [vmem:[#allocation31_spill] sm:$0xff] }
 0x25b   : > { %v1917_v63 = vmul.f32 %v4650_v30, %v4992_v48  ;;  %v2189_v0 = vmul.f32 %v5616_v60, %v4994_v5  ;;  %v5057_v24 = vpop.f32.mrf.mxu1 }
 0x25c   : > { %3201 = vmatmul.msk.f32.gmra.mxu2 %vm740_vm1, %v5614_v22  ;;  %3217 = vmatmul.msk.f32.gmra.mxu3 %vm740_vm1, %v5614_v22  ;;  %v1979_v11 = vmul.f32 %v1883_v21, %v1883_v21  ;;  %v1995_v43 = vmul.f32 %v1931_v47, %v1931_v47  ;;  %1947 = vst [vmem:[%s4924_s15 + $0x40] sm:$0xff] %v1883_v21 }
 0x25d   : > { %v2299_v37 = vmul.f32 %v2203_v61, %v2203_v61  ;;  %1963 = vst [vmem:[%s4931_s0 + $0x40] sm:$0xff] %v1931_v47  ;;  %v2315_v8 = vmul.f32 %v2251_v34, %v2251_v34 }
 0x25e   : > { %v2011_v53 = vadd.f32 %v1995_v43, %v1979_v11  ;;  %2267 = vst [vmem:[%s4924_s15 + $0x48] sm:$0xff] %v2203_v61  ;;  %v5618_v11 = vld [vmem:[#allocation15_spill] sm:$0xff] }
 0x25f   : > { %v1523_v57 = vpop.f32.mrf.mxu2  ;;  %v1588_v58 = vpop.f32.mrf.mxu3  ;;  %2283 = vst [vmem:[%s4931_s0 + $0x48] sm:$0xff] %v2251_v34  ;;  %v2331_v59 = vadd.f32 %v2315_v8, %v2299_v37  ;;  %v1870_v8 = vmul.f32 %v4679_v6, %v5016_v2 }
 0x260   : > { %v1852_v25 = vmul.f32 %v4619_v51, %v1523_v57  ;;  %v1900_v16 = vmul.f32 %v4621_v29, %v1523_v57  ;;  %v2172_v39 = vmul.f32 %v4623_v18, %v1588_v58  ;;  %v2220_v14 = vmul.f32 %v4625_v35, %v1588_v58  ;;  %2031 = vadd.xlane.f32.xlu2 %v2011_v53 }
 0x261   : > { %2349 = vadd.xlane.f32.xlu1 %v2330_v15  ;;  %v1869_v35 = vmul.f32 %v4652_v12, %v4992_v48  ;;  %v2190_v57 = vmul.f32 %v4683_v7, %v5025_v46 }
 0x262   : > { %v2204_v9 = vadd.f32 %v2188_v54, %v2172_v39  ;;  %v2252_v40 = vsub.f32 %v2220_v14, %v2236_v3  ;;  %v1884_v31 = vadd.f32 %v1868_v26, %v1852_v25  ;;  %v1932_v23 = vsub.f32 %v1900_v16, %v1916_v19  ;;  %v1665_v58 = vpop.f32.mrf.mxu0  ;;  %v5619_v39 = vld [vmem:[#allocation32_spill] sm:$0xff] }
 0x263   : > { %v1918_v3 = vmul.f32 %v4677_v1, %v5016_v2  ;;  %v2238_v14 = vmul.f32 %v5619_v39, %v5025_v46  ;;  %v1730_v2 = vpop.f32.mrf.mxu1 }
 0x264   : > { %3202 = vmatmul.msk.f32.gmra.mxu2 %vm740_vm1, %v5615_v27  ;;  %3218 = vmatmul.msk.f32.gmra.mxu3 %vm740_vm1, %v5615_v27  ;;  %v2300_v51 = vmul.f32 %v2204_v9, %v2204_v9  ;;  %v2316_v29 = vmul.f32 %v2252_v40, %v2252_v40  ;;  %2268 = vst [vmem:[%s4924_s15 + $0x58] sm:$0xff] %v2204_v9 }
 0x265   : > { %v1980_v18 = vmul.f32 %v1884_v31, %v1884_v31  ;;  %2284 = vst [vmem:[%s4931_s0 + $0x58] sm:$0xff] %v2252_v40  ;;  %v1996_v4 = vmul.f32 %v1932_v23, %v1932_v23 }
 0x266   : > { %v2332_v17 = vadd.f32 %v2316_v29, %v2300_v51  ;;  %1948 = vst [vmem:[%s4924_s15 + $0x50] sm:$0xff] %v1884_v31 }
 0x267   : > { %v1526_v38 = vpop.f32.mrf.mxu2  ;;  %v1591_v55 = vpop.f32.mrf.mxu3  ;;  %1964 = vst [vmem:[%s4931_s0 + $0x50] sm:$0xff] %v1932_v23  ;;  %v2012_v5 = vadd.f32 %v1996_v4, %v1980_v18  ;;  %v5620_v23 = vld [vmem:[#allocation16_spill] sm:$0xff]  ;;  %v1871_v4 = vmul.f32 %v4706_v62, %v5047_v28 }
 0x268   : > { %v1853_v33 = vmul.f32 %v4650_v30, %v1526_v38  ;;  %v1901_v15 = vmul.f32 %v4652_v12, %v1526_v38  ;;  %v2173_v21 = vmul.f32 %v5617_v50, %v1591_v55  ;;  %v2221_v48 = vmul.f32 %v5616_v60, %v1591_v55  ;;  %2353 = vadd.xlane.f32.xlu0 %v2332_v17  ;;  %v5622_v55 = vld [vmem:[#allocation33_spill] sm:$0xff] }
 0x269   : > { %2351 = vadd.xlane.f32.xlu2 %v2331_v59  ;;  %v2239_v17 = vmul.f32 %v5622_v55, %v5057_v24 }
 0x26a   : > { %v2205_v47 = vadd.f32 %v2189_v0, %v2173_v21  ;;  %v2253_v61 = vsub.f32 %v2221_v48, %v2237_v10  ;;  %v1885_v34 = vadd.f32 %v1869_v35, %v1853_v33  ;;  %v1933_v22 = vsub.f32 %v1901_v15, %v1917_v63  ;;  %v5621_v10 = vld [vmem:[#allocation34_spill] sm:$0xff] }
 0x26b   : > { %v1919_v63 = vmul.f32 %v4704_v56, %v5047_v28  ;;  %v2191_v38 = vmul.f32 %v5621_v10, %v5057_v24  ;;  %v1668_v28 = vpop.f32.mrf.mxu0 }
 0x26c   : > { %3203 = vmatmul.msk.f32.gmra.mxu2 %vm740_vm1, %v5618_v11  ;;  %v2301_v30 = vmul.f32 %v2205_v47, %v2205_v47  ;;  %v2317_v12 = vmul.f32 %v2253_v61, %v2253_v61  ;;  %2269 = vst [vmem:[%s4924_s15 + $0x68] sm:$0xff] %v2205_v47  ;;  %v1981_v43 = vmul.f32 %v1885_v34, %v1885_v34  ;;  %v5623_v47 = vld [vmem:[#allocation17_spill] sm:$0xff] }
 0x26d   : > { %3219 = vmatmul.msk.f32.gmra.mxu3 %vm740_vm1, %v5618_v11  ;;  %2285 = vst [vmem:[%s4931_s0 + $0x68] sm:$0xff] %v2253_v61  ;;  %v1997_v37 = vmul.f32 %v1933_v22, %v1933_v22 }
 0x26e   : > { %v2333_v26 = vadd.f32 %v2317_v12, %v2301_v30  ;;  %1949 = vst [vmem:[%s4924_s15 + $0x60] sm:$0xff] %v1885_v34  ;;  %v1872_v30 = vmul.f32 %v4734_v44, %v1665_v58 }
 0x26f   : > { %v1529_v19 = vpop.f32.mrf.mxu2  ;;  %v2013_v54 = vadd.f32 %v1997_v37, %v1981_v43  ;;  %1965 = vst [vmem:[%s4931_s0 + $0x60] sm:$0xff] %v1933_v22  ;;  %v1594_v16 = vpop.f32.mrf.mxu3  ;;  %v1920_v37 = vmul.f32 %v4732_v42, %v1665_v58 }
 0x270   : > { %v1854_v53 = vmul.f32 %v4677_v1, %v1529_v19  ;;  %v1902_v25 = vmul.f32 %v4679_v6, %v1529_v19  ;;  %2355 = vadd.xlane.f32.xlu1 %v2333_v26  ;;  %v2174_v59 = vmul.f32 %v5619_v39, %v1594_v16  ;;  %v2222_v9 = vmul.f32 %v4683_v7, %v1594_v16  ;;  %v5624_v26 = vld [vmem:[#allocation36_spill] sm:$0xff] }
 0x271   : > { %2033 = vadd.xlane.f32.xlu2 %v2012_v5  ;;  %2035 = vadd.xlane.f32.xlu0 %v2013_v54  ;;  %v1733_v5 = vpop.f32.mrf.mxu1 }
 0x272   : > { %v1886_v40 = vadd.f32 %v1870_v8, %v1854_v53  ;;  %v1934_v1 = vsub.f32 %v1902_v25, %v1918_v3  ;;  %v2206_v31 = vadd.f32 %v2190_v57, %v2174_v59  ;;  %v2254_v6 = vsub.f32 %v2222_v9, %v2238_v14  ;;  %v5625_v57 = vld [vmem:[#allocation35_spill] sm:$0xff] }
 0x273   : > { %v2192_v8 = vmul.f32 %v5624_v26, %v1730_v2  ;;  %v2240_v53 = vmul.f32 %v5625_v57, %v1730_v2  ;;  %v1671_v9 = vpop.f32.mrf.mxu0 }
 0x274   : > { %3204 = vmatmul.msk.f32.gmra.mxu2 %vm740_vm1, %v5620_v23  ;;  %v1982_v27 = vmul.f32 %v1886_v40, %v1886_v40  ;;  %v1998_v51 = vmul.f32 %v1934_v1, %v1934_v1  ;;  %1950 = vst [vmem:[%s4924_s15 + $0x70] sm:$0xff] %v1886_v40  ;;  %v2302_v46 = vmul.f32 %v2206_v31, %v2206_v31 }
 0x275   : > { %3220 = vmatmul.msk.f32.gmra.mxu3 %vm740_vm1, %v5620_v23  ;;  %v2318_v7 = vmul.f32 %v2254_v6, %v2254_v6  ;;  %2270 = vst [vmem:[%s4924_s15 + $0x78] sm:$0xff] %v2206_v31  ;;  %v1873_v23 = vmul.f32 %v4759_v36, %v1668_v28 }
 0x276   : > { %2286 = vst [vmem:[%s4931_s0 + $0x78] sm:$0xff] %v2254_v6  ;;  %v2014_v29 = vadd.f32 %v1998_v51, %v1982_v27 }
 0x277   : > { %v1532_v18 = vpop.f32.mrf.mxu2  ;;  %v2334_v35 = vadd.f32 %v2318_v7, %v2302_v46  ;;  %1966 = vst [vmem:[%s4931_s0 + $0x70] sm:$0xff] %v1934_v1  ;;  %v1597_v50 = vpop.f32.mrf.mxu3  ;;  %v1921_v46 = vmul.f32 %v4757_v41, %v1668_v28  ;;  %v2193_v7 = vmul.f32 %v4763_v20, %v1733_v5 }
 0x278   : > { %v1855_v60 = vmul.f32 %v4704_v56, %v1532_v18  ;;  %v1903_v0 = vmul.f32 %v4706_v62, %v1532_v18  ;;  %2037 = vadd.xlane.f32.xlu1 %v2014_v29  ;;  %v2175_v33 = vmul.f32 %v5622_v55, %v1597_v50  ;;  %v2223_v15 = vmul.f32 %v5621_v10, %v1597_v50 }
 0x279   : > { %2357 = vadd.xlane.f32.xlu2 %v2334_v35  ;;  %v1736_v31 = vpop.f32.mrf.mxu1 }
 0x27a   : > { %v1887_v21 = vadd.f32 %v1871_v4, %v1855_v60  ;;  %v1935_v56 = vsub.f32 %v1903_v0, %v1919_v63  ;;  %v2207_v62 = vadd.f32 %v2191_v38, %v2175_v33  ;;  %v2255_v48 = vsub.f32 %v2223_v15, %v2239_v17  ;;  %v5627_v4 = vld [vmem:[#allocation37_spill] sm:$0xff] }
 0x27b   : > { %v2241_v63 = vmul.f32 %v5627_v4, %v1733_v5  ;;  %v1674_v15 = vpop.f32.mrf.mxu0 }
 0x27c   : > { %1951 = vst [vmem:[%s4924_s15 + $0x80] sm:$0xff] %v1887_v21  ;;  %3205 = vmatmul.msk.f32.gmra.mxu2 %vm740_vm1, %v5623_v47  ;;  %v1983_v61 = vmul.f32 %v1887_v21, %v1887_v21  ;;  %v1999_v34 = vmul.f32 %v1935_v56, %v1935_v56  ;;  %v2303_v24 = vmul.f32 %v2207_v62, %v2207_v62 }
 0x27d   : > { %1967 = vst [vmem:[%s4931_s0 + $0x80] sm:$0xff] %v1935_v56  ;;  %3221 = vmatmul.msk.f32.gmra.mxu3 %vm740_vm1, %v5623_v47  ;;  %v2319_v22 = vmul.f32 %v2255_v48, %v2255_v48  ;;  %v1874_v21 = vmul.f32 %v4786_v52, %v1671_v9  ;;  %v5629_v56 = vld [vmem:[#allocation38_spill] sm:$0xff]  ;;  %v5631_v47 = vld [vmem:[#allocation40_spill] sm:$0xff] }
 0x27e   : > { %2271 = vst [vmem:[%s4924_s15 + $0x88] sm:$0xff] %v2207_v62  ;;  %v2015_v11 = vadd.f32 %v1999_v34, %v1983_v61  ;;  %v1922_v62 = vmul.f32 %v5629_v56, %v1671_v9  ;;  %v2194_v61 = vmul.f32 %v5631_v47, %v1736_v31  ;;  %v5632_v34 = vld [vmem:[#allocation39_spill] sm:$0xff]  ;;  %v5634_v9 = vld [vmem:[#allocation41_spill] sm:$0xff] }
 0x27f   : > { %2287 = vst [vmem:[%s4931_s0 + $0x88] sm:$0xff] %v2255_v48  ;;  %v1535_v12 = vpop.f32.mrf.mxu2  ;;  %v2335_v43 = vadd.f32 %v2319_v22, %v2303_v24  ;;  %v1600_v3 = vpop.f32.mrf.mxu3  ;;  %v2242_v24 = vmul.f32 %v5632_v34, %v1736_v31 }
 0x280   : > { %v1856_v19 = vmul.f32 %v4732_v42, %v1535_v12  ;;  %v1904_v54 = vmul.f32 %v4734_v44, %v1535_v12  ;;  %v2176_v25 = vmul.f32 %v5625_v57, %v1600_v3  ;;  %v2224_v16 = vmul.f32 %v5624_v26, %v1600_v3  ;;  %v5626_v42 = vld [vmem:[#allocation18_spill] sm:$0xff] }
 0x281   : > { %2359 = vadd.xlane.f32.xlu0 %v2335_v43  ;;  %2039 = vadd.xlane.f32.xlu2 %v2015_v11  ;;  %v1739_v22 = vpop.f32.mrf.mxu1 }
 0x282   : > { %v1888_v39 = vadd.f32 %v1872_v30, %v1856_v19  ;;  %v1936_v14 = vsub.f32 %v1904_v54, %v1920_v37  ;;  %v2208_v58 = vadd.f32 %v2192_v8, %v2176_v25  ;;  %v2256_v59 = vsub.f32 %v2224_v16, %v2240_v53 }
 0x283   : > { %v3436_v19 = vmov 0.0  }
 0x284   : > { %1952 = vst [vmem:[%s4924_s15 + $0x90] sm:$0xff] %v1888_v39  ;;  %3206 = vmatmul.msk.f32.gmra.mxu2 %vm740_vm1, %v5626_v42  ;;  %v1984_v44 = vmul.f32 %v1888_v39, %v1888_v39  ;;  %v2000_v40 = vmul.f32 %v1936_v14, %v1936_v14  ;;  %v2304_v2 = vmul.f32 %v2208_v58, %v2208_v58 }
 0x285   : > { %1968 = vst [vmem:[%s4931_s0 + $0x90] sm:$0xff] %v1936_v14  ;;  %3222 = vmatmul.msk.f32.gmra.mxu3 %vm740_vm1, %v5626_v42  ;;  %v2320_v1 = vmul.f32 %v2256_v59, %v2256_v59  ;;  %v1875_v14 = vmul.f32 %v4813_v13, %v1674_v15  ;;  %v1923_v42 = vmul.f32 %v5634_v9, %v1674_v15 }
 0x286   : > { %2272 = vst [vmem:[%s4924_s15 + $0x98] sm:$0xff] %v2208_v58  ;;  %v2016_v6 = vadd.f32 %v2000_v40, %v1984_v44  ;;  %v5635_v44 = vld [vmem:[#allocation43_spill] sm:$0xff] }
 0x287   : > { %2288 = vst [vmem:[%s4931_s0 + $0x98] sm:$0xff] %v2256_v59  ;;  %v1538_v27 = vpop.f32.mrf.mxu2  ;;  %v2336_v51 = vadd.f32 %v2320_v1, %v2304_v2  ;;  %v1603_v35 = vpop.f32.mrf.mxu3  ;;  %v2195_v40 = vmul.f32 %v5635_v44, %v1739_v22 }
 0x288   : > { %v1857_v29 = vmul.f32 %v4757_v41, %v1538_v27  ;;  %v1905_v18 = vmul.f32 %v4759_v36, %v1538_v27  ;;  %v2177_v60 = vmul.f32 %v5627_v4, %v1603_v35  ;;  %v2225_v0 = vmul.f32 %v4763_v20, %v1603_v35  ;;  %v5628_v41 = vld [vmem:[#allocation19_spill] sm:$0xff]  ;;  %2396 = vst.msk [vmem:[%s5150_s28] sm:$0xff] %vm2395_vm2, %v3436_v19  ;;  %v1677_v2 = vpop.f32.mrf.mxu0  ;;  %v5637_v4 = vld [vmem:[#allocation21_spill] sm:$0xff] }
 0x289   : > { %2361 = vadd.xlane.f32.xlu1 %v2336_v51  ;;  %2041 = vadd.xlane.f32.xlu0 %v2016_v6  ;;  %2397 = vst.msk [vmem:[%s5150_s28 + $0x8] sm:$0xff] %vm2395_vm2, %v3436_v19 }
 0x28a   : > { %v1889_v50 = vadd.f32 %v1873_v23, %v1857_v29  ;;  %v1937_v10 = vsub.f32 %v1905_v18, %v1921_v46  ;;  %v2209_v38 = vadd.f32 %v2193_v7, %v2177_v60  ;;  %v2257_v55 = vsub.f32 %v2225_v0, %v2241_v63  ;;  %2398 = vst.msk [vmem:[%s5150_s28 + $0x10] sm:$0xff] %vm2395_vm2, %v3436_v19  ;;  %v5636_v23 = vld [vmem:[#allocation42_spill] sm:$0xff]  ;;  %v1742_v7 = vpop.f32.mrf.mxu1 }
 0x28b   : > { %v2243_v27 = vmul.f32 %v5636_v23, %v1739_v22  ;;  %2399 = vst.msk [vmem:[%s5150_s28 + $0x18] sm:$0xff] %vm2395_vm2, %v3436_v19 }
 0x28c   : > { %1953 = vst [vmem:[%s4924_s15 + $0xa0] sm:$0xff] %v1889_v50  ;;  %3207 = vmatmul.msk.f32.gmra.mxu2 %vm740_vm1, %v5628_v41  ;;  %v1985_v36 = vmul.f32 %v1889_v50, %v1889_v50  ;;  %v2001_v17 = vmul.f32 %v1937_v10, %v1937_v10  ;;  %v2305_v20 = vmul.f32 %v2209_v38, %v2209_v38 }
 0x28d   : > { %1969 = vst [vmem:[%s4931_s0 + $0xa0] sm:$0xff] %v1937_v10  ;;  %3223 = vmatmul.msk.f32.gmra.mxu3 %vm740_vm1, %v5628_v41  ;;  %v2321_v33 = vmul.f32 %v2257_v55, %v2257_v55 }
 0x28e   : > { %2273 = vst [vmem:[%s4924_s15 + $0xa8] sm:$0xff] %v2209_v38  ;;  %v2017_v28 = vadd.f32 %v2001_v17, %v1985_v36  ;;  %v1876_v38 = vmul.f32 %v4840_v49, %v1677_v2  ;;  %v5638_v36 = vld [vmem:[#allocation24_spill] sm:$0xff] }
 0x28f   : > { %2289 = vst [vmem:[%s4931_s0 + $0xa8] sm:$0xff] %v2257_v55  ;;  %v1541_v48 = vpop.f32.mrf.mxu2  ;;  %v2337_v5 = vadd.f32 %v2321_v33, %v2305_v20  ;;  %v1606_v12 = vpop.f32.mrf.mxu3  ;;  %v1924_v17 = vmul.f32 %v5638_v36, %v1677_v2  ;;  %v5639_v20 = vld [vmem:[#allocation44_spill] sm:$0xff] }
 0x290   : > { %v1858_v11 = vmul.f32 %v5629_v56, %v1541_v48  ;;  %v1906_v30 = vmul.f32 %v4786_v52, %v1541_v48  ;;  %v2178_v43 = vmul.f32 %v5632_v34, %v1606_v12  ;;  %v2226_v37 = vmul.f32 %v5631_v47, %v1606_v12  ;;  %v5633_v52 = vld [vmem:[#allocation20_spill] sm:$0xff]  ;;  %2400 = vst.msk [vmem:[%s5150_s28 + $0x20] sm:$0xff] %vm2395_vm2, %v3436_v19  ;;  %v5640_v56 = vld [vmem:[#allocation25_spill] sm:$0xff]  ;;  %v1680_v47 = vpop.f32.mrf.mxu0 }
 0x291   : > { %2363 = vadd.xlane.f32.xlu2 %v2337_v5  ;;  %2043 = vadd.xlane.f32.xlu1 %v2017_v28  ;;  %2401 = vst.msk [vmem:[%s5150_s28 + $0x28] sm:$0xff] %vm2395_vm2, %v3436_v19  ;;  %v2196_v33 = vmul.f32 %v5639_v20, %v1742_v7 }
 0x292   : > { %v1890_v26 = vadd.f32 %v1874_v21, %v1858_v11  ;;  %v1938_v8 = vsub.f32 %v1906_v30, %v1922_v62  ;;  %v2210_v54 = vadd.f32 %v2194_v61, %v2178_v43  ;;  %v2258_v3 = vsub.f32 %v2226_v37, %v2242_v24  ;;  %2402 = vst.msk [vmem:[%s5150_s28 + $0x30] sm:$0xff] %vm2395_vm2, %v3436_v19  ;;  %v1745_v22 = vpop.f32.mrf.mxu1  ;;  %v5641_v11 = vld [vmem:[#allocation22_spill] sm:$0xff] }
 0x293   : > { %v2244_v62 = vmul.f32 %v5640_v56, %v1742_v7  ;;  %2403 = vst.msk [vmem:[%s5150_s28 + $0x38] sm:$0xff] %vm2395_vm2, %v3436_v19 }
 0x294   : > { %1954 = vst [vmem:[%s4924_s15 + $0xb0] sm:$0xff] %v1890_v26  ;;  %3208 = vmatmul.msk.f32.gmra.mxu2 %vm740_vm1, %v5633_v52  ;;  %v1986_v57 = vmul.f32 %v1890_v26, %v1890_v26  ;;  %v2002_v53 = vmul.f32 %v1938_v8, %v1938_v8  ;;  %v2306_v25 = vmul.f32 %v2210_v54, %v2210_v54 }
 0x295   : > { %1970 = vst [vmem:[%s4931_s0 + $0xb0] sm:$0xff] %v1938_v8  ;;  %3224 = vmatmul.msk.f32.gmra.mxu3 %vm740_vm1, %v5633_v52  ;;  %v2322_v16 = vmul.f32 %v2258_v3, %v2258_v3  ;;  %v5642_v8 = vld [vmem:[#allocation27_spill] sm:$0xff] }
 0x296   : > { %2274 = vst [vmem:[%s4924_s15 + $0xb8] sm:$0xff] %v2210_v54  ;;  %v2018_v39 = vadd.f32 %v2002_v53, %v1986_v57  ;;  %v1877_v54 = vmul.f32 %v5642_v8, %v1680_v47  ;;  %v5643_v57 = vld [vmem:[#allocation26_spill] sm:$0xff] }
 0x297   : > { %2290 = vst [vmem:[%s4931_s0 + $0xb8] sm:$0xff] %v2258_v3  ;;  %v1544_v58 = vpop.f32.mrf.mxu2  ;;  %v2338_v59 = vadd.f32 %v2322_v16, %v2306_v25  ;;  %v1609_v6 = vpop.f32.mrf.mxu3  ;;  %v1925_v53 = vmul.f32 %v5643_v57, %v1680_v47  ;;  %v5644_v25 = vld [vmem:[#allocation46_spill] sm:$0xff] }
 0x298   : > { %v1859_v1 = vmul.f32 %v5634_v9, %v1544_v58  ;;  %v1907_v31 = vmul.f32 %v4813_v13, %v1544_v58  ;;  %v2179_v51 = vmul.f32 %v5636_v23, %v1609_v6  ;;  %v2227_v46 = vmul.f32 %v5635_v44, %v1609_v6  ;;  %2404 = vst.msk [vmem:[%s5150_s28 + $0x40] sm:$0xff] %vm2395_vm2, %v3436_v19  ;;  %v1683_v6 = vpop.f32.mrf.mxu0  ;;  %v5646_v23 = vld [vmem:[#allocation23_spill] sm:$0xff] }
 0x299   : > { %2365 = vadd.xlane.f32.xlu0 %v2338_v59  ;;  %2045 = vadd.xlane.f32.xlu2 %v2018_v39  ;;  %2405 = vst.msk [vmem:[%s5150_s28 + $0x48] sm:$0xff] %vm2395_vm2, %v3436_v19  ;;  %v2197_v16 = vmul.f32 %v5644_v25, %v1745_v22  ;;  %v5645_v59 = vld [vmem:[#allocation45_spill] sm:$0xff] }
 0x29a   : > { %v1891_v13 = vadd.f32 %v1875_v14, %v1859_v1  ;;  %v1939_v29 = vsub.f32 %v1907_v31, %v1923_v42  ;;  %v2211_v18 = vadd.f32 %v2195_v40, %v2179_v51  ;;  %v2259_v35 = vsub.f32 %v2227_v46, %v2243_v27  ;;  %2406 = vst.msk [vmem:[%s5150_s28 + $0x50] sm:$0xff] %vm2395_vm2, %v3436_v19 }
 0x29b   : > { %v2245_v9 = vmul.f32 %v5645_v59, %v1745_v22  ;;  %2407 = vst.msk [vmem:[%s5150_s28 + $0x58] sm:$0xff] %vm2395_vm2, %v3436_v19 }
 0x29c   : > { %1955 = vst [vmem:[%s4924_s15 + $0xc0] sm:$0xff] %v1891_v13  ;;  %3209 = vmatmul.msk.f32.gmra.mxu2 %vm740_vm1, %v5637_v4  ;;  %v1987_v63 = vmul.f32 %v1891_v13, %v1891_v13  ;;  %v2003_v60 = vmul.f32 %v1939_v29, %v1939_v29  ;;  %v2307_v0 = vmul.f32 %v2211_v18, %v2211_v18  ;;  %v1748_v13 = vpop.f32.mrf.mxu1 }
 0x29d   : > { %1971 = vst [vmem:[%s4931_s0 + $0xc0] sm:$0xff] %v1939_v29  ;;  %3225 = vmatmul.msk.f32.gmra.mxu3 %vm740_vm1, %v5637_v4  ;;  %v2323_v50 = vmul.f32 %v2259_v35, %v2259_v35 }
 0x29e   : > { %2275 = vst [vmem:[%s4924_s15 + $0xc8] sm:$0xff] %v2211_v18  ;;  %v2019_v10 = vadd.f32 %v2003_v60, %v1987_v63  ;;  %v1878_v18 = vmul.f32 %v4890_v32, %v1683_v6  ;;  %v1926_v63 = vmul.f32 %v4888_v45, %v1683_v6 }
 0x29f   : > { %2291 = vst [vmem:[%s4931_s0 + $0xc8] sm:$0xff] %v2259_v35  ;;  %v1547_v55 = vpop.f32.mrf.mxu2  ;;  %v2339_v41 = vadd.f32 %v2323_v50, %v2307_v0  ;;  %v1612_v21 = vpop.f32.mrf.mxu3 }
 0x2a0   : > { %v1860_v15 = vmul.f32 %v5638_v36, %v1547_v55  ;;  %v1908_v28 = vmul.f32 %v4840_v49, %v1547_v55  ;;  %v2180_v48 = vmul.f32 %v5640_v56, %v1612_v21  ;;  %v2228_v5 = vmul.f32 %v5639_v20, %v1612_v21  ;;  %2408 = vst.msk [vmem:[%s5150_s28 + $0x60] sm:$0xff] %vm2395_vm2, %v3436_v19  ;;  %v5648_v55 = vld [vmem:[#allocation28_spill] sm:$0xff] }
 0x2a1   : > { %2367 = vadd.xlane.f32.xlu1 %v2339_v41  ;;  %2047 = vadd.xlane.f32.xlu0 %v2019_v10  ;;  %2409 = vst.msk [vmem:[%s5150_s28 + $0x68] sm:$0xff] %vm2395_vm2, %v3436_v19  ;;  %v5647_v10 = vld [vmem:[#allocation29_spill] sm:$0xff]  ;;  %v2246_v41 = vmul.f32 %v5648_v55, %v1748_v13 }
 0x2a2   : > { %v1892_v49 = vadd.f32 %v1876_v38, %v1860_v15  ;;  %v1940_v61 = vsub.f32 %v1908_v28, %v1924_v17  ;;  %v2212_v34 = vadd.f32 %v2196_v33, %v2180_v48  ;;  %v2260_v24 = vsub.f32 %v2228_v5, %v2244_v62  ;;  %2410 = vst.msk [vmem:[%s5150_s28 + $0x70] sm:$0xff] %vm2395_vm2, %v3436_v19  ;;  %v2412_v62 = vld [vmem:[%s5150_s28] sm:$0xff] }
 0x2a3   : > { %v2198_v38 = vmul.f32 %v5647_v10, %v1748_v13  ;;  %2411 = vst.msk [vmem:[%s5150_s28 + $0x78] sm:$0xff] %vm2395_vm2, %v3436_v19 }
 0x2a4   : > { %1956 = vst [vmem:[%s4924_s15 + $0xd0] sm:$0xff] %v1892_v49  ;;  %3210 = vmatmul.msk.f32.gmra.mxu2 %vm740_vm1, %v5641_v11  ;;  %v1988_v30 = vmul.f32 %v1892_v49, %v1892_v49  ;;  %v2004_v12 = vmul.f32 %v1940_v61, %v1940_v61  ;;  %v2308_v43 = vmul.f32 %v2212_v34, %v2212_v34 }
 0x2a5   : > { %1972 = vst [vmem:[%s4931_s0 + $0xd0] sm:$0xff] %v1940_v61  ;;  %3226 = vmatmul.msk.f32.gmra.mxu3 %vm740_vm1, %v5641_v11  ;;  %v2324_v37 = vmul.f32 %v2260_v24, %v2260_v24 }
 0x2a6   : > { %2276 = vst [vmem:[%s4924_s15 + $0xd8] sm:$0xff] %v2212_v34  ;;  %v2020_v26 = vadd.f32 %v2004_v12, %v1988_v30 }
 0x2a7   : > { %2292 = vst [vmem:[%s4931_s0 + $0xd8] sm:$0xff] %v2260_v24  ;;  %v1550_v3 = vpop.f32.mrf.mxu2  ;;  %v5229_v52 = vadd.f32 %v2324_v37, %v2308_v43  ;;  %v1615_v58 = vpop.f32.mrf.mxu3 }
 0x2a8   : > { %v1861_v39 = vmul.f32 %v5643_v57, %v1550_v3  ;;  %v1909_v14 = vmul.f32 %v5642_v8, %v1550_v3  ;;  %v2181_v42 = vmul.f32 %v5645_v59, %v1615_v58  ;;  %v2229_v44 = vmul.f32 %v5644_v25, %v1615_v58 }
 0x2a9   : > { %2049 = vadd.xlane.f32.xlu1 %v2020_v26 }
 0x2aa   : > { %v1893_v40 = vadd.f32 %v1877_v54, %v1861_v39  ;;  %v1941_v2 = vsub.f32 %v1909_v14, %v1925_v53  ;;  %v2213_v1 = vadd.f32 %v2197_v16, %v2181_v42  ;;  %v2261_v31 = vsub.f32 %v2229_v44, %v2245_v9 }
 0x2ac   : > { %1957 = vst [vmem:[%s4924_s15 + $0xe0] sm:$0xff] %v1893_v40  ;;  %3211 = vmatmul.msk.f32.gmra.mxu2 %vm740_vm1, %v5646_v23  ;;  %v1989_v27 = vmul.f32 %v1893_v40, %v1893_v40  ;;  %v2005_v51 = vmul.f32 %v1941_v2, %v1941_v2  ;;  %v2309_v46 = vmul.f32 %v2213_v1, %v2213_v1 }
 0x2ad   : > { %1973 = vst [vmem:[%s4931_s0 + $0xe0] sm:$0xff] %v1941_v2  ;;  %3227 = vmatmul.msk.f32.gmra.mxu3 %vm740_vm1, %v5646_v23  ;;  %v2325_v7 = vmul.f32 %v2261_v31, %v2261_v31 }
 0x2ae   : > { %2277 = vst [vmem:[%s4924_s15 + $0xe8] sm:$0xff] %v2213_v1  ;;  %v2021_v29 = vadd.f32 %v2005_v51, %v1989_v27 }
 0x2af   : > { %2293 = vst [vmem:[%s4931_s0 + $0xe8] sm:$0xff] %v2261_v31  ;;  %v1553_v35 = vpop.f32.mrf.mxu2  ;;  %v5259_v4 = vadd.f32 %v2325_v7, %v2309_v46  ;;  %v1618_v50 = vpop.f32.mrf.mxu3 }
 0x2b0   : > { %v1862_v60 = vmul.f32 %v4888_v45, %v1553_v35  ;;  %v1910_v0 = vmul.f32 %v4890_v32, %v1553_v35  ;;  %2051 = vadd.xlane.f32.xlu2 %v2021_v29  ;;  %v2182_v36 = vmul.f32 %v5648_v55, %v1618_v50  ;;  %v2230_v17 = vmul.f32 %v5647_v10, %v1618_v50 }
 0x2b2   : > { %v1894_v32 = vadd.f32 %v1878_v18, %v1862_v60  ;;  %v1942_v45 = vsub.f32 %v1910_v0, %v1926_v63  ;;  %v2214_v20 = vadd.f32 %v2198_v38, %v2182_v36  ;;  %v2262_v33 = vsub.f32 %v2230_v17, %v2246_v41 }
 0x2b3   : > { %v2344_v15 = vpop.xlane.xlu1 %2343 }
 0x2b4   : > { %1958 = vst [vmem:[%s4924_s15 + $0xf0] sm:$0xff] %v1894_v32  ;;  %v1990_v28 = vmul.f32 %v1894_v32, %v1894_v32  ;;  %v2006_v21 = vmul.f32 %v1942_v45, %v1942_v45  ;;  %v2310_v56 = vmul.f32 %v2214_v20, %v2214_v20  ;;  %v2326_v19 = vmul.f32 %v2262_v33, %v2262_v33  ;;  %v2024_v48 = vpop.xlane.xlu0 %2023 }
 0x2b5   : > { %1974 = vst [vmem:[%s4931_s0 + $0xf0] sm:$0xff] %v1942_v45  ;;  %v2375_v47 = vadd.f32 %v2344_v15, %v2024_v48 }
 0x2b6   : > { %2278 = vst [vmem:[%s4924_s15 + $0xf8] sm:$0xff] %v2214_v20  ;;  %v2022_v5 = vadd.f32 %v2006_v21, %v1990_v28  ;;  %v2342_v61 = vadd.f32 %v2326_v19, %v2310_v56 }
 0x2b7   : > { %2294 = vst [vmem:[%s4931_s0 + $0xf8] sm:$0xff] %v2262_v33  ;;  %v2481_v49 = vpop.f32.mrf.mxu2  ;;  %v2566_v34 = vpop.f32.mrf.mxu3  ;;  %v2428_v24 = vadd.f32 %v2412_v62, %v2375_v47 }
 0x2b8   : > { %2529 = vst.msk [vmem:[%s5280_s1] sm:$0xff] %vm517_vm0, %v2481_v49  ;;  %2369 = vadd.xlane.f32.xlu2 %v5229_v52  ;;  %2053 = vadd.xlane.f32.xlu0 %v2022_v5 }
 0x2b9   : > { %2614 = vst.msk [vmem:[%s5288_s24] sm:$0xff] %vm517_vm0, %v2566_v34  ;;  %2373 = vadd.xlane.f32.xlu1 %v2342_v61 }
 0x2ba   : > { %2445 = vst.msk [vmem:[%s5150_s28] sm:$0xff] %vm2395_vm2, %v2428_v24 }
 0x2bb   : > { %v2346_v22 = vpop.xlane.xlu2 %2345 }
 0x2bc   : > { %3351 = shalt.err (!%p3348_p5)
}
 0x2bd   : > { %s3437_s13 = smov 256   ;;  %s3438_s26 = smov 16   ;;  %v2413_v11 = vld [vmem:[%s5150_s28 + $0x8] sm:$0xff]  ;;  %v2026_v30 = vpop.xlane.xlu0 %2025 }
 0x2be   : > { %3250 = dma.vmem_to_hbm [thread:$0]  (%p3539_p4), %s2667_s3, 4096, %s2669_s14, %s2631_s2, %s3437_s13, %s3437_s13, %s3438_s26   ;;  %v2376_v12 = vadd.f32 %v2346_v22, %v2026_v30 }
 0x2bf   : > { %s5649_s4 = sshll.u32 %s3426_s20, 8  ;;  %s2686_s23 = sshll.u32 %s4931_s0, 4  ;;  %v2484_v43 = vpop.f32.mrf.mxu2  ;;  %v2569_v37 = vpop.f32.mrf.mxu3  ;;  %s2687_s23 = int_to_ptr.vmem [resolvable:$true] %s2686_s23 }
 0x2c0   : > { %s2685_s9 = scalar_lea.hbm %s5475_s8, %s5649_s4  ;;  %2530 = vst.msk [vmem:[%s5280_s1 + $0x8] sm:$0xff] %vm517_vm0, %v2484_v43  ;;  %2371 = vadd.xlane.f32.xlu0 %v5259_v4  ;;  %v2429_v26 = vadd.f32 %v2413_v11, %v2376_v12  ;;  %s2636_s2 = scalar_lea.sflag [#allocation5], %s4901_s16 }
 0x2c1   : > { %s2688_s12 = sshll.u32 %s2685_s9, 4  ;;  %2615 = vst.msk [vmem:[%s5288_s24 + $0x8] sm:$0xff] %vm517_vm0, %v2569_v37  ;;  %s3372_s15 = scalar_lea.hbm %s5475_s8, 512  ;;  %s2689_s12 = int_to_ptr.hbm [resolvable:$true] %s2688_s12 }
 0x2c2   : > { %s3366_s20 = sshra.s32 %s2689_s12, 4  ;;  %s3367_s20 = int_to_ptr.hbm [resolvable:$true] %s3366_s20 }
 0x2c3   : > { %s3368_s3 = scalar_lea.hbm %s3367_s20, 256  ;;  %p3373_p10 = scmp.lt.s32.totalorder %s3367_s20, %s5475_s8 }
 0x2c4   : > { %p3369_p6 = scmp.ne.s32.totalorder %s3367_s20, %s3368_s3  ;;  %p3374_p11 = scmp.lt.s32.totalorder %s3372_s15, %s3368_s3 }
 0x2c6   : > { %p3370_p7 = pnand %p3369_p6, %p3539_p4  ;;  %p3375_p12 = por %p3374_p11, %p3373_p10 }
 0x2c8   : > { %p3371_p9 = pneg %p3370_p7 }
 0x2ca   : > { %p3376_p13 = pnand %p3375_p12, %p3371_p9 }
 0x2cc   : > { %3379 = shalt.err (!%p3376_p13)
}
 0x2cd   : > { %3251 = dma.vmem_to_hbm [thread:$0]  (%p3539_p4), %s2687_s23, 4096, %s2689_s12, %s2636_s2, %s3437_s13, %s3437_s13, %s3438_s26   ;;  %v2348_v8 = vpop.xlane.xlu0 %2347  ;;  %v2028_v3 = vpop.xlane.xlu1 %2027 }
 0x2ce   : > { %2446 = vst.msk [vmem:[%s5150_s28 + $0x8] sm:$0xff] %vm2395_vm2, %v2429_v26  ;;  %v2414_v54 = vld [vmem:[%s5150_s28 + $0x10] sm:$0xff]  ;;  %v2377_v52 = vadd.f32 %v2348_v8, %v2028_v3  ;;  %v2487_v57 = vpop.f32.mrf.mxu2  ;;  %v2572_v53 = vpop.f32.mrf.mxu3  ;;  %v2415_v59 = vld [vmem:[%s5150_s28 + $0x18] sm:$0xff]  ;;  %v2416_v31 = vld [vmem:[%s5150_s28 + $0x20] sm:$0xff] }
 0x2cf   : > { %2531 = vst.msk [vmem:[%s5280_s1 + $0x10] sm:$0xff] %vm517_vm0, %v2487_v57  ;;  %v2417_v13 = vld [vmem:[%s5150_s28 + $0x28] sm:$0xff]  ;;  %v2418_v18 = vld [vmem:[%s5150_s28 + $0x30] sm:$0xff]  ;;  %v2419_v41 = vld [vmem:[%s5150_s28 + $0x38] sm:$0xff] }
 0x2d0   : > { %v2430_v25 = vadd.f32 %v2414_v54, %v2377_v52  ;;  %2616 = vst.msk [vmem:[%s5288_s24 + $0x10] sm:$0xff] %vm517_vm0, %v2572_v53  ;;  %v2420_v33 = vld [vmem:[%s5150_s28 + $0x40] sm:$0xff]  ;;  %v2421_v48 = vld [vmem:[%s5150_s28 + $0x48] sm:$0xff]  ;;  %v2422_v22 = vld [vmem:[%s5150_s28 + $0x50] sm:$0xff] }
 0x2d1   : > { %v2423_v8 = vld [vmem:[%s5150_s28 + $0x58] sm:$0xff] }
 0x2d2   : > { %2447 = vst.msk [vmem:[%s5150_s28 + $0x10] sm:$0xff] %vm2395_vm2, %v2430_v25 }
 0x2d3   : > { %v2032_v58 = vpop.xlane.xlu2 %2031 }
 0x2d5   : > { %v2030_v16 = vpop.xlane.xlu1 %2029 }
 0x2d6   : > { %v2490_v39 = vpop.f32.mrf.mxu2  ;;  %v2575_v14 = vpop.f32.mrf.mxu3 }
 0x2d7   : > { %2532 = vst.msk [vmem:[%s5280_s1 + $0x18] sm:$0xff] %vm517_vm0, %v2490_v39 }
 0x2d8   : > { %2617 = vst.msk [vmem:[%s5288_s24 + $0x18] sm:$0xff] %vm517_vm0, %v2575_v14 }
 0x2db   : > { %v2354_v1 = vpop.xlane.xlu0 %2353 }
 0x2dc   : > { %v2352_v6 = vpop.xlane.xlu2 %2351 }
 0x2dd   : > { %v2350_v9 = vpop.xlane.xlu1 %2349  ;;  %v2379_v23 = vadd.f32 %v2352_v6, %v2032_v58  ;;  %v2425_v6 = vld [vmem:[%s5150_s28 + $0x68] sm:$0xff] }
 0x2de   : > { %v2378_v42 = vadd.f32 %v2350_v9, %v2030_v16  ;;  %v2493_v44 = vpop.f32.mrf.mxu2  ;;  %v2578_v40 = vpop.f32.mrf.mxu3  ;;  %v2424_v16 = vld [vmem:[%s5150_s28 + $0x60] sm:$0xff] }
 0x2df   : > { %2533 = vst.msk [vmem:[%s5280_s1 + $0x20] sm:$0xff] %vm517_vm0, %v2493_v44  ;;  %v2432_v27 = vadd.f32 %v2416_v31, %v2379_v23 }
 0x2e0   : > { %v2431_v2 = vadd.f32 %v2415_v59, %v2378_v42  ;;  %2618 = vst.msk [vmem:[%s5288_s24 + $0x20] sm:$0xff] %vm517_vm0, %v2578_v40 }
 0x2e1   : > { %2449 = vst.msk [vmem:[%s5150_s28 + $0x20] sm:$0xff] %vm2395_vm2, %v2432_v27 }
 0x2e2   : > { %2448 = vst.msk [vmem:[%s5150_s28 + $0x18] sm:$0xff] %vm2395_vm2, %v2431_v2 }
 0x2e4   : > { %v2034_v29 = vpop.xlane.xlu2 %2033  ;;  %v2036_v35 = vpop.xlane.xlu0 %2035 }
 0x2e5   : > { %v2356_v7 = vpop.xlane.xlu1 %2355  ;;  %v2380_v4 = vadd.f32 %v2354_v1, %v2034_v29 }
 0x2e6   : > { %v2496_v51 = vpop.f32.mrf.mxu2  ;;  %v2581_v46 = vpop.f32.mrf.mxu3  ;;  %v2381_v63 = vadd.f32 %v2356_v7, %v2036_v35  ;;  %v2427_v7 = vld [vmem:[%s5150_s28 + $0x78] sm:$0xff] }
 0x2e7   : > { %2534 = vst.msk [vmem:[%s5280_s1 + $0x28] sm:$0xff] %vm517_vm0, %v2496_v51  ;;  %v2433_v60 = vadd.f32 %v2417_v13, %v2380_v4 }
 0x2e8   : > { %2619 = vst.msk [vmem:[%s5288_s24 + $0x28] sm:$0xff] %vm517_vm0, %v2581_v46  ;;  %v2434_v0 = vadd.f32 %v2418_v18, %v2381_v63  ;;  %v2426_v63 = vld [vmem:[%s5150_s28 + $0x70] sm:$0xff] }
 0x2e9   : > { %2450 = vst.msk [vmem:[%s5150_s28 + $0x28] sm:$0xff] %vm2395_vm2, %v2433_v60 }
 0x2ea   : > { %2451 = vst.msk [vmem:[%s5150_s28 + $0x30] sm:$0xff] %vm2395_vm2, %v2434_v0 }
 0x2ec   : > { %v2358_v55 = vpop.xlane.xlu2 %2357 }
 0x2ed   : > { %v2038_v38 = vpop.xlane.xlu1 %2037 }
 0x2ee   : > { %v2499_v50 = vpop.f32.mrf.mxu2  ;;  %v2584_v10 = vpop.f32.mrf.mxu3  ;;  %v2382_v36 = vadd.f32 %v2358_v55, %v2038_v38 }
 0x2ef   : > { %2535 = vst.msk [vmem:[%s5280_s1 + $0x30] sm:$0xff] %vm517_vm0, %v2499_v50 }
 0x2f0   : > { %2620 = vst.msk [vmem:[%s5288_s24 + $0x30] sm:$0xff] %vm517_vm0, %v2584_v10  ;;  %v2435_v17 = vadd.f32 %v2419_v41, %v2382_v36 }
 0x2f2   : > { %2452 = vst.msk [vmem:[%s5150_s28 + $0x38] sm:$0xff] %vm2395_vm2, %v2435_v17 }
 0x2f4   : > { %v2360_v20 = vpop.xlane.xlu0 %2359  ;;  %v2040_v15 = vpop.xlane.xlu2 %2039 }
 0x2f5   : > { %v2383_v28 = vadd.f32 %v2360_v20, %v2040_v15 }
 0x2f6   : > { %v2502_v32 = vpop.f32.mrf.mxu2  ;;  %v2587_v45 = vpop.f32.mrf.mxu3 }
 0x2f7   : > { %2536 = vst.msk [vmem:[%s5280_s1 + $0x38] sm:$0xff] %vm517_vm0, %v2502_v32  ;;  %v2436_v21 = vadd.f32 %v2420_v33, %v2383_v28 }
 0x2f8   : > { %2621 = vst.msk [vmem:[%s5288_s24 + $0x38] sm:$0xff] %vm517_vm0, %v2587_v45 }
 0x2f9   : > { %2453 = vst.msk [vmem:[%s5150_s28 + $0x40] sm:$0xff] %vm2395_vm2, %v2436_v21 }
 0x2fc   : > { %v2362_v62 = vpop.xlane.xlu1 %2361  ;;  %v2042_v5 = vpop.xlane.xlu0 %2041 }
 0x2fd   : > { %v2384_v47 = vadd.f32 %v2362_v62, %v2042_v5 }
 0x2fe   : > { %v2505_v56 = vpop.f32.mrf.mxu2  ;;  %v2590_v19 = vpop.f32.mrf.mxu3 }
 0x2ff   : > { %2537 = vst.msk [vmem:[%s5280_s1 + $0x40] sm:$0xff] %vm517_vm0, %v2505_v56  ;;  %v2437_v49 = vadd.f32 %v2421_v48, %v2384_v47 }
 0x300   : > { %2622 = vst.msk [vmem:[%s5288_s24 + $0x40] sm:$0xff] %vm517_vm0, %v2590_v19 }
 0x301   : > { %2454 = vst.msk [vmem:[%s5150_s28 + $0x48] sm:$0xff] %vm2395_vm2, %v2437_v49 }
 0x304   : > { %v2364_v24 = vpop.xlane.xlu2 %2363  ;;  %v2044_v11 = vpop.xlane.xlu1 %2043 }
 0x305   : > { %v2385_v30 = vadd.f32 %v2364_v24, %v2044_v11 }
 0x306   : > { %v2508_v61 = vpop.f32.mrf.mxu2  ;;  %v2593_v34 = vpop.f32.mrf.mxu3 }
 0x307   : > { %2538 = vst.msk [vmem:[%s5280_s1 + $0x48] sm:$0xff] %vm517_vm0, %v2508_v61  ;;  %v2438_v12 = vadd.f32 %v2422_v22, %v2385_v30 }
 0x308   : > { %2623 = vst.msk [vmem:[%s5288_s24 + $0x48] sm:$0xff] %vm517_vm0, %v2593_v34 }
 0x309   : > { %2455 = vst.msk [vmem:[%s5150_s28 + $0x50] sm:$0xff] %vm2395_vm2, %v2438_v12 }
 0x30c   : > { %v2366_v26 = vpop.xlane.xlu0 %2365  ;;  %v2046_v54 = vpop.xlane.xlu2 %2045 }
 0x30d   : > { %v2386_v3 = vadd.f32 %v2366_v26, %v2046_v54 }
 0x30e   : > { %v2511_v43 = vpop.f32.mrf.mxu2  ;;  %v2596_v37 = vpop.f32.mrf.mxu3 }
 0x30f   : > { %2539 = vst.msk [vmem:[%s5280_s1 + $0x50] sm:$0xff] %vm517_vm0, %v2511_v43  ;;  %v2439_v52 = vadd.f32 %v2423_v8, %v2386_v3 }
 0x310   : > { %2624 = vst.msk [vmem:[%s5288_s24 + $0x50] sm:$0xff] %vm517_vm0, %v2596_v37 }
 0x311   : > { %2456 = vst.msk [vmem:[%s5150_s28 + $0x58] sm:$0xff] %vm2395_vm2, %v2439_v52 }
 0x314   : > { %v2368_v25 = vpop.xlane.xlu1 %2367  ;;  %v2048_v39 = vpop.xlane.xlu0 %2047 }
 0x315   : > { %v2387_v14 = vadd.f32 %v2368_v25, %v2048_v39 }
 0x316   : > { %v2514_v57 = vpop.f32.mrf.mxu2  ;;  %v2599_v53 = vpop.f32.mrf.mxu3 }
 0x317   : > { %2540 = vst.msk [vmem:[%s5280_s1 + $0x58] sm:$0xff] %vm517_vm0, %v2514_v57  ;;  %v2440_v58 = vadd.f32 %v2424_v16, %v2387_v14 }
 0x318   : > { %2625 = vst.msk [vmem:[%s5288_s24 + $0x58] sm:$0xff] %vm517_vm0, %v2599_v53 }
 0x319   : > { %2457 = vst.msk [vmem:[%s5150_s28 + $0x60] sm:$0xff] %vm2395_vm2, %v2440_v58 }
 0x31c   : > { %v2050_v2 = vpop.xlane.xlu1 %2049 }
 0x31e   : > { %v2517_v59 = vpop.f32.mrf.mxu2  ;;  %v2602_v9 = vpop.f32.mrf.mxu3 }
 0x31f   : > { %2541 = vst.msk [vmem:[%s5280_s1 + $0x60] sm:$0xff] %vm517_vm0, %v2517_v59 }
 0x320   : > { %2626 = vst.msk [vmem:[%s5288_s24 + $0x60] sm:$0xff] %vm517_vm0, %v2602_v9 }
 0x323   : > { %v2052_v40 = vpop.xlane.xlu2 %2051 }
 0x326   : > { %v2520_v42 = vpop.f32.mrf.mxu2  ;;  %v2605_v44 = vpop.f32.mrf.mxu3 }
 0x327   : > { %2542 = vst.msk [vmem:[%s5280_s1 + $0x68] sm:$0xff] %vm517_vm0, %v2520_v42 }
 0x328   : > { %2627 = vst.msk [vmem:[%s5288_s24 + $0x68] sm:$0xff] %vm517_vm0, %v2605_v44 }
 0x32b   : > { %v2370_v23 = vpop.xlane.xlu2 %2369  ;;  %v2054_v27 = vpop.xlane.xlu0 %2053 }
 0x32c   : > { %v2374_v51 = vpop.xlane.xlu1 %2373  ;;  %v2388_v46 = vadd.f32 %v2370_v23, %v2050_v2 }
 0x32d   : > { %v2390_v13 = vadd.f32 %v2374_v51, %v2054_v27 }
 0x32e   : > { %v2523_v1 = vpop.f32.mrf.mxu2  ;;  %v2608_v31 = vpop.f32.mrf.mxu3  ;;  %v2441_v29 = vadd.f32 %v2425_v6, %v2388_v46 }
 0x32f   : > { %2543 = vst.msk [vmem:[%s5280_s1 + $0x70] sm:$0xff] %vm517_vm0, %v2523_v1  ;;  %v2443_v18 = vadd.f32 %v2427_v7, %v2390_v13 }
 0x330   : > { %2628 = vst.msk [vmem:[%s5288_s24 + $0x70] sm:$0xff] %vm517_vm0, %v2608_v31 }
 0x331   : > { %2458 = vst.msk [vmem:[%s5150_s28 + $0x68] sm:$0xff] %vm2395_vm2, %v2441_v29 }
 0x332   : > { %2460 = vst.msk [vmem:[%s5150_s28 + $0x78] sm:$0xff] %vm2395_vm2, %v2443_v18 }
 0x333   : > { %v2372_v60 = vpop.xlane.xlu0 %2371 }
 0x334   : > { %v2389_v0 = vadd.f32 %v2372_v60, %v2052_v40 }
 0x336   : > { %v2526_v35 = vpop.f32.mrf.mxu2  ;;  %v2611_v4 = vpop.f32.mrf.mxu3  ;;  %v2442_v50 = vadd.f32 %v2426_v63, %v2389_v0 }
 0x337   : > { %2544 = vst.msk [vmem:[%s5280_s1 + $0x78] sm:$0xff] %vm517_vm0, %v2526_v35 }
 0x338   : > { %2629 = vst.msk [vmem:[%s5288_s24 + $0x78] sm:$0xff] %vm517_vm0, %v2611_v4 }
 0x339   : > { %2459 = vst.msk [vmem:[%s5150_s28 + $0x70] sm:$0xff] %vm2395_vm2, %v2442_v50 }
 0x33a PF: > { %p3261_p4 = scmp.ge.s32.totalorder %s3434_s22, 2  ;;  %s2715_s27 = sand.u32 1, %s3414_s17  }
 0x33b   : > { %s2716_s16 = scalar_lea.sflag [#allocation3], %s2715_s27 }
 0x33c   : > { %p3255_p0 = pnand %p3261_p4, %p3546_p8 }
 0x33e   : > { %p3256_p1 = pneg %p3255_p0 }
 0x340   : > { %3405 = dma.done.wait (%p3256_p1), %s2716_s16, 4096  }
 0x341   : > { %3407 = vsyncadd (%p3256_p1), %s2716_s16, 4294963200  ;;  %s2726_s1 = scalar_lea.sflag [#allocation5], %s2715_s27 }
 0x342   : > { %3409 = dma.done.wait (%p3256_p1), %s2726_s1, 4096  }
 0x343   : > { %3411 = vsyncadd (%p3256_p1), %s2726_s1, 4294963200  ;;  %s28_s22 = sadd.s32 1, %s3434_s22   ;;  %s5650_s17 = smov %s3418_s18 }
 0x344   : > { %p25_p2 = scmp.ge.s32.totalorder %s28_s22, 4   ;;  %s5651_s18 = smov %s3422_s19 }
 0x345   : > { %s5652_s19 = smov %s3552_s30  ;;  %s5653_s20 = smov %s3430_s21 }
 0x346   : > { %s5654_s21 = smov %s5656_s25  ;;  %27 = sbr.rel (!%p25_p2) target bundleno = 15 (0xf), region = 150 }
 0x34b   :  { %2756 = vsyncpa [#allocation3], 1 }
 0x34c   :  { %2758 = vsyncpa [#allocation3 + $0x1], 1 }
 0x34d   :  { %2759 = vsyncpa [#allocation5], 1 }
 0x34e   :  { %2761 = vsyncpa [#allocation5 + $0x1], 1 }

// kernel: tpu_custom_call.1
= control target key start
LH: loop header
LB: loop body
LE: loop exit
PB: predicated region body
PF: predicated region fallthrough
CT: control target
= control target key end

     0   :  { %s5467_s0 = inlined_call_operand.vmem [shape: f32[256,16], index: 0, kind: input, shape index: {}]   ;;  %s5468_s1 = inlined_call_operand.vmem [shape: f32[1,32,16], index: 1, kind: input, shape index: {}]   ;;  %s5469_s2 = inlined_call_operand.vmem [shape: f32[1,512,16], index: 2, kind: input, shape index: {}]   ;;  %s5470_s3 = inlined_call_operand.vmem [shape: f32[32,16], index: 3, kind: input, shape index: {}]   ;;  %s5471_s4 = inlined_call_operand.vmem [shape: f32[32,16], index: 4, kind: input, shape index: {}]   ;;  %s5472_s5 = inlined_call_operand.vmem [shape: f32[32,512], index: 5, kind: input, shape index: {}]   ;;  %s5473_s6 = inlined_call_operand.vmem [shape: f32[32,256], index: 6, kind: input, shape index: {}]   ;;  %s5474_s7 = inlined_call_operand.hbm [shape: f32[256,256], index: 7, kind: output, shape index: {0}]   ;;  %s5475_s8 = inlined_call_operand.hbm [shape: f32[256,256], index: 8, kind: output, shape index: {1}]   ;;  %s5476_s9 = inlined_call_operand.vmem [shape: f32[256,1], index: 9, kind: output, shape index: {2}]   ;;  %s5477_s10 = inlined_call_operand.vmem [shape: f32[256,16], index: 10, kind: output, shape index: {3}]   ;;  %s5478_s11 = inlined_call_operand.vmem [shape: f32[256,16], index: 11, kind: output, shape index: {4}]  }
   0x1   :  { %5541 = sst [smem:[#allocation47_spill]] %s5467_s0 }
   0x2   :  { %5542 = sst [smem:[#allocation48_spill]] %s5468_s1 }
   0x3   :  { %5543 = sst [smem:[#allocation49_spill]] %s5469_s2 }
   0x4   :  { %5544 = sst [smem:[#allocation50_spill]] %s5470_s3 }
   0x5   :  { %5545 = sst [smem:[#allocation51_spill]] %s5471_s4 }
   0x6   :  { %5546 = sst [smem:[#allocation52_spill]] %s5472_s5 }
   0x7   :  { %5547 = sst [smem:[#allocation53_spill]] %s5473_s6 }
   0x8   :  { %5548 = sst [smem:[#allocation54_spill]] %s5476_s9 }
   0x9   :  { %17 = vsyncpa [#allocation3], 0 }
   0xa   :  { %19 = vsyncpa [#allocation3 + $0x1], 0 }
   0xb   :  { %20 = vsyncpa [#allocation5], 0 }
   0xc   :  { %22 = vsyncpa [#allocation5 + $0x1], 0  ;;  %s3499_s17 = smov 0   ;;  %s3501_s18 = smov 0  }
   0xd   :  { %s3503_s19 = smov 0   ;;  %s3505_s20 = smov 0  }
   0xe   :  { %s3507_s21 = smov 0   ;;  %s3509_s22 = smov 0  }
   0xf LB: > { %s2915_s23 = sadd.s32 4294967295, %s3434_s22   ;;  %s2916_s24 = sadd.s32 4294967294, %s3434_s22   ;;  %s3434_s22 = sphi %s3509_s22, %s28_s22   ;;  %s3430_s21 = sphi %s3507_s21, %s5654_s21   ;;  %s3426_s20 = sphi %s3505_s20, %s5653_s20   ;;  %s3422_s19 = sphi %s3503_s19, %s5652_s19   ;;  %s3418_s18 = sphi %s3501_s18, %s5651_s18   ;;  %s3414_s17 = sphi %s3499_s17, %s5650_s17  }
  0x10   : > { %s40_s25 = sadd.s32 1, %s3430_s21  ;;  %s211_s26 = sadd.s32 1, %s3422_s19 }
  0x11   : > { %p42_p0 = scmp.ge.s32.totalorder %s40_s25, 2  ;;  %p221_p1 = scmp.ne.s32.totalorder %s3422_s19, %s3418_s18 }
  0x12   : > { %p222_p2 = scmp.eq.s32.totalorder %s2915_s23, 1  ;;  %p227_p3 = scmp.ne.s32.totalorder %s3418_s18, %s3414_s17 }
  0x13   : > { %s5656_s25 = smov (%p42_p0, %s40_s25), 0  ;;  %p228_p5 = scmp.eq.s32.totalorder %s2916_s24, 1 }
  0x14   : > { %p3539_p4 = por %p222_p2, %p221_p1  ;;  %s206_s28 = ssub.s32 %s3430_s21, %s5656_s25 }
  0x15   : > { %p2921_p6 = scmp.ge.s32.totalorder %s3434_s22, 1  ;;  %p209_p7 = scmp.eq.s32.totalorder %s206_s28, 0 }
  0x16   : > { %p3546_p8 = por %p228_p5, %p227_p3  ;;  %p389_p9 = scmp.lt.s32.totalorder %s3434_s22, 3 }
  0x17   : > { %s3552_s30 = scalar_select %p209_p7, %s3422_s19, %s211_s26  }
  0x18   : > { %p390_p10 = pnand %p2921_p6, %p389_p9 }
  0x1a   : > { %393 = sbr.rel (%p390_p10) target bundleno = 826 (0x33a), region = 48 }
  0x1f   : > { %s5551_s3 = sld [smem:[#allocation50_spill]]  ;;  %vm517_vm0 = vcmask 130048   ;;  %s2924_s16 = sshll.u32 %s3426_s20, 4  ;;  %vm740_vm1 = vcmask 261120   ;;  %vm2395_vm2 = vcmask 7168  }
  0x20   : > { %s5552_s1 = sld [smem:[#allocation48_spill]]  ;;  %p460_p11 = scmp.lt.s32.totalorder %s2924_s16, 31 }
  0x21   : > { %s5553_s0 = sld [smem:[#allocation47_spill]]  ;;  %s5540_s26 = sshll.u32 %s3426_s20, 8 }
  0x22   : > { %s5658_s16 = smov (!%p460_p11, %s2924_s16), 31  ;;  %s5554_s5 = sld [smem:[#allocation52_spill]] }
  0x23   : > { %s3585_s23 = sshll.u32 %s5658_s16, 3  ;;  %s5558_s6 = sld [smem:[#allocation53_spill]] }
  0x24   : > { %s5568_s2 = sld [smem:[#allocation49_spill]]  ;;  %s5288_s24 = scalar_lea.vmem %s5478_s11, %s3585_s23 }
  0x25   : > { %v3557_v0 = vld [vmem:[%s5551_s3 + $0x18] sm:$0xff]  ;;  %v3569_v2 = vld [vmem:[%s5551_s3 + $0x10] sm:$0xff]  ;;  %v3580_v4 = vld [vmem:[%s5551_s3 + $0x8] sm:$0xff]  ;;  %s5573_s4 = sld [smem:[#allocation51_spill]]  ;;  %s2665_s13 = scalar_lea.hbm %s5474_s7, %s5540_s26 }
  0x26   : > { %v646_v1 = vld [vmem:[%s5552_s1 + $0x18] sm:$0xff]  ;;  %2932 = vmatpush.xpose.msk.msra.mxu0 %vm517_vm0, %v3557_v0  ;;  %v645_v3 = vld [vmem:[%s5552_s1 + $0x10] sm:$0xff]  ;;  %v644_v5 = vld [vmem:[%s5552_s1 + $0x8] sm:$0xff]  ;;  %s5630_s9 = sld [smem:[#allocation54_spill]] }
  0x27   : > { %2952 = vmatpush.xpose.msk.msra.mxu1 %vm517_vm0, %v646_v1  ;;  %v3593_v6 = vld [vmem:[%s5551_s3] sm:$0xff]  ;;  %s3602_s16 = scalar_lea.vmem %s5553_s0, %s3585_s23 }
  0x28   : > { %v643_v7 = vld [vmem:[%s5552_s1] sm:$0xff]  ;;  %v3615_v9 = vld [vmem:[%s3602_s16 + $0x8] sm:$0xff]  ;;  %v3622_v10 = vld [vmem:[%s3602_s16 + $0x10] sm:$0xff]  ;;  %s5280_s1 = scalar_lea.vmem %s5477_s10, %s3585_s23 }
  0x29   : > { %v3608_v8 = vld [vmem:[%s3602_s16] sm:$0xff]  ;;  %v3629_v11 = vld [vmem:[%s3602_s16 + $0x18] sm:$0xff]  ;;  %v3643_v13 = vld [vmem:[%s3602_s16 + $0x28] sm:$0xff] }
  0x2a   : > { %2933 = vmatpush.xpose.msk.msra.mxu0 %vm517_vm0, %v3569_v2  ;;  %v3636_v12 = vld [vmem:[%s3602_s16 + $0x20] sm:$0xff]  ;;  %v3653_v15 = vld [vmem:[%s3602_s16 + $0x30] sm:$0xff]  ;;  %v737_v16 = vld [vmem:[%s5554_s5 + $0x68] sm:$0xff] }
  0x2b   : > { %2953 = vmatpush.xpose.msk.msra.mxu1 %vm517_vm0, %v645_v3  ;;  %v736_v14 = vld [vmem:[%s5554_s5 + $0x60] sm:$0xff]  ;;  %3246 = vmatpush.msra.mxu3 %v737_v16  ;;  %v3663_v17 = vld [vmem:[%s3602_s16 + $0x38] sm:$0xff]  ;;  %v3677_v19 = vld [vmem:[%s3602_s16 + $0x48] sm:$0xff] }
  0x2c   : > { %3242 = vmatpush.msra.mxu2 %v736_v14  ;;  %v3670_v18 = vld [vmem:[%s3602_s16 + $0x40] sm:$0xff]  ;;  %v3687_v21 = vld [vmem:[%s3602_s16 + $0x50] sm:$0xff]  ;;  %v733_v22 = vld [vmem:[%s5554_s5 + $0x48] sm:$0xff]  ;;  %s5150_s28 = scalar_lea.vmem %s5630_s9, %s3585_s23  ;;  %s3344_s23 = scalar_lea.hbm %s5474_s7, 512 }
  0x2d   : > { %v732_v20 = vld [vmem:[%s5554_s5 + $0x40] sm:$0xff]  ;;  %3247 = vmatpush.msra.mxu3 %v733_v22  ;;  %v3697_v23 = vld [vmem:[%s3602_s16 + $0x58] sm:$0xff]  ;;  %v729_v25 = vld [vmem:[%s5554_s5 + $0x28] sm:$0xff] }
  0x2e   : > { %2934 = vmatpush.xpose.msk.msra.mxu0 %vm517_vm0, %v3580_v4  ;;  %3243 = vmatpush.msra.mxu2 %v732_v20  ;;  %v728_v24 = vld [vmem:[%s5554_s5 + $0x20] sm:$0xff]  ;;  %v725_v28 = vld [vmem:[%s5554_s5 + $0x8] sm:$0xff]  ;;  %v3730_v30 = vld [vmem:[%s3602_s16 + $0x70] sm:$0xff] }
  0x2f   : > { %2954 = vmatpush.xpose.msk.msra.mxu1 %vm517_vm0, %v644_v5  ;;  %v3710_v26 = vld [vmem:[%s3602_s16 + $0x60] sm:$0xff]  ;;  %3248 = vmatpush.msra.mxu3 %v729_v25  ;;  %v3723_v29 = vld [vmem:[%s3602_s16 + $0x68] sm:$0xff]  ;;  %v3737_v31 = vld [vmem:[%s3602_s16 + $0x78] sm:$0xff] }
  0x30   : > { %v724_v27 = vld [vmem:[%s5554_s5] sm:$0xff]  ;;  %3244 = vmatpush.msra.mxu2 %v728_v24  ;;  %v1055_v38 = vld [vmem:[%s5558_s6 + $0x30] sm:$0xff]  ;;  %v1056_v39 = vld [vmem:[%s5558_s6 + $0x38] sm:$0xff] }
  0x31   : > { %3249 = vmatpush.msra.mxu3 %v725_v28  ;;  %v1053_v40 = vld [vmem:[%s5558_s6 + $0x20] sm:$0xff]  ;;  %v1054_v41 = vld [vmem:[%s5558_s6 + $0x28] sm:$0xff]  ;;  %v1051_v42 = vld [vmem:[%s5558_s6 + $0x10] sm:$0xff] }
  0x32   : > { %2935 = vmatpush.xpose.msk.msra.mxu0 %vm517_vm0, %v3593_v6  ;;  %3245 = vmatpush.msra.mxu2 %v724_v27  ;;  %v1052_v43 = vld [vmem:[%s5558_s6 + $0x18] sm:$0xff]  ;;  %v738_v46 = vld [vmem:[%s5554_s5 + $0x70] sm:$0xff]  ;;  %v1049_v47 = vld [vmem:[%s5558_s6] sm:$0xff] }
  0x33   : > { %2955 = vmatpush.xpose.msk.msra.mxu1 %vm517_vm0, %v643_v7  ;;  %v1050_v48 = vld [vmem:[%s5558_s6 + $0x8] sm:$0xff]  ;;  %v739_v51 = vld [vmem:[%s5554_s5 + $0x78] sm:$0xff]  ;;  %v734_v54 = vld [vmem:[%s5554_s5 + $0x50] sm:$0xff] }
  0x34   : > { %931 = vmatpush.msrb.mxu2 %v738_v46  ;;  %996 = vmatpush.msrb.mxu3 %v739_v51  ;;  %v735_v57 = vld [vmem:[%s5554_s5 + $0x58] sm:$0xff]  ;;  %v730_v60 = vld [vmem:[%s5554_s5 + $0x30] sm:$0xff]  ;;  %v1295_v46 = vld [vmem:[%s5568_s2 + $0x1e0] sm:$0xff] }
  0x35   : > { %2936 = vmatmul.msk.f32.vlgmr.msra.gmra.mxu0 %vm517_vm0, %v3608_v8  ;;  %v731_v63 = vld [vmem:[%s5554_s5 + $0x38] sm:$0xff]  ;;  %v726_v5 = vld [vmem:[%s5554_s5 + $0x10] sm:$0xff] }
  0x36   : > { %2956 = vmatmul.msk.f32.vlgmr.msra.gmra.mxu1 %vm517_vm0, %v3608_v8  ;;  %801 = vmatpush.msrb.mxu0 %v736_v14  ;;  %v1249_v51 = vld [vmem:[%s5568_s2 + $0x70] sm:$0xff] }
  0x37   : > { %866 = vmatpush.msrb.mxu1 %v737_v16  ;;  %932 = vmatpush.msrb.mxu2 %v734_v54  ;;  %v727_v16 = vld [vmem:[%s5554_s5 + $0x18] sm:$0xff] }
  0x38   : > { %802 = vmatpush.msrb.mxu0 %v732_v20  ;;  %997 = vmatpush.msrb.mxu3 %v735_v57  ;;  %v1266_v54 = vld [vmem:[%s5568_s2 + $0xf8] sm:$0xff] }
  0x39   : > { %867 = vmatpush.msrb.mxu1 %v733_v22  ;;  %933 = vmatpush.msrb.mxu2 %v730_v60  ;;  %v1278_v57 = vld [vmem:[%s5568_s2 + $0x158] sm:$0xff] }
  0x3a   : > { %803 = vmatpush.msrb.mxu0 %v728_v24  ;;  %998 = vmatpush.msrb.mxu3 %v731_v63  ;;  %v1282_v24 = vld [vmem:[%s5568_s2 + $0x178] sm:$0xff]  ;;  %v1277_v63 = vld [vmem:[%s5568_s2 + $0x150] sm:$0xff] }
  0x3b   : > { %868 = vmatpush.msrb.mxu1 %v729_v25  ;;  %934 = vmatpush.msrb.mxu2 %v726_v5  ;;  %v1298_v25 = vld [vmem:[%s5568_s2 + $0x1f8] sm:$0xff]  ;;  %v1293_v5 = vld [vmem:[%s5568_s2 + $0x1d0] sm:$0xff] }
  0x3c   : > { %804 = vmatpush.msrb.mxu0 %v724_v27  ;;  %999 = vmatpush.msrb.mxu3 %v727_v16  ;;  %v1281_v27 = vld [vmem:[%s5568_s2 + $0x170] sm:$0xff]  ;;  %v1294_v60 = vld [vmem:[%s5568_s2 + $0x1d8] sm:$0xff] }
  0x3d   : > { %2937 = vmatmul.msk.f32.gmra.mxu0 %vm517_vm0, %v3615_v9  ;;  %869 = vmatpush.msrb.mxu1 %v725_v28  ;;  %v1297_v28 = vld [vmem:[%s5568_s2 + $0x1f0] sm:$0xff] }
  0x3e   : > { %2957 = vmatmul.msk.f32.gmra.mxu1 %vm517_vm0, %v3615_v9  ;;  %1117 = vmatpush.msra.mxu0 %v1055_v38 }
  0x3f   : > { %1182 = vmatpush.msra.mxu1 %v1056_v39 }
  0x40   : > { %1118 = vmatpush.msra.mxu0 %v1053_v40  ;;  %v1250_v40 = vld [vmem:[%s5568_s2 + $0x78] sm:$0xff] }
  0x41   : > { %1183 = vmatpush.msra.mxu1 %v1054_v41  ;;  %v1280_v41 = vld [vmem:[%s5568_s2 + $0x168] sm:$0xff] }
  0x42   : > { %1119 = vmatpush.msra.mxu0 %v1051_v42  ;;  %v1296_v42 = vld [vmem:[%s5568_s2 + $0x1e8] sm:$0xff] }
  0x43   : > { %1184 = vmatpush.msra.mxu1 %v1052_v43  ;;  %v1279_v43 = vld [vmem:[%s5568_s2 + $0x160] sm:$0xff] }
  0x44   : > { %1120 = vmatpush.msra.mxu0 %v1049_v47 }
  0x45   : > { %2938 = vmatmul.msk.f32.gmra.mxu0 %vm517_vm0, %v3622_v10  ;;  %1185 = vmatpush.msra.mxu1 %v1050_v48 }
  0x46   : > { %2958 = vmatmul.msk.f32.gmra.mxu1 %vm517_vm0, %v3622_v10 }
  0x4d   : > { %2939 = vmatmul.msk.f32.gmra.mxu0 %vm517_vm0, %v3629_v11 }
  0x4e   : > { %2959 = vmatmul.msk.f32.gmra.mxu1 %vm517_vm0, %v3629_v11 }
  0x55   : > { %2940 = vmatmul.msk.f32.gmra.mxu0 %vm517_vm0, %v3636_v12 }
  0x56   : > { %2960 = vmatmul.msk.f32.gmra.mxu1 %vm517_vm0, %v3636_v12 }
  0x5d   : > { %2941 = vmatmul.msk.f32.gmra.mxu0 %vm517_vm0, %v3643_v13 }
  0x5e   : > { %2961 = vmatmul.msk.f32.gmra.mxu1 %vm517_vm0, %v3643_v13 }
  0x65   : > { %2942 = vmatmul.msk.f32.gmra.mxu0 %vm517_vm0, %v3653_v15 }
  0x66   : > { %2962 = vmatmul.msk.f32.gmra.mxu1 %vm517_vm0, %v3653_v15 }
  0x6d   : > { %2943 = vmatmul.msk.f32.gmra.mxu0 %vm517_vm0, %v3663_v17 }
  0x6e   : > { %2963 = vmatmul.msk.f32.gmra.mxu1 %vm517_vm0, %v3663_v17 }
  0x75   : > { %2944 = vmatmul.msk.f32.gmra.mxu0 %vm517_vm0, %v3670_v18 }
  0x76   : > { %2964 = vmatmul.msk.f32.gmra.mxu1 %vm517_vm0, %v3670_v18 }
  0x7d   : > { %2945 = vmatmul.msk.f32.gmra.mxu0 %vm517_vm0, %v3677_v19 }
  0x7e   : > { %2965 = vmatmul.msk.f32.gmra.mxu1 %vm517_vm0, %v3677_v19 }
  0x85   : > { %2946 = vmatmul.msk.f32.gmra.mxu0 %vm517_vm0, %v3687_v21 }
  0x86   : > { %2966 = vmatmul.msk.f32.gmra.mxu1 %vm517_vm0, %v3687_v21 }
  0x8d   : > { %2947 = vmatmul.msk.f32.gmra.mxu0 %vm517_vm0, %v3697_v23 }
  0x8e   : > { %2967 = vmatmul.msk.f32.gmra.mxu1 %vm517_vm0, %v3697_v23 }
  0x95   : > { %2948 = vmatmul.msk.f32.gmra.mxu0 %vm517_vm0, %v3710_v26 }
  0x96   : > { %2968 = vmatmul.msk.f32.gmra.mxu1 %vm517_vm0, %v3710_v26 }
  0x9d   : > { %2949 = vmatmul.msk.f32.gmra.mxu0 %vm517_vm0, %v3723_v29 }
  0x9e   : > { %2969 = vmatmul.msk.f32.gmra.mxu1 %vm517_vm0, %v3723_v29 }
  0xa5   : > { %2950 = vmatmul.msk.f32.gmra.mxu0 %vm517_vm0, %v3730_v30 }
  0xa6   : > { %2970 = vmatmul.msk.f32.gmra.mxu1 %vm517_vm0, %v3730_v30 }
  0xad   : > { %2951 = vmatmul.msk.f32.gmra.mxu0 %vm517_vm0, %v3737_v31 }
  0xae   : > { %2971 = vmatmul.msk.f32.gmra.mxu1 %vm517_vm0, %v3737_v31 }
  0xb2   : > { %v3743_v32 = vpop.f32.mrf.mxu0 }
  0xb3   : > { %5555 = vst [vmem:[#allocation8_spill] sm:$0xff] %v3743_v32  ;;  %v3745_v33 = vpop.f32.mrf.mxu1 }
  0xb5   : > { %2972 = vmatmul.msk.f32.vlgmr.msrb.gmra.mxu0 %vm740_vm1, %v3745_v33 }
  0xb6   : > { %2988 = vmatmul.msk.f32.vlgmr.msrb.gmra.mxu1 %vm740_vm1, %v3745_v33  ;;  %3132 = vmatpush.xpose.msk.msrb.mxu0 %vm517_vm0, %v1282_v24 }
  0xb7   : > { %3164 = vmatpush.xpose.msk.msrb.mxu1 %vm517_vm0, %v1298_v25  ;;  %v1248_v25 = vld [vmem:[%s5568_s2 + $0x68] sm:$0xff] }
  0xba   : > { %v3751_v34 = vpop.f32.mrf.mxu0  ;;  %3133 = vmatpush.xpose.msk.msrb.mxu0 %vm517_vm0, %v1281_v27  ;;  %v1265_v27 = vld [vmem:[%s5568_s2 + $0xf0] sm:$0xff] }
  0xbb   : > { %5556 = vst [vmem:[#allocation9_spill] sm:$0xff] %v3751_v34  ;;  %v3753_v35 = vpop.f32.mrf.mxu1  ;;  %3165 = vmatpush.xpose.msk.msrb.mxu1 %vm517_vm0, %v1297_v28  ;;  %v1276_v28 = vld [vmem:[%s5568_s2 + $0x148] sm:$0xff] }
  0xbd   : > { %2973 = vmatmul.msk.f32.gmra.mxu0 %vm740_vm1, %v3753_v35 }
  0xbe   : > { %2989 = vmatmul.msk.f32.gmra.mxu1 %vm740_vm1, %v3753_v35  ;;  %3134 = vmatpush.xpose.msk.msrb.mxu0 %vm517_vm0, %v1280_v41  ;;  %v1275_v41 = vld [vmem:[%s5568_s2 + $0x140] sm:$0xff] }
  0xbf   : > { %3166 = vmatpush.xpose.msk.msrb.mxu1 %vm517_vm0, %v1296_v42  ;;  %v1291_v42 = vld [vmem:[%s5568_s2 + $0x1c0] sm:$0xff] }
  0xc2   : > { %v3759_v36 = vpop.f32.mrf.mxu0  ;;  %3135 = vmatpush.xpose.msk.msrb.mxu0 %vm517_vm0, %v1279_v43 }
  0xc3   : > { %5557 = vst [vmem:[#allocation10_spill] sm:$0xff] %v3759_v36  ;;  %v3761_v37 = vpop.f32.mrf.mxu1  ;;  %3167 = vmatpush.xpose.msk.msrb.mxu1 %vm517_vm0, %v1295_v46 }
  0xc5   : > { %2974 = vmatmul.msk.f32.gmra.mxu0 %vm740_vm1, %v3761_v37 }
  0xc6   : > { %2990 = vmatmul.msk.f32.gmra.mxu1 %vm740_vm1, %v3761_v37  ;;  %3136 = vmatpush.xpose.msk.msrb.mxu0 %vm517_vm0, %v1278_v57  ;;  %v1274_v57 = vld [vmem:[%s5568_s2 + $0x138] sm:$0xff] }
  0xc7   : > { %3168 = vmatpush.xpose.msk.msrb.mxu1 %vm517_vm0, %v1294_v60  ;;  %v1290_v60 = vld [vmem:[%s5568_s2 + $0x1b8] sm:$0xff] }
  0xca   : > { %v3785_v44 = vpop.f32.mrf.mxu0  ;;  %3137 = vmatpush.xpose.msk.msrb.mxu0 %vm517_vm0, %v1277_v63  ;;  %v1273_v63 = vld [vmem:[%s5568_s2 + $0x130] sm:$0xff] }
  0xcb   : > { %5559 = vst [vmem:[#allocation11_spill] sm:$0xff] %v3785_v44  ;;  %v3787_v45 = vpop.f32.mrf.mxu1  ;;  %3169 = vmatpush.xpose.msk.msrb.mxu1 %vm517_vm0, %v1293_v5  ;;  %v1289_v5 = vld [vmem:[%s5568_s2 + $0x1b0] sm:$0xff] }
  0xcd   : > { %2975 = vmatmul.msk.f32.gmra.mxu0 %vm740_vm1, %v3787_v45 }
  0xce   : > { %2991 = vmatmul.msk.f32.gmra.mxu1 %vm740_vm1, %v3787_v45  ;;  %3138 = vmatpush.xpose.msk.msrb.mxu0 %vm517_vm0, %v1276_v28  ;;  %v1246_v28 = vld [vmem:[%s5568_s2 + $0x58] sm:$0xff] }
  0xd2   : > { %v3802_v49 = vpop.f32.mrf.mxu0  ;;  %3139 = vmatpush.xpose.msk.msrb.mxu0 %vm517_vm0, %v1275_v41  ;;  %v1288_v41 = vld [vmem:[%s5568_s2 + $0x1a8] sm:$0xff] }
  0xd3   : > { %5560 = vst [vmem:[#allocation12_spill] sm:$0xff] %v3802_v49  ;;  %v3804_v50 = vpop.f32.mrf.mxu1 }
  0xd5   : > { %2976 = vmatmul.msk.f32.gmra.mxu0 %vm740_vm1, %v3804_v50 }
  0xd6   : > { %2992 = vmatmul.msk.f32.gmra.mxu1 %vm740_vm1, %v3804_v50  ;;  %3140 = vmatpush.xpose.msk.msrb.mxu0 %vm517_vm0, %v1274_v57 }
  0xda   : > { %v3813_v52 = vpop.f32.mrf.mxu0  ;;  %3141 = vmatpush.xpose.msk.msrb.mxu0 %vm517_vm0, %v1273_v63  ;;  %v1262_v63 = vld [vmem:[%s5568_s2 + $0xd8] sm:$0xff] }
  0xdb   : > { %5561 = vst [vmem:[#allocation13_spill] sm:$0xff] %v3813_v52  ;;  %v3815_v53 = vpop.f32.mrf.mxu1 }
  0xdd   : > { %2977 = vmatmul.msk.f32.gmra.mxu0 %vm740_vm1, %v3815_v53 }
  0xde   : > { %2993 = vmatmul.msk.f32.gmra.mxu1 %vm740_vm1, %v3815_v53 }
  0xe2   : > { %v3824_v55 = vpop.f32.mrf.mxu0 }
  0xe3   : > { %5562 = vst [vmem:[#allocation14_spill] sm:$0xff] %v3824_v55  ;;  %v3826_v56 = vpop.f32.mrf.mxu1 }
  0xe5   : > { %2978 = vmatmul.msk.f32.gmra.mxu0 %vm740_vm1, %v3826_v56 }
  0xe6   : > { %2994 = vmatmul.msk.f32.gmra.mxu1 %vm740_vm1, %v3826_v56 }
  0xea   : > { %v3835_v58 = vpop.f32.mrf.mxu0 }
  0xeb   : > { %5563 = vst [vmem:[#allocation15_spill] sm:$0xff] %v3835_v58  ;;  %v3837_v59 = vpop.f32.mrf.mxu1 }
  0xec   : > { %2979 = vmatmul.msk.f32.vlgmr.msra.gmra.mxu2 %vm740_vm1, %v3837_v59  ;;  %2995 = vmatmul.msk.f32.vlgmr.msra.gmra.mxu3 %vm740_vm1, %v3837_v59 }
  0xed   : > { %3036 = vmatmul.msk.f32.vlgmr.msra.gmra.mxu0 %vm740_vm1, %v3743_v32  ;;  %3068 = vmatpush.xpose.msk.msra.mxu2 %vm517_vm0, %v1250_v40  ;;  %v1292_v40 = vld [vmem:[%s5568_s2 + $0x1c8] sm:$0xff] }
  0xee   : > { %3052 = vmatmul.msk.f32.vlgmr.msra.gmra.mxu1 %vm740_vm1, %v3743_v32  ;;  %3100 = vmatpush.xpose.msk.msra.mxu3 %vm517_vm0, %v1266_v54  ;;  %v1264_v54 = vld [vmem:[%s5568_s2 + $0xe8] sm:$0xff] }
  0xef   : > { %3170 = vmatpush.xpose.msk.msrb.mxu1 %vm517_vm0, %v1292_v40  ;;  %v1263_v40 = vld [vmem:[%s5568_s2 + $0xe0] sm:$0xff] }
  0xf1   : > { %3069 = vmatpush.xpose.msk.msra.mxu2 %vm517_vm0, %v1249_v51  ;;  %v1247_v51 = vld [vmem:[%s5568_s2 + $0x60] sm:$0xff] }
  0xf2   : > { %v3850_v61 = vpop.f32.mrf.mxu0  ;;  %3101 = vmatpush.xpose.msk.msra.mxu3 %vm517_vm0, %v1265_v27 }
  0xf3   : > { %5564 = vst [vmem:[#allocation16_spill] sm:$0xff] %v3850_v61  ;;  %v3852_v62 = vpop.f32.mrf.mxu1  ;;  %3171 = vmatpush.xpose.msk.msrb.mxu1 %vm517_vm0, %v1291_v42  ;;  %v1271_v42 = vld [vmem:[%s5568_s2 + $0x120] sm:$0xff] }
  0xf4   : > { %2980 = vmatmul.msk.f32.gmra.mxu2 %vm740_vm1, %v3852_v62  ;;  %2996 = vmatmul.msk.f32.gmra.mxu3 %vm740_vm1, %v3852_v62 }
  0xf5   : > { %3037 = vmatmul.msk.f32.gmra.mxu0 %vm740_vm1, %v3751_v34  ;;  %3070 = vmatpush.xpose.msk.msra.mxu2 %vm517_vm0, %v1248_v25 }
  0xf6   : > { %3053 = vmatmul.msk.f32.gmra.mxu1 %vm740_vm1, %v3751_v34  ;;  %3102 = vmatpush.xpose.msk.msra.mxu3 %vm517_vm0, %v1264_v54 }
  0xf7   : > { %3172 = vmatpush.xpose.msk.msrb.mxu1 %vm517_vm0, %v1290_v60  ;;  %v1245_v60 = vld [vmem:[%s5568_s2 + $0x50] sm:$0xff] }
  0xf9   : > { %3071 = vmatpush.xpose.msk.msra.mxu2 %vm517_vm0, %v1247_v51  ;;  %v1287_v51 = vld [vmem:[%s5568_s2 + $0x1a0] sm:$0xff] }
  0xfa   : > { %v3865_v1 = vpop.f32.mrf.mxu0  ;;  %3103 = vmatpush.xpose.msk.msra.mxu3 %vm517_vm0, %v1263_v40  ;;  %v1285_v40 = vld [vmem:[%s5568_s2 + $0x190] sm:$0xff] }
  0xfb   : > { %5565 = vst [vmem:[#allocation17_spill] sm:$0xff] %v3865_v1  ;;  %v3867_v3 = vpop.f32.mrf.mxu1  ;;  %3173 = vmatpush.xpose.msk.msrb.mxu1 %vm517_vm0, %v1289_v5  ;;  %v1286_v5 = vld [vmem:[%s5568_s2 + $0x198] sm:$0xff] }
  0xfc   : > { %2981 = vmatmul.msk.f32.gmra.mxu2 %vm740_vm1, %v3867_v3  ;;  %2997 = vmatmul.msk.f32.gmra.mxu3 %vm740_vm1, %v3867_v3 }
  0xfd   : > { %3038 = vmatmul.msk.f32.gmra.mxu0 %vm740_vm1, %v3759_v36  ;;  %3072 = vmatpush.xpose.msk.msra.mxu2 %vm517_vm0, %v1246_v28  ;;  %v1269_v28 = vld [vmem:[%s5568_s2 + $0x110] sm:$0xff] }
  0xfe   : > { %3054 = vmatmul.msk.f32.gmra.mxu1 %vm740_vm1, %v3759_v36  ;;  %3104 = vmatpush.xpose.msk.msra.mxu3 %vm517_vm0, %v1262_v63  ;;  %v1267_v63 = vld [vmem:[%s5568_s2 + $0x100] sm:$0xff] }
  0xff   : > { %3174 = vmatpush.xpose.msk.msrb.mxu1 %vm517_vm0, %v1288_v41  ;;  %v1244_v41 = vld [vmem:[%s5568_s2 + $0x48] sm:$0xff] }
 0x101   : > { %3073 = vmatpush.xpose.msk.msra.mxu2 %vm517_vm0, %v1245_v60  ;;  %v1284_v60 = vld [vmem:[%s5568_s2 + $0x188] sm:$0xff] }
 0x102   : > { %v3880_v7 = vpop.f32.mrf.mxu0 }
 0x103   : > { %5566 = vst [vmem:[#allocation18_spill] sm:$0xff] %v3880_v7  ;;  %v3882_v14 = vpop.f32.mrf.mxu1  ;;  %3175 = vmatpush.xpose.msk.msrb.mxu1 %vm517_vm0, %v1287_v51 }
 0x104   : > { %2982 = vmatmul.msk.f32.gmra.mxu2 %vm740_vm1, %v3882_v14  ;;  %2998 = vmatmul.msk.f32.gmra.mxu3 %vm740_vm1, %v3882_v14 }
 0x105   : > { %3039 = vmatmul.msk.f32.gmra.mxu0 %vm740_vm1, %v3785_v44  ;;  %3074 = vmatpush.xpose.msk.msra.mxu2 %vm517_vm0, %v1244_v41  ;;  %v1242_v41 = vld [vmem:[%s5568_s2 + $0x38] sm:$0xff] }
 0x106   : > { %3055 = vmatmul.msk.f32.gmra.mxu1 %vm740_vm1, %v3785_v44 }
 0x107   : > { %3176 = vmatpush.xpose.msk.msrb.mxu1 %vm517_vm0, %v1286_v5  ;;  %v1243_v5 = vld [vmem:[%s5568_s2 + $0x40] sm:$0xff] }
 0x109   : > { %3075 = vmatpush.xpose.msk.msra.mxu2 %vm517_vm0, %v1243_v5  ;;  %v1240_v5 = vld [vmem:[%s5568_s2 + $0x28] sm:$0xff] }
 0x10a   : > { %v3895_v20 = vpop.f32.mrf.mxu0 }
 0x10b   : > { %5567 = vst [vmem:[#allocation19_spill] sm:$0xff] %v3895_v20  ;;  %v3897_v22 = vpop.f32.mrf.mxu1  ;;  %3177 = vmatpush.xpose.msk.msrb.mxu1 %vm517_vm0, %v1285_v40 }
 0x10c   : > { %2983 = vmatmul.msk.f32.gmra.mxu2 %vm740_vm1, %v3897_v22  ;;  %2999 = vmatmul.msk.f32.gmra.mxu3 %vm740_vm1, %v3897_v22 }
 0x10d   : > { %3040 = vmatmul.msk.f32.gmra.mxu0 %vm740_vm1, %v3802_v49  ;;  %3076 = vmatpush.xpose.msk.msra.mxu2 %vm517_vm0, %v1242_v41 }
 0x10e   : > { %3056 = vmatmul.msk.f32.gmra.mxu1 %vm740_vm1, %v3802_v49 }
 0x10f   : > { %3178 = vmatpush.xpose.msk.msrb.mxu1 %vm517_vm0, %v1284_v60  ;;  %v1241_v60 = vld [vmem:[%s5568_s2 + $0x30] sm:$0xff] }
 0x111   : > { %3077 = vmatpush.xpose.msk.msra.mxu2 %vm517_vm0, %v1241_v60 }
 0x112   : > { %v3921_v38 = vpop.f32.mrf.mxu0 }
 0x113   : > { %5569 = vst [vmem:[#allocation20_spill] sm:$0xff] %v3921_v38  ;;  %v3923_v39 = vpop.f32.mrf.mxu1 }
 0x114   : > { %2984 = vmatmul.msk.f32.gmra.mxu2 %vm740_vm1, %v3923_v39  ;;  %3000 = vmatmul.msk.f32.gmra.mxu3 %vm740_vm1, %v3923_v39 }
 0x115   : > { %3041 = vmatmul.msk.f32.gmra.mxu0 %vm740_vm1, %v3813_v52  ;;  %3078 = vmatpush.xpose.msk.msra.mxu2 %vm517_vm0, %v1240_v5  ;;  %v1238_v5 = vld [vmem:[%s5568_s2 + $0x18] sm:$0xff] }
 0x116   : > { %3057 = vmatmul.msk.f32.gmra.mxu1 %vm740_vm1, %v3813_v52 }
 0x11a   : > { %v3953_v47 = vpop.f32.mrf.mxu0 }
 0x11b   : > { %5570 = vst [vmem:[#allocation21_spill] sm:$0xff] %v3953_v47  ;;  %v3955_v48 = vpop.f32.mrf.mxu1 }
 0x11c   : > { %2985 = vmatmul.msk.f32.gmra.mxu2 %vm740_vm1, %v3955_v48  ;;  %3001 = vmatmul.msk.f32.gmra.mxu3 %vm740_vm1, %v3955_v48 }
 0x11d   : > { %3042 = vmatmul.msk.f32.gmra.mxu0 %vm740_vm1, %v3824_v55 }
 0x11e   : > { %3058 = vmatmul.msk.f32.gmra.mxu1 %vm740_vm1, %v3824_v55 }
 0x122   : > { %v3989_v16 = vpop.f32.mrf.mxu0 }
 0x123   : > { %5571 = vst [vmem:[#allocation22_spill] sm:$0xff] %v3989_v16  ;;  %v3991_v24 = vpop.f32.mrf.mxu1 }
 0x124   : > { %2986 = vmatmul.msk.f32.gmra.mxu2 %vm740_vm1, %v3991_v24  ;;  %3002 = vmatmul.msk.f32.gmra.mxu3 %vm740_vm1, %v3991_v24 }
 0x125   : > { %3043 = vmatmul.msk.f32.gmra.mxu0 %vm740_vm1, %v3835_v58 }
 0x126   : > { %3059 = vmatmul.msk.f32.gmra.mxu1 %vm740_vm1, %v3835_v58  ;;  %v1251_v58 = vld [vmem:[%s5568_s2 + $0x80] sm:$0xff] }
 0x12a   : > { %v4025_v43 = vpop.f32.mrf.mxu0 }
 0x12b   : > { %5572 = vst [vmem:[#allocation23_spill] sm:$0xff] %v4025_v43  ;;  %v4027_v46 = vpop.f32.mrf.mxu1 }
 0x12c   : > { %2987 = vmatmul.msk.f32.gmra.mxu2 %vm740_vm1, %v4027_v46  ;;  %3003 = vmatmul.msk.f32.gmra.mxu3 %vm740_vm1, %v4027_v46 }
 0x12d   : > { %3044 = vmatmul.msk.f32.gmra.mxu0 %vm740_vm1, %v3850_v61 }
 0x12e   : > { %3060 = vmatmul.msk.f32.gmra.mxu1 %vm740_vm1, %v3850_v61 }
 0x132   : > { %v4061_v25 = vpop.f32.mrf.mxu0 }
 0x133   : > { %v4063_v27 = vpop.f32.mrf.mxu1 }
 0x134   : > { %3004 = vmatmul.msk.f32.vlgmr.msrb.gmra.mxu2 %vm740_vm1, %v3745_v33  ;;  %3020 = vmatmul.msk.f32.vlgmr.msrb.gmra.mxu3 %vm740_vm1, %v3745_v33  ;;  %v1272_v33 = vld [vmem:[%s5568_s2 + $0x128] sm:$0xff] }
 0x135   : > { %3045 = vmatmul.msk.f32.gmra.mxu0 %vm740_vm1, %v3865_v1 }
 0x136   : > { %3061 = vmatmul.msk.f32.gmra.mxu1 %vm740_vm1, %v3865_v1  ;;  %3142 = vmatpush.xpose.msk.msrb.mxu0 %vm517_vm0, %v1272_v33 }
 0x13a   : > { %v4097_v54 = vpop.f32.mrf.mxu0  ;;  %3143 = vmatpush.xpose.msk.msrb.mxu0 %vm517_vm0, %v1271_v42  ;;  %v1261_v42 = vld [vmem:[%s5568_s2 + $0xd0] sm:$0xff] }
 0x13b   : > { %v4101_v57 = vpop.f32.mrf.mxu1  ;;  %3105 = vmatpush.xpose.msk.msra.mxu3 %vm517_vm0, %v1261_v42  ;;  %v1259_v42 = vld [vmem:[%s5568_s2 + $0xc0] sm:$0xff] }
 0x13c   : > { %3005 = vmatmul.msk.f32.gmra.mxu2 %vm740_vm1, %v3753_v35  ;;  %3021 = vmatmul.msk.f32.gmra.mxu3 %vm740_vm1, %v3753_v35  ;;  %v1270_v35 = vld [vmem:[%s5568_s2 + $0x118] sm:$0xff] }
 0x13d   : > { %3046 = vmatmul.msk.f32.gmra.mxu0 %vm740_vm1, %v3880_v7 }
 0x13e   : > { %3062 = vmatmul.msk.f32.gmra.mxu1 %vm740_vm1, %v3880_v7  ;;  %3144 = vmatpush.xpose.msk.msrb.mxu0 %vm517_vm0, %v1270_v35  ;;  %v1283_v35 = vld [vmem:[%s5568_s2 + $0x180] sm:$0xff] }
 0x13f   : > { %3179 = vmatpush.xpose.msk.msrb.mxu1 %vm517_vm0, %v1283_v35 }
 0x142   : > { %3145 = vmatpush.xpose.msk.msrb.mxu0 %vm517_vm0, %v1269_v28  ;;  %v4135_v33 = vpop.f32.mrf.mxu0  ;;  %v1260_v28 = vld [vmem:[%s5568_s2 + $0xc8] sm:$0xff] }
 0x143   : > { %v4149_v51 = vpop.f32.mrf.mxu1  ;;  %3106 = vmatpush.xpose.msk.msra.mxu3 %vm517_vm0, %v1260_v28  ;;  %v1257_v28 = vld [vmem:[%s5568_s2 + $0xb0] sm:$0xff] }
 0x144   : > { %3006 = vmatmul.msk.f32.gmra.mxu2 %vm740_vm1, %v3761_v37  ;;  %3022 = vmatmul.msk.f32.gmra.mxu3 %vm740_vm1, %v3761_v37  ;;  %v1268_v37 = vld [vmem:[%s5568_s2 + $0x108] sm:$0xff] }
 0x145   : > { %3047 = vmatmul.msk.f32.gmra.mxu0 %vm740_vm1, %v3895_v20 }
 0x146   : > { %3063 = vmatmul.msk.f32.gmra.mxu1 %vm740_vm1, %v3895_v20  ;;  %3146 = vmatpush.xpose.msk.msrb.mxu0 %vm517_vm0, %v1268_v37 }
 0x147   : > { %3107 = vmatpush.xpose.msk.msra.mxu3 %vm517_vm0, %v1259_v42  ;;  %v1256_v42 = vld [vmem:[%s5568_s2 + $0xa8] sm:$0xff] }
 0x14a   : > { %3147 = vmatpush.xpose.msk.msrb.mxu0 %vm517_vm0, %v1267_v63  ;;  %v4183_v40 = vpop.f32.mrf.mxu0  ;;  %v1258_v63 = vld [vmem:[%s5568_s2 + $0xb8] sm:$0xff] }
 0x14b   : > { %3108 = vmatpush.xpose.msk.msra.mxu3 %vm517_vm0, %v1258_v63 }
 0x14c   : > { %3007 = vmatmul.msk.f32.gmra.mxu2 %vm740_vm1, %v3787_v45  ;;  %3023 = vmatmul.msk.f32.gmra.mxu3 %vm740_vm1, %v3787_v45  ;;  %v4189_v45 = vpop.f32.mrf.mxu1 }
 0x14d   : > { %3048 = vmatmul.msk.f32.gmra.mxu0 %vm740_vm1, %v3921_v38 }
 0x14e   : > { %3064 = vmatmul.msk.f32.gmra.mxu1 %vm740_vm1, %v3921_v38 }
 0x14f   : > { %3109 = vmatpush.xpose.msk.msra.mxu3 %vm517_vm0, %v1257_v28  ;;  %v1255_v28 = vld [vmem:[%s5568_s2 + $0xa0] sm:$0xff] }
 0x152   : > { %v4207_v37 = vpop.f32.mrf.mxu0 }
 0x153   : > { %3110 = vmatpush.xpose.msk.msra.mxu3 %vm517_vm0, %v1256_v42 }
 0x154   : > { %3008 = vmatmul.msk.f32.gmra.mxu2 %vm740_vm1, %v3804_v50  ;;  %3024 = vmatmul.msk.f32.gmra.mxu3 %vm740_vm1, %v3804_v50  ;;  %v4209_v50 = vpop.f32.mrf.mxu1 }
 0x155   : > { %3049 = vmatmul.msk.f32.gmra.mxu0 %vm740_vm1, %v3953_v47 }
 0x156   : > { %3065 = vmatmul.msk.f32.gmra.mxu1 %vm740_vm1, %v3953_v47 }
 0x157   : > { %3111 = vmatpush.xpose.msk.msra.mxu3 %vm517_vm0, %v1255_v28  ;;  %v1254_v28 = vld [vmem:[%s5568_s2 + $0x98] sm:$0xff] }
 0x15a   : > { %v4227_v35 = vpop.f32.mrf.mxu0 }
 0x15b   : > { %3112 = vmatpush.xpose.msk.msra.mxu3 %vm517_vm0, %v1254_v28  ;;  %v1253_v28 = vld [vmem:[%s5568_s2 + $0x90] sm:$0xff] }
 0x15c   : > { %3009 = vmatmul.msk.f32.gmra.mxu2 %vm740_vm1, %v3815_v53  ;;  %3025 = vmatmul.msk.f32.gmra.mxu3 %vm740_vm1, %v3815_v53  ;;  %v4229_v53 = vpop.f32.mrf.mxu1 }
 0x15d   : > { %3050 = vmatmul.msk.f32.gmra.mxu0 %vm740_vm1, %v3989_v16 }
 0x15e   : > { %3066 = vmatmul.msk.f32.gmra.mxu1 %vm740_vm1, %v3989_v16 }
 0x15f   : > { %3113 = vmatpush.xpose.msk.msra.mxu3 %vm517_vm0, %v1253_v28  ;;  %v1252_v28 = vld [vmem:[%s5568_s2 + $0x88] sm:$0xff] }
 0x162   : > { %v4247_v41 = vpop.f32.mrf.mxu0 }
 0x163   : > { %3114 = vmatpush.xpose.msk.msra.mxu3 %vm517_vm0, %v1252_v28 }
 0x164   : > { %3010 = vmatmul.msk.f32.gmra.mxu2 %vm740_vm1, %v3826_v56  ;;  %3026 = vmatmul.msk.f32.gmra.mxu3 %vm740_vm1, %v3826_v56  ;;  %v1239_v56 = vld [vmem:[%s5568_s2 + $0x20] sm:$0xff]  ;;  %v4261_v60 = vpop.f32.mrf.mxu1 }
 0x165   : > { %3051 = vmatmul.msk.f32.gmra.mxu0 %vm740_vm1, %v4025_v43  ;;  %3079 = vmatpush.xpose.msk.msra.mxu2 %vm517_vm0, %v1239_v56 }
 0x166   : > { %3067 = vmatmul.msk.f32.gmra.mxu1 %vm740_vm1, %v4025_v43 }
 0x167   : > { %3115 = vmatpush.xpose.msk.msra.mxu3 %vm517_vm0, %v1251_v58 }
 0x169   : > { %3080 = vmatpush.xpose.msk.msra.mxu2 %vm517_vm0, %v1238_v5  ;;  %v1237_v5 = vld [vmem:[%s5568_s2 + $0x10] sm:$0xff] }
 0x16a   : > { %v4283_v56 = vpop.f32.mrf.mxu0 }
 0x16b   : > { %v1751_v44 = vmul.f32 %v4283_v56, %v4061_v25  ;;  %v2071_v34 = vmul.f32 %v4283_v56, %v4063_v27 }
 0x16c   : > { %3011 = vmatmul.msk.f32.gmra.mxu2 %vm740_vm1, %v3837_v59  ;;  %3027 = vmatmul.msk.f32.gmra.mxu3 %vm740_vm1, %v3837_v59  ;;  %v4293_v43 = vpop.f32.mrf.mxu1 }
 0x16d   : > { %3148 = vmatmul.msk.f32.vlgmr.msrb.gmra.mxu0 %vm517_vm0, %v3608_v8  ;;  %3081 = vmatpush.xpose.msk.msra.mxu2 %vm517_vm0, %v1237_v5  ;;  %v1236_v5 = vld [vmem:[%s5568_s2 + $0x8] sm:$0xff]  ;;  %v1799_v36 = vmul.f32 %v4293_v43, %v4061_v25 }
 0x16e   : > { %3180 = vmatmul.msk.f32.vlgmr.msrb.gmra.mxu1 %vm517_vm0, %v3608_v8 }
 0x16f   : > { %v4267_v59 = vpop.f32.mrf.mxu2  ;;  %v4269_v63 = vpop.f32.mrf.mxu3 }
 0x171   : > { %3082 = vmatpush.xpose.msk.msra.mxu2 %vm517_vm0, %v1236_v5  ;;  %v1235_v5 = vld [vmem:[%s5568_s2] sm:$0xff] }
 0x172   : > { %v4315_v47 = vpop.f32.mrf.mxu0 }
 0x174   : > { %3012 = vmatmul.msk.f32.gmra.mxu2 %vm740_vm1, %v3852_v62  ;;  %3028 = vmatmul.msk.f32.gmra.mxu3 %vm740_vm1, %v3852_v62  ;;  %v4317_v38 = vpop.f32.mrf.mxu1 }
 0x175   : > { %3149 = vmatmul.msk.f32.gmra.mxu0 %vm517_vm0, %v3615_v9  ;;  %3083 = vmatpush.xpose.msk.msra.mxu2 %vm517_vm0, %v1235_v5 }
 0x176   : > { %3181 = vmatmul.msk.f32.gmra.mxu1 %vm517_vm0, %v3615_v9 }
 0x177   : > { %v4289_v62 = vpop.f32.mrf.mxu2  ;;  %v4291_v42 = vpop.f32.mrf.mxu3 }
 0x179   : > { %2476 = vmatpush.msrb.mxu2 %v3557_v0 }
 0x17a   : > { %v4339_v7 = vpop.f32.mrf.mxu0 }
 0x17b   : > { %2477 = vmatpush.msrb.mxu2 %v3569_v2 }
 0x17c   : > { %3013 = vmatmul.msk.f32.gmra.mxu2 %vm740_vm1, %v3867_v3  ;;  %3029 = vmatmul.msk.f32.gmra.mxu3 %vm740_vm1, %v3867_v3  ;;  %v4341_v1 = vpop.f32.mrf.mxu1 }
 0x17d   : > { %3150 = vmatmul.msk.f32.gmra.mxu0 %vm517_vm0, %v3622_v10  ;;  %2478 = vmatpush.msrb.mxu2 %v3580_v4  ;;  %v2548_v4 = vld [vmem:[%s5573_s4 + $0x18] sm:$0xff] }
 0x17e   : > { %3182 = vmatmul.msk.f32.gmra.mxu1 %vm517_vm0, %v3622_v10  ;;  %2561 = vmatpush.msrb.mxu3 %v2548_v4 }
 0x17f   : > { %v4311_v16 = vpop.f32.mrf.mxu2  ;;  %v4313_v3 = vpop.f32.mrf.mxu3  ;;  %2479 = vmatpush.msrb.mxu2 %v3593_v6 }
 0x182   : > { %v4370_v5 = vpop.f32.mrf.mxu0 }
 0x184   : > { %3014 = vmatmul.msk.f32.gmra.mxu2 %vm740_vm1, %v3882_v14  ;;  %3030 = vmatmul.msk.f32.gmra.mxu3 %vm740_vm1, %v3882_v14  ;;  %v4377_v28 = vpop.f32.mrf.mxu1 }
 0x185   : > { %3151 = vmatmul.msk.f32.gmra.mxu0 %vm517_vm0, %v3629_v11 }
 0x186   : > { %3183 = vmatmul.msk.f32.gmra.mxu1 %vm517_vm0, %v3629_v11 }
 0x187   : > { %v4335_v20 = vpop.f32.mrf.mxu2  ;;  %v4337_v14 = vpop.f32.mrf.mxu3 }
 0x18a   : > { %v4394_v6 = vpop.f32.mrf.mxu0 }
 0x18c   : > { %3015 = vmatmul.msk.f32.gmra.mxu2 %vm740_vm1, %v3897_v22  ;;  %3031 = vmatmul.msk.f32.gmra.mxu3 %vm740_vm1, %v3897_v22 }
 0x18d   : > { %3152 = vmatmul.msk.f32.gmra.mxu0 %vm517_vm0, %v3636_v12 }
 0x18e   : > { %3184 = vmatmul.msk.f32.gmra.mxu1 %vm517_vm0, %v3636_v12 }
 0x18f   : > { %v4359_v61 = vpop.f32.mrf.mxu2  ;;  %v4361_v22 = vpop.f32.mrf.mxu3 }
 0x192   : > { %v4418_v4 = vpop.f32.mrf.mxu0 }
 0x194   : > { %3016 = vmatmul.msk.f32.gmra.mxu2 %vm740_vm1, %v3923_v39  ;;  %3032 = vmatmul.msk.f32.gmra.mxu3 %vm740_vm1, %v3923_v39  ;;  %v4404_v39 = vpop.f32.mrf.mxu1 }
 0x195   : > { %3153 = vmatmul.msk.f32.gmra.mxu0 %vm517_vm0, %v3643_v13 }
 0x196   : > { %3185 = vmatmul.msk.f32.gmra.mxu1 %vm517_vm0, %v3643_v13 }
 0x197   : > { %v4383_v0 = vpop.f32.mrf.mxu2  ;;  %v4385_v2 = vpop.f32.mrf.mxu3 }
 0x19a   : > { %v4434_v52 = vpop.f32.mrf.mxu0 }
 0x19c   : > { %3017 = vmatmul.msk.f32.gmra.mxu2 %vm740_vm1, %v3955_v48  ;;  %3033 = vmatmul.msk.f32.gmra.mxu3 %vm740_vm1, %v3955_v48  ;;  %v4420_v55 = vpop.f32.mrf.mxu1 }
 0x19d   : > { %3154 = vmatmul.msk.f32.gmra.mxu0 %vm517_vm0, %v3653_v15 }
 0x19e   : > { %3186 = vmatmul.msk.f32.gmra.mxu1 %vm517_vm0, %v3653_v15 }
 0x19f   : > { %v4400_v13 = vpop.f32.mrf.mxu2  ;;  %v4402_v58 = vpop.f32.mrf.mxu3 }
 0x1a0   : > { %5574 = vst [vmem:[#allocation24_spill] sm:$0xff] %v4400_v13 }
 0x1a1   : > { %5575 = vst [vmem:[#allocation25_spill] sm:$0xff] %v4402_v58 }
 0x1a2   : > { %v4466_v13 = vpop.f32.mrf.mxu0 }
 0x1a4   : > { %3018 = vmatmul.msk.f32.gmra.mxu2 %vm740_vm1, %v3991_v24  ;;  %3034 = vmatmul.msk.f32.gmra.mxu3 %vm740_vm1, %v3991_v24  ;;  %v4436_v49 = vpop.f32.mrf.mxu1 }
 0x1a5   : > { %3155 = vmatmul.msk.f32.gmra.mxu0 %vm517_vm0, %v3663_v17 }
 0x1a6   : > { %3187 = vmatmul.msk.f32.gmra.mxu1 %vm517_vm0, %v3663_v17 }
 0x1a7   : > { %v4414_v48 = vpop.f32.mrf.mxu2  ;;  %v4416_v15 = vpop.f32.mrf.mxu3 }
 0x1a8   : > { %5576 = vst [vmem:[#allocation26_spill] sm:$0xff] %v4414_v48 }
 0x1a9   : > { %5577 = vst [vmem:[#allocation27_spill] sm:$0xff] %v4416_v15 }
 0x1ac   : > { %3019 = vmatmul.msk.f32.gmra.mxu2 %vm740_vm1, %v4027_v46  ;;  %3035 = vmatmul.msk.f32.gmra.mxu3 %vm740_vm1, %v4027_v46 }
 0x1ad   : > { %3156 = vmatmul.msk.f32.gmra.mxu0 %vm517_vm0, %v3670_v18 }
 0x1ae   : > { %3188 = vmatmul.msk.f32.gmra.mxu1 %vm517_vm0, %v3670_v18 }
 0x1af   : > { %v4430_v17 = vpop.f32.mrf.mxu2  ;;  %v4432_v24 = vpop.f32.mrf.mxu3 }
 0x1b0   : > { %5578 = vst [vmem:[#allocation28_spill] sm:$0xff] %v4430_v17 }
 0x1b1   : > { %5579 = vst [vmem:[#allocation29_spill] sm:$0xff] %v4432_v24 }
 0x1b4   : > { %3084 = vmatmul.msk.f32.vlgmr.msra.gmra.mxu2 %vm517_vm0, %v3608_v8  ;;  %3116 = vmatmul.msk.f32.vlgmr.msra.gmra.mxu3 %vm517_vm0, %v3608_v8  ;;  %v2119_v8 = vmul.f32 %v4293_v43, %v4063_v27  ;;  %v2072_v27 = vmul.f32 %v4315_v47, %v4101_v57 }
 0x1b5   : > { %3157 = vmatmul.msk.f32.gmra.mxu0 %vm517_vm0, %v3677_v19 }
 0x1b6   : > { %3189 = vmatmul.msk.f32.gmra.mxu1 %vm517_vm0, %v3677_v19 }
 0x1b7   : > { %v936_v18 = vpop.f32.mrf.mxu2  ;;  %v1001_v46 = vpop.f32.mrf.mxu3 }
 0x1b8   : > { %v1767_v32 = vmul.f32 %v4293_v43, %v936_v18  ;;  %v1815_v24 = vmul.f32 %v4283_v56, %v936_v18  ;;  %v2087_v19 = vmul.f32 %v4293_v43, %v1001_v46  ;;  %v2135_v17 = vmul.f32 %v4283_v56, %v1001_v46  ;;  %v2547_v43 = vld [vmem:[%s5573_s4 + $0x10] sm:$0xff] }
 0x1b9   : > { %2562 = vmatpush.msrb.mxu3 %v2547_v43  ;;  %v2120_v56 = vmul.f32 %v4317_v38, %v4101_v57  ;;  %v4505_v57 = vpop.f32.mrf.mxu0  ;;  %v1753_v43 = vmul.f32 %v4339_v7, %v4135_v33 }
 0x1ba   : > { %v4458_v15 = vsub.f32 %v1751_v44, %v1767_v32  ;;  %v4460_v48 = vadd.f32 %v1815_v24, %v1799_v36  ;;  %v4462_v58 = vsub.f32 %v2071_v34, %v2087_v19  ;;  %v4464_v25 = vadd.f32 %v2135_v17, %v2119_v8  ;;  %v4475_v32 = vpop.f32.mrf.mxu1 }
 0x1bb   : > { %v1752_v44 = vmul.f32 %v4315_v47, %v4097_v54 }
 0x1bc   : > { %3085 = vmatmul.msk.f32.gmra.mxu2 %vm517_vm0, %v3615_v9  ;;  %3117 = vmatmul.msk.f32.gmra.mxu3 %vm517_vm0, %v3615_v9  ;;  %v1800_v9 = vmul.f32 %v4317_v38, %v4097_v54 }
 0x1bd   : > { %3158 = vmatmul.msk.f32.gmra.mxu0 %vm517_vm0, %v3687_v21 }
 0x1be   : > { %3190 = vmatmul.msk.f32.gmra.mxu1 %vm517_vm0, %v3687_v21 }
 0x1bf   : > { %v939_v34 = vpop.f32.mrf.mxu2  ;;  %v1004_v36 = vpop.f32.mrf.mxu3 }
 0x1c0   : > { %v1768_v17 = vmul.f32 %v4317_v38, %v939_v34  ;;  %v1816_v24 = vmul.f32 %v4315_v47, %v939_v34  ;;  %v2088_v21 = vmul.f32 %v4317_v38, %v1004_v36  ;;  %v2136_v18 = vmul.f32 %v4315_v47, %v1004_v36 }
 0x1c1   : > { %v1801_v34 = vmul.f32 %v4341_v1, %v4135_v33  ;;  %v2073_v36 = vmul.f32 %v4339_v7, %v4149_v51 }
 0x1c2   : > { %v4493_v46 = vsub.f32 %v1752_v44, %v1768_v17  ;;  %v4495_v8 = vadd.f32 %v1816_v24, %v1800_v9  ;;  %v4497_v19 = vsub.f32 %v2072_v27, %v2088_v21  ;;  %v4499_v54 = vadd.f32 %v2136_v18, %v2120_v56  ;;  %v4519_v44 = vpop.f32.mrf.mxu1 }
 0x1c3   : > { %v1802_v18 = vmul.f32 %v4377_v28, %v4183_v40 }
 0x1c4   : > { %3086 = vmatmul.msk.f32.gmra.mxu2 %vm517_vm0, %v3622_v10  ;;  %3118 = vmatmul.msk.f32.gmra.mxu3 %vm517_vm0, %v3622_v10  ;;  %v2121_v10 = vmul.f32 %v4341_v1, %v4149_v51  ;;  %v1754_v51 = vmul.f32 %v4370_v5, %v4183_v40 }
 0x1c5   : > { %3159 = vmatmul.msk.f32.gmra.mxu0 %vm517_vm0, %v3697_v23 }
 0x1c6   : > { %3191 = vmatmul.msk.f32.gmra.mxu1 %vm517_vm0, %v3697_v23 }
 0x1c7   : > { %v942_v38 = vpop.f32.mrf.mxu2  ;;  %v1007_v47 = vpop.f32.mrf.mxu3 }
 0x1c8   : > { %v1769_v9 = vmul.f32 %v4341_v1, %v942_v38  ;;  %v1817_v23 = vmul.f32 %v4339_v7, %v942_v38  ;;  %v2089_v27 = vmul.f32 %v4341_v1, %v1007_v47  ;;  %v2137_v56 = vmul.f32 %v4339_v7, %v1007_v47  ;;  %v4549_v47 = vpop.f32.mrf.mxu0 }
 0x1c9   : > { %v2074_v38 = vmul.f32 %v4370_v5, %v4189_v45 }
 0x1ca   : > { %v4525_v17 = vsub.f32 %v1753_v43, %v1769_v9  ;;  %v4527_v24 = vadd.f32 %v1817_v23, %v1801_v34  ;;  %v4529_v33 = vsub.f32 %v2073_v36, %v2089_v27  ;;  %v4531_v21 = vadd.f32 %v2137_v56, %v2121_v10  ;;  %v4555_v10 = vpop.f32.mrf.mxu1 }
 0x1cb   : > { %v1803_v56 = vmul.f32 %v4404_v39, %v4207_v37 }
 0x1cc   : > { %3087 = vmatmul.msk.f32.gmra.mxu2 %vm517_vm0, %v3629_v11  ;;  %3119 = vmatmul.msk.f32.gmra.mxu3 %vm517_vm0, %v3629_v11  ;;  %v2122_v11 = vmul.f32 %v4377_v28, %v4189_v45 }
 0x1cd   : > { %3160 = vmatmul.msk.f32.gmra.mxu0 %vm517_vm0, %v3710_v26 }
 0x1ce   : > { %3192 = vmatmul.msk.f32.gmra.mxu1 %vm517_vm0, %v3710_v26 }
 0x1cf   : > { %v945_v1 = vpop.f32.mrf.mxu2  ;;  %v1010_v7 = vpop.f32.mrf.mxu3 }
 0x1d0   : > { %v1770_v43 = vmul.f32 %v4377_v28, %v945_v1  ;;  %v1818_v26 = vmul.f32 %v4370_v5, %v945_v1  ;;  %v2090_v34 = vmul.f32 %v4377_v28, %v1010_v7  ;;  %v2138_v36 = vmul.f32 %v4370_v5, %v1010_v7 }
 0x1d1   : > { %v1755_v28 = vmul.f32 %v4394_v6, %v4207_v37  ;;  %v2075_v1 = vmul.f32 %v4394_v6, %v4209_v50 }
 0x1d2   : > { %v4557_v9 = vsub.f32 %v1754_v51, %v1770_v43  ;;  %v4559_v40 = vadd.f32 %v1818_v26, %v1802_v18  ;;  %v4561_v23 = vsub.f32 %v2074_v38, %v2090_v34  ;;  %v4563_v27 = vadd.f32 %v2138_v36, %v2122_v11  ;;  %v4585_v38 = vpop.f32.mrf.mxu0  ;;  %v4595_v34 = vpop.f32.mrf.mxu1 }
 0x1d4   : > { %3088 = vmatmul.msk.f32.gmra.mxu2 %vm517_vm0, %v3636_v12  ;;  %3120 = vmatmul.msk.f32.gmra.mxu3 %vm517_vm0, %v3636_v12  ;;  %v2123_v12 = vmul.f32 %v4404_v39, %v4209_v50  ;;  %v3313_v50 = vld [vmem:[%s3602_s16 + $0x28] sm:$0xff] }
 0x1d5   : > { %3161 = vmatmul.msk.f32.gmra.mxu0 %vm517_vm0, %v3723_v29 }
 0x1d6   : > { %3193 = vmatmul.msk.f32.gmra.mxu1 %vm517_vm0, %v3723_v29 }
 0x1d7   : > { %v948_v45 = vpop.f32.mrf.mxu2  ;;  %v1013_v5 = vpop.f32.mrf.mxu3 }
 0x1d8   : > { %v1771_v7 = vmul.f32 %v4404_v39, %v948_v45  ;;  %v1819_v51 = vmul.f32 %v4394_v6, %v948_v45  ;;  %v2091_v29 = vmul.f32 %v4404_v39, %v1013_v5  ;;  %v2139_v18 = vmul.f32 %v4394_v6, %v1013_v5  ;;  %v2546_v6 = vld [vmem:[%s5573_s4 + $0x8] sm:$0xff] }
 0x1d9   : > { %2563 = vmatpush.msrb.mxu3 %v2546_v6  ;;  %v1756_v45 = vmul.f32 %v4418_v4, %v4227_v35  ;;  %v1804_v5 = vmul.f32 %v4420_v55, %v4227_v35  ;;  %v3314_v6 = vld [vmem:[%s3602_s16 + $0x30] sm:$0xff] }
 0x1da   : > { %v4587_v11 = vsub.f32 %v1755_v28, %v1771_v7  ;;  %v4589_v43 = vadd.f32 %v1819_v51, %v1803_v56  ;;  %v4591_v37 = vsub.f32 %v2075_v1, %v2091_v29  ;;  %v4593_v26 = vadd.f32 %v2139_v18, %v2123_v12 }
 0x1db   : > { %v2076_v28 = vmul.f32 %v4418_v4, %v4229_v53  ;;  %v2124_v56 = vmul.f32 %v4420_v55, %v4229_v53  ;;  %v4632_v53 = vpop.f32.mrf.mxu1 }
 0x1dc   : > { %3089 = vmatmul.msk.f32.gmra.mxu2 %vm517_vm0, %v3313_v50  ;;  %3121 = vmatmul.msk.f32.gmra.mxu3 %vm517_vm0, %v3313_v50  ;;  %v4627_v50 = vpop.f32.mrf.mxu0 }
 0x1dd   : > { %3162 = vmatmul.msk.f32.gmra.mxu0 %vm517_vm0, %v3730_v30 }
 0x1de   : > { %3194 = vmatmul.msk.f32.gmra.mxu1 %vm517_vm0, %v3730_v30 }
 0x1df   : > { %v951_v39 = vpop.f32.mrf.mxu2  ;;  %v1016_v36 = vpop.f32.mrf.mxu3 }
 0x1e0   : > { %v1772_v1 = vmul.f32 %v4420_v55, %v951_v39  ;;  %v1820_v30 = vmul.f32 %v4418_v4, %v951_v39  ;;  %v2092_v12 = vmul.f32 %v4420_v55, %v1016_v36  ;;  %v2140_v7 = vmul.f32 %v4418_v4, %v1016_v36 }
 0x1e1   : > { %v1757_v39 = vmul.f32 %v4434_v52, %v4247_v41  ;;  %v1805_v36 = vmul.f32 %v4436_v49, %v4247_v41 }
 0x1e2   : > { %v4619_v51 = vsub.f32 %v1756_v45, %v1772_v1  ;;  %v4621_v29 = vadd.f32 %v1820_v30, %v1804_v5  ;;  %v4623_v18 = vsub.f32 %v2076_v28, %v2092_v12  ;;  %v4625_v35 = vadd.f32 %v2140_v7, %v2124_v56 }
 0x1e3   : > { %v2077_v45 = vmul.f32 %v4434_v52, %v4261_v60  ;;  %v2125_v5 = vmul.f32 %v4436_v49, %v4261_v60 }
 0x1e4   : > { %3090 = vmatmul.msk.f32.gmra.mxu2 %vm517_vm0, %v3314_v6  ;;  %3122 = vmatmul.msk.f32.gmra.mxu3 %vm517_vm0, %v3314_v6  ;;  %v3315_v6 = vld [vmem:[%s3602_s16 + $0x38] sm:$0xff]  ;;  %v4661_v60 = vpop.f32.mrf.mxu0 }
 0x1e5   : > { %3163 = vmatmul.msk.f32.gmra.mxu0 %vm517_vm0, %v3737_v31 }
 0x1e6   : > { %3195 = vmatmul.msk.f32.gmra.mxu1 %vm517_vm0, %v3737_v31 }
 0x1e7   : > { %v954_v55 = vpop.f32.mrf.mxu2  ;;  %v1019_v4 = vpop.f32.mrf.mxu3 }
 0x1e8   : > { %v1773_v28 = vmul.f32 %v4436_v49, %v954_v55  ;;  %v1821_v56 = vmul.f32 %v4434_v52, %v954_v55  ;;  %v2093_v31 = vmul.f32 %v4436_v49, %v1019_v4  ;;  %v2141_v1 = vmul.f32 %v4434_v52, %v1019_v4 }
 0x1e9   : > { %v1758_v52 = vmul.f32 %v4466_v13, %v4267_v59  ;;  %v1806_v4 = vmul.f32 %v4475_v32, %v4267_v59 }
 0x1ea   : > { %v4650_v30 = vsub.f32 %v1757_v39, %v1773_v28  ;;  %v4652_v12 = vadd.f32 %v1821_v56, %v1805_v36  ;;  %v4654_v7 = vsub.f32 %v2077_v45, %v2093_v31  ;;  %v4656_v41 = vadd.f32 %v2141_v1, %v2125_v5  ;;  %v4671_v45 = vpop.f32.mrf.mxu1 }
 0x1eb   : > { %v2078_v39 = vmul.f32 %v4466_v13, %v4269_v63  ;;  %v2126_v36 = vmul.f32 %v4475_v32, %v4269_v63 }
 0x1ec   : > { %5580 = vst [vmem:[#allocation30_spill] sm:$0xff] %v4654_v7  ;;  %3091 = vmatmul.msk.f32.gmra.mxu2 %vm517_vm0, %v3315_v6  ;;  %3123 = vmatmul.msk.f32.gmra.mxu3 %vm517_vm0, %v3315_v6 }
 0x1ed   : > { %5581 = vst [vmem:[#allocation31_spill] sm:$0xff] %v4656_v41  ;;  %v3316_v41 = vld [vmem:[%s3602_s16 + $0x40] sm:$0xff] }
 0x1ef   : > { %v957_v55 = vpop.f32.mrf.mxu2  ;;  %v1022_v49 = vpop.f32.mrf.mxu3 }
 0x1f0   : > { %v1774_v5 = vmul.f32 %v4475_v32, %v957_v55  ;;  %v1822_v28 = vmul.f32 %v4466_v13, %v957_v55  ;;  %v2094_v56 = vmul.f32 %v4475_v32, %v1022_v49  ;;  %v2142_v31 = vmul.f32 %v4466_v13, %v1022_v49 }
 0x1f1   : > { %v1759_v32 = vmul.f32 %v4505_v57, %v4289_v62  ;;  %v1807_v13 = vmul.f32 %v4519_v44, %v4289_v62  ;;  %v2079_v49 = vmul.f32 %v4505_v57, %v4291_v42 }
 0x1f2   : > { %v4677_v1 = vsub.f32 %v1758_v52, %v1774_v5  ;;  %v4679_v6 = vadd.f32 %v1822_v28, %v1806_v4  ;;  %v4681_v59 = vsub.f32 %v2078_v39, %v2094_v56  ;;  %v4683_v7 = vadd.f32 %v2142_v31, %v2126_v36  ;;  %v4696_v4 = vpop.f32.mrf.mxu0  ;;  %v4702_v28 = vpop.f32.mrf.mxu1 }
 0x1f3   : > { %v2127_v52 = vmul.f32 %v4519_v44, %v4291_v42  ;;  %v3317_v42 = vld [vmem:[%s3602_s16 + $0x48] sm:$0xff] }
 0x1f4   : > { %5582 = vst [vmem:[#allocation32_spill] sm:$0xff] %v4681_v59  ;;  %3092 = vmatmul.msk.f32.gmra.mxu2 %vm517_vm0, %v3316_v41  ;;  %3124 = vmatmul.msk.f32.gmra.mxu3 %vm517_vm0, %v3316_v41 }
 0x1f7   : > { %v960_v63 = vpop.f32.mrf.mxu2  ;;  %v1025_v55 = vpop.f32.mrf.mxu3 }
 0x1f8   : > { %v1775_v39 = vmul.f32 %v4519_v44, %v960_v63  ;;  %v1823_v41 = vmul.f32 %v4505_v57, %v960_v63  ;;  %v2095_v36 = vmul.f32 %v4519_v44, %v1025_v55  ;;  %v2143_v5 = vmul.f32 %v4505_v57, %v1025_v55  ;;  %v2545_v44 = vld [vmem:[%s5573_s4] sm:$0xff] }
 0x1f9   : > { %2564 = vmatpush.msrb.mxu3 %v2545_v44  ;;  %v1760_v55 = vmul.f32 %v4549_v47, %v4311_v16 }
 0x1fa   : > { %v4704_v56 = vsub.f32 %v1759_v32, %v1775_v39  ;;  %v4706_v62 = vadd.f32 %v1823_v41, %v1807_v13  ;;  %v4708_v31 = vsub.f32 %v2079_v49, %v2095_v36  ;;  %v4710_v59 = vadd.f32 %v2143_v5, %v2127_v52  ;;  %v4730_v5 = vpop.f32.mrf.mxu0 }
 0x1fb   : > { %v1808_v32 = vmul.f32 %v4555_v10, %v4311_v16  ;;  %v2080_v13 = vmul.f32 %v4549_v47, %v4313_v3  ;;  %v2128_v49 = vmul.f32 %v4555_v10, %v4313_v3  ;;  %v3318_v3 = vld [vmem:[%s3602_s16 + $0x50] sm:$0xff] }
 0x1fc   : > { %5583 = vst [vmem:[#allocation33_spill] sm:$0xff] %v4708_v31  ;;  %3093 = vmatmul.msk.f32.gmra.mxu2 %vm517_vm0, %v3317_v42  ;;  %3125 = vmatmul.msk.f32.gmra.mxu3 %vm517_vm0, %v3317_v42 }
 0x1fd   : > { %5584 = vst [vmem:[#allocation34_spill] sm:$0xff] %v4710_v59  ;;  %v4740_v59 = vpop.f32.mrf.mxu1 }
 0x1ff   : > { %v963_v57 = vpop.f32.mrf.mxu2  ;;  %v1028_v63 = vpop.f32.mrf.mxu3 }
 0x200   : > { %v1776_v52 = vmul.f32 %v4555_v10, %v963_v57  ;;  %v1824_v39 = vmul.f32 %v4549_v47, %v963_v57  ;;  %v2096_v41 = vmul.f32 %v4555_v10, %v1028_v63  ;;  %v2144_v36 = vmul.f32 %v4549_v47, %v1028_v63 }
 0x201   : > { %v1761_v57 = vmul.f32 %v4585_v38, %v4335_v20  ;;  %v1809_v63 = vmul.f32 %v4595_v34, %v4335_v20 }
 0x202   : > { %v4732_v42 = vsub.f32 %v1760_v55, %v1776_v52  ;;  %v4734_v44 = vadd.f32 %v1824_v39, %v1808_v32  ;;  %v4736_v16 = vsub.f32 %v2080_v13, %v2096_v41  ;;  %v4738_v31 = vadd.f32 %v2144_v36, %v2128_v49 }
 0x203   : > { %v2081_v55 = vmul.f32 %v4585_v38, %v4337_v14  ;;  %v2129_v32 = vmul.f32 %v4595_v34, %v4337_v14 }
 0x204   : > { %5585 = vst [vmem:[#allocation35_spill] sm:$0xff] %v4736_v16  ;;  %3094 = vmatmul.msk.f32.gmra.mxu2 %vm517_vm0, %v3318_v3  ;;  %3126 = vmatmul.msk.f32.gmra.mxu3 %vm517_vm0, %v3318_v3  ;;  %v4765_v16 = vpop.f32.mrf.mxu0 }
 0x205   : > { %5586 = vst [vmem:[#allocation36_spill] sm:$0xff] %v4738_v31  ;;  %v3319_v31 = vld [vmem:[%s3602_s16 + $0x58] sm:$0xff]  ;;  %v4770_v14 = vpop.f32.mrf.mxu1 }
 0x207   : > { %v966_v10 = vpop.f32.mrf.mxu2  ;;  %v1031_v47 = vpop.f32.mrf.mxu3 }
 0x208   : > { %v1777_v13 = vmul.f32 %v4595_v34, %v966_v10  ;;  %v1825_v49 = vmul.f32 %v4585_v38, %v966_v10  ;;  %v2097_v52 = vmul.f32 %v4595_v34, %v1031_v47  ;;  %v2145_v39 = vmul.f32 %v4585_v38, %v1031_v47 }
 0x209   : > { %v1762_v10 = vmul.f32 %v4627_v50, %v4359_v61  ;;  %v1810_v47 = vmul.f32 %v4632_v53, %v4359_v61 }
 0x20a   : > { %v4757_v41 = vsub.f32 %v1761_v57, %v1777_v13  ;;  %v4759_v36 = vadd.f32 %v1825_v49, %v1809_v63  ;;  %v4761_v3 = vsub.f32 %v2081_v55, %v2097_v52  ;;  %v4763_v20 = vadd.f32 %v2145_v39, %v2129_v32 }
 0x20b   : > { %v2082_v57 = vmul.f32 %v4627_v50, %v4361_v22  ;;  %v2130_v63 = vmul.f32 %v4632_v53, %v4361_v22 }
 0x20c   : > { %5587 = vst [vmem:[#allocation37_spill] sm:$0xff] %v4761_v3  ;;  %3095 = vmatmul.msk.f32.gmra.mxu2 %vm517_vm0, %v3319_v31  ;;  %3127 = vmatmul.msk.f32.gmra.mxu3 %vm517_vm0, %v3319_v31  ;;  %v3320_v3 = vld [vmem:[%s3602_s16 + $0x60] sm:$0xff]  ;;  %v4795_v22 = vpop.f32.mrf.mxu0 }
 0x20f   : > { %v969_v34 = vpop.f32.mrf.mxu2  ;;  %v1034_v38 = vpop.f32.mrf.mxu3 }
 0x210   : > { %v1778_v55 = vmul.f32 %v4632_v53, %v969_v34  ;;  %v1826_v31 = vmul.f32 %v4627_v50, %v969_v34  ;;  %v2098_v32 = vmul.f32 %v4632_v53, %v1034_v38  ;;  %v2146_v13 = vmul.f32 %v4627_v50, %v1034_v38 }
 0x211   : > { %v1763_v50 = vmul.f32 %v4661_v60, %v4383_v0  ;;  %v1811_v38 = vmul.f32 %v4671_v45, %v4383_v0 }
 0x212   : > { %v4784_v49 = vsub.f32 %v1762_v10, %v1778_v55  ;;  %v4786_v52 = vadd.f32 %v1826_v31, %v1810_v47  ;;  %v4788_v39 = vsub.f32 %v2082_v57, %v2098_v32  ;;  %v4790_v61 = vadd.f32 %v2146_v13, %v2130_v63  ;;  %v4805_v57 = vpop.f32.mrf.mxu1 }
 0x213   : > { %v2083_v10 = vmul.f32 %v4661_v60, %v4385_v2  ;;  %v2131_v47 = vmul.f32 %v4671_v45, %v4385_v2 }
 0x214   : > { %5588 = vst [vmem:[#allocation38_spill] sm:$0xff] %v4784_v49  ;;  %3096 = vmatmul.msk.f32.gmra.mxu2 %vm517_vm0, %v3320_v3  ;;  %3128 = vmatmul.msk.f32.gmra.mxu3 %vm517_vm0, %v3320_v3  ;;  %v5594_v49 = vld [vmem:[#allocation24_spill] sm:$0xff] }
 0x215   : > { %5589 = vst [vmem:[#allocation39_spill] sm:$0xff] %v4788_v39 }
 0x216   : > { %5590 = vst [vmem:[#allocation40_spill] sm:$0xff] %v4790_v61  ;;  %v3321_v61 = vld [vmem:[%s3602_s16 + $0x68] sm:$0xff] }
 0x217   : > { %v972_v34 = vpop.f32.mrf.mxu2  ;;  %v1037_v53 = vpop.f32.mrf.mxu3 }
 0x218   : > { %v1779_v3 = vmul.f32 %v4671_v45, %v972_v34  ;;  %v1827_v63 = vmul.f32 %v4661_v60, %v972_v34  ;;  %v2099_v55 = vmul.f32 %v4671_v45, %v1037_v53  ;;  %v2147_v31 = vmul.f32 %v4661_v60, %v1037_v53  ;;  %v5595_v53 = vld [vmem:[#allocation25_spill] sm:$0xff] }
 0x219   : > { %v1764_v45 = vmul.f32 %v4696_v4, %v5594_v49  ;;  %v1812_v60 = vmul.f32 %v4702_v28, %v5594_v49 }
 0x21a   : > { %v4811_v32 = vsub.f32 %v1763_v50, %v1779_v3  ;;  %v4813_v13 = vadd.f32 %v1827_v63, %v1811_v38  ;;  %v4815_v0 = vsub.f32 %v2083_v10, %v2099_v55  ;;  %v4817_v39 = vadd.f32 %v2147_v31, %v2131_v47  ;;  %v4830_v10 = vpop.f32.mrf.mxu0  ;;  %v4836_v55 = vpop.f32.mrf.mxu1 }
 0x21b   : > { %v2084_v50 = vmul.f32 %v4696_v4, %v5595_v53  ;;  %v2132_v38 = vmul.f32 %v4702_v28, %v5595_v53  ;;  %v3322_v53 = vld [vmem:[%s3602_s16 + $0x70] sm:$0xff] }
 0x21c   : > { %5591 = vst [vmem:[#allocation41_spill] sm:$0xff] %v4811_v32  ;;  %3097 = vmatmul.msk.f32.gmra.mxu2 %vm517_vm0, %v3321_v61  ;;  %3129 = vmatmul.msk.f32.gmra.mxu3 %vm517_vm0, %v3321_v61  ;;  %v5599_v32 = vld [vmem:[#allocation26_spill] sm:$0xff] }
 0x21d   : > { %5592 = vst [vmem:[#allocation42_spill] sm:$0xff] %v4815_v0 }
 0x21e   : > { %5593 = vst [vmem:[#allocation43_spill] sm:$0xff] %v4817_v39 }
 0x21f   : > { %v975_v2 = vpop.f32.mrf.mxu2  ;;  %v1040_v34 = vpop.f32.mrf.mxu3 }
 0x220   : > { %v1780_v47 = vmul.f32 %v4702_v28, %v975_v2  ;;  %v1828_v61 = vmul.f32 %v4696_v4, %v975_v2  ;;  %v2100_v3 = vmul.f32 %v4702_v28, %v1040_v34  ;;  %v2148_v63 = vmul.f32 %v4696_v4, %v1040_v34 }
 0x221   : > { %v1765_v4 = vmul.f32 %v4730_v5, %v5599_v32  ;;  %v1813_v34 = vmul.f32 %v4740_v59, %v5599_v32 }
 0x222   : > { %v4838_v31 = vsub.f32 %v1764_v45, %v1780_v47  ;;  %v4840_v49 = vadd.f32 %v1828_v61, %v1812_v60  ;;  %v4842_v0 = vsub.f32 %v2084_v50, %v2100_v3  ;;  %v4844_v39 = vadd.f32 %v2148_v63, %v2132_v38  ;;  %v5600_v45 = vld [vmem:[#allocation27_spill] sm:$0xff]  ;;  %v4861_v63 = vpop.f32.mrf.mxu0 }
 0x223   : > { %v2085_v60 = vmul.f32 %v4730_v5, %v5600_v45  ;;  %v2133_v50 = vmul.f32 %v4740_v59, %v5600_v45  ;;  %v3323_v45 = vld [vmem:[%s3602_s16 + $0x78] sm:$0xff]  ;;  %s4901_s16 = sand.u32 1, %s3418_s18  }
 0x224   : > { %5596 = vst [vmem:[#allocation24_spill] sm:$0xff] %v4838_v31  ;;  %3098 = vmatmul.msk.f32.gmra.mxu2 %vm517_vm0, %v3322_v53  ;;  %3130 = vmatmul.msk.f32.gmra.mxu3 %vm517_vm0, %v3322_v53  ;;  %v4871_v31 = vpop.f32.mrf.mxu1  ;;  %s2922_s14 = sshll.u32 %s4901_s16, 8  ;;  %s2631_s2 = scalar_lea.sflag [#allocation3], %s4901_s16 }
 0x225   : > { %5597 = vst [vmem:[#allocation25_spill] sm:$0xff] %v4842_v0  ;;  %s4924_s15 = scalar_lea.vmem [#allocation2], %s2922_s14  ;;  %s4931_s0 = scalar_lea.vmem [#allocation4], %s2922_s14 }
 0x226   : > { %5598 = vst [vmem:[#allocation44_spill] sm:$0xff] %v4844_v39  ;;  %s2666_s3 = sshll.u32 %s4924_s15, 4  ;;  %s2668_s14 = sshll.u32 %s2665_s13, 4  ;;  %s2667_s3 = int_to_ptr.vmem [resolvable:$true] %s2666_s3  ;;  %s2669_s14 = int_to_ptr.hbm [resolvable:$true] %s2668_s14 }
 0x227   : > { %v978_v2 = vpop.f32.mrf.mxu2  ;;  %v1043_v28 = vpop.f32.mrf.mxu3  ;;  %s3338_s4 = sshra.s32 %s2669_s14, 4  ;;  %s3339_s4 = int_to_ptr.hbm [resolvable:$true] %s3338_s4 }
 0x228   : > { %v1781_v38 = vmul.f32 %v4740_v59, %v978_v2  ;;  %v1829_v47 = vmul.f32 %v4730_v5, %v978_v2  ;;  %v2101_v61 = vmul.f32 %v4740_v59, %v1043_v28  ;;  %v2149_v3 = vmul.f32 %v4730_v5, %v1043_v28  ;;  %v5605_v2 = vld [vmem:[#allocation28_spill] sm:$0xff]  ;;  %s3340_s5 = scalar_lea.hbm %s3339_s4, 256  ;;  %p3345_p1 = scmp.lt.s32.totalorder %s3339_s4, %s5474_s7 }
 0x229   : > { %v1766_v28 = vmul.f32 %v4765_v16, %v5605_v2  ;;  %p3341_p12 = scmp.ne.s32.totalorder %s3339_s4, %s3340_s5  ;;  %p3346_p2 = scmp.lt.s32.totalorder %s3344_s23, %s3340_s5 }
 0x22a   : > { %v4863_v53 = vsub.f32 %v1765_v4, %v1781_v38  ;;  %v4865_v0 = vadd.f32 %v1829_v47, %v1813_v34  ;;  %v4867_v32 = vsub.f32 %v2085_v60, %v2101_v61  ;;  %v4869_v39 = vadd.f32 %v2149_v3, %v2133_v50  ;;  %v5606_v34 = vld [vmem:[#allocation29_spill] sm:$0xff] }
 0x22b   : > { %v1814_v4 = vmul.f32 %v4770_v14, %v5605_v2  ;;  %v2086_v60 = vmul.f32 %v4765_v16, %v5606_v34  ;;  %v2134_v50 = vmul.f32 %v4770_v14, %v5606_v34  ;;  %p3342_p13 = pnand %p3341_p12, %p3539_p4  ;;  %p3347_p3 = por %p3346_p2, %p3345_p1 }
 0x22c   : > { %5601 = vst [vmem:[#allocation26_spill] sm:$0xff] %v4863_v53  ;;  %3099 = vmatmul.msk.f32.gmra.mxu2 %vm517_vm0, %v3323_v45  ;;  %3131 = vmatmul.msk.f32.gmra.mxu3 %vm517_vm0, %v3323_v45  ;;  %v4896_v53 = vpop.f32.mrf.mxu0 }
 0x22d   : > { %5602 = vst [vmem:[#allocation27_spill] sm:$0xff] %v4865_v0  ;;  %v5609_v0 = vld [vmem:[#allocation8_spill] sm:$0xff]  ;;  %p3343_p0 = pneg %p3342_p13 }
 0x22e   : > { %5603 = vst [vmem:[#allocation45_spill] sm:$0xff] %v4867_v32 }
 0x22f   : > { %5604 = vst [vmem:[#allocation46_spill] sm:$0xff] %v4869_v39  ;;  %v981_v59 = vpop.f32.mrf.mxu2  ;;  %v1046_v5 = vpop.f32.mrf.mxu3  ;;  %p3348_p5 = pnand %p3347_p3, %p3343_p0 }
 0x230   : > { %v1782_v38 = vmul.f32 %v4770_v14, %v981_v59  ;;  %v1830_v47 = vmul.f32 %v4765_v16, %v981_v59  ;;  %v2102_v61 = vmul.f32 %v4770_v14, %v1046_v5  ;;  %v2150_v3 = vmul.f32 %v4765_v16, %v1046_v5  ;;  %v4905_v16 = vpop.f32.mrf.mxu1 }
 0x231   : > { %v1863_v14 = vmul.f32 %v4460_v48, %v4795_v22  ;;  %v1911_v59 = vmul.f32 %v4458_v15, %v4795_v22  ;;  %v2183_v5 = vmul.f32 %v4464_v25, %v4805_v57 }
 0x232   : > { %v4888_v45 = vsub.f32 %v1766_v28, %v1782_v38  ;;  %v4890_v32 = vadd.f32 %v1830_v47, %v1814_v4  ;;  %v4892_v39 = vsub.f32 %v2086_v60, %v2102_v61  ;;  %v4894_v2 = vadd.f32 %v2150_v3, %v2134_v50 }
 0x233   : > { %v2231_v28 = vmul.f32 %v4462_v58, %v4805_v57 }
 0x234   : > { %5607 = vst [vmem:[#allocation28_spill] sm:$0xff] %v4892_v39  ;;  %3196 = vmatmul.msk.f32.vlgmr.msrb.gmra.mxu2 %vm740_vm1, %v5609_v0  ;;  %3212 = vmatmul.msk.f32.vlgmr.msrb.gmra.mxu3 %vm740_vm1, %v5609_v0  ;;  %v5610_v39 = vld [vmem:[#allocation9_spill] sm:$0xff] }
 0x235   : > { %5608 = vst [vmem:[#allocation29_spill] sm:$0xff] %v4894_v2 }
 0x237   : > { %v1508_v4 = vpop.f32.mrf.mxu2  ;;  %v1573_v34 = vpop.f32.mrf.mxu3 }
 0x238   : > { %v1847_v60 = vmul.f32 %v4458_v15, %v1508_v4  ;;  %v1895_v0 = vmul.f32 %v4460_v48, %v1508_v4  ;;  %v2167_v50 = vmul.f32 %v4462_v58, %v1573_v34  ;;  %v2215_v38 = vmul.f32 %v4464_v25, %v1573_v34  ;;  %v4929_v15 = vpop.f32.mrf.mxu0  ;;  %v4941_v34 = vpop.f32.mrf.mxu1 }
 0x239   : > { %v1864_v48 = vmul.f32 %v4495_v8, %v4830_v10 }
 0x23a   : > { %v2199_v47 = vadd.f32 %v2183_v5, %v2167_v50  ;;  %v2247_v61 = vsub.f32 %v2215_v38, %v2231_v28  ;;  %v1879_v22 = vadd.f32 %v1863_v14, %v1847_v60  ;;  %v1927_v3 = vsub.f32 %v1895_v0, %v1911_v59 }
 0x23b   : > { %v2184_v14 = vmul.f32 %v4499_v54, %v4836_v55  ;;  %v2232_v59 = vmul.f32 %v4497_v19, %v4836_v55 }
 0x23c   : > { %3197 = vmatmul.msk.f32.gmra.mxu2 %vm740_vm1, %v5610_v39  ;;  %3213 = vmatmul.msk.f32.gmra.mxu3 %vm740_vm1, %v5610_v39  ;;  %v2295_v57 = vmul.f32 %v2199_v47, %v2199_v47  ;;  %v2311_v2 = vmul.f32 %v2247_v61, %v2247_v61  ;;  %2263 = vst [vmem:[%s4924_s15 + $0x8] sm:$0xff] %v2199_v47 }
 0x23d   : > { %v1975_v58 = vmul.f32 %v1879_v22, %v1879_v22  ;;  %2279 = vst [vmem:[%s4931_s0 + $0x8] sm:$0xff] %v2247_v61  ;;  %v1991_v25 = vmul.f32 %v1927_v3, %v1927_v3  ;;  %v1912_v39 = vmul.f32 %v4493_v46, %v4830_v10 }
 0x23e   : > { %v2327_v4 = vadd.f32 %v2311_v2, %v2295_v57  ;;  %1943 = vst [vmem:[%s4924_s15] sm:$0xff] %v1879_v22  ;;  %v5611_v22 = vld [vmem:[#allocation10_spill] sm:$0xff]  ;;  %v1913_v57 = vmul.f32 %v4525_v17, %v4861_v63 }
 0x23f   : > { %v1511_v5 = vpop.f32.mrf.mxu2  ;;  %v1576_v28 = vpop.f32.mrf.mxu3  ;;  %1959 = vst [vmem:[%s4931_s0] sm:$0xff] %v1927_v3  ;;  %v2007_v38 = vadd.f32 %v1991_v25, %v1975_v58  ;;  %v2185_v58 = vmul.f32 %v4531_v21, %v4871_v31 }
 0x240   : > { %v1848_v60 = vmul.f32 %v4493_v46, %v1511_v5  ;;  %v1896_v0 = vmul.f32 %v4495_v8, %v1511_v5  ;;  %v2168_v50 = vmul.f32 %v4497_v19, %v1576_v28  ;;  %v2216_v10 = vmul.f32 %v4499_v54, %v1576_v28  ;;  %2343 = vadd.xlane.f32.xlu1 %v2327_v4 }
 0x241   : > { %2023 = vadd.xlane.f32.xlu0 %v2007_v38  ;;  %v1865_v54 = vmul.f32 %v4527_v24, %v4861_v63 }
 0x242   : > { %v2200_v55 = vadd.f32 %v2184_v14, %v2168_v50  ;;  %v2248_v47 = vsub.f32 %v2216_v10, %v2232_v59  ;;  %v1880_v61 = vadd.f32 %v1864_v48, %v1848_v60  ;;  %v1928_v2 = vsub.f32 %v1896_v0, %v1912_v39  ;;  %v4963_v59 = vpop.f32.mrf.mxu0 }
 0x243   : > { %v2233_v48 = vmul.f32 %v4529_v33, %v4871_v31  ;;  %v4970_v31 = vpop.f32.mrf.mxu1 }
 0x244   : > { %3198 = vmatmul.msk.f32.gmra.mxu2 %vm740_vm1, %v5611_v22  ;;  %3214 = vmatmul.msk.f32.gmra.mxu3 %vm740_vm1, %v5611_v22  ;;  %v2296_v46 = vmul.f32 %v2200_v55, %v2200_v55  ;;  %v2312_v8 = vmul.f32 %v2248_v47, %v2248_v47  ;;  %2264 = vst [vmem:[%s4924_s15 + $0x18] sm:$0xff] %v2200_v55  ;;  %v5612_v55 = vld [vmem:[#allocation11_spill] sm:$0xff] }
 0x245   : > { %v1976_v19 = vmul.f32 %v1880_v61, %v1880_v61  ;;  %2280 = vst [vmem:[%s4931_s0 + $0x18] sm:$0xff] %v2248_v47  ;;  %v1992_v3 = vmul.f32 %v1928_v2, %v1928_v2  ;;  %v2234_v22 = vmul.f32 %v4561_v23, %v4905_v16 }
 0x246   : > { %v2328_v14 = vadd.f32 %v2312_v8, %v2296_v46  ;;  %1944 = vst [vmem:[%s4924_s15 + $0x10] sm:$0xff] %v1880_v61  ;;  %v1914_v61 = vmul.f32 %v4557_v9, %v4896_v53 }
 0x247   : > { %v1514_v25 = vpop.f32.mrf.mxu2  ;;  %v1579_v39 = vpop.f32.mrf.mxu3  ;;  %1960 = vst [vmem:[%s4931_s0 + $0x10] sm:$0xff] %v1928_v2  ;;  %v2008_v60 = vadd.f32 %v1992_v3, %v1976_v19  ;;  %v2186_v2 = vmul.f32 %v4563_v27, %v4905_v16 }
 0x248   : > { %v1849_v5 = vmul.f32 %v4525_v17, %v1514_v25  ;;  %v1897_v28 = vmul.f32 %v4527_v24, %v1514_v25  ;;  %v2169_v4 = vmul.f32 %v4529_v33, %v1579_v39  ;;  %v2217_v63 = vmul.f32 %v4531_v21, %v1579_v39  ;;  %2345 = vadd.xlane.f32.xlu2 %v2328_v14 }
 0x249   : > { %2025 = vadd.xlane.f32.xlu0 %v2008_v60  ;;  %v1866_v21 = vmul.f32 %v4559_v40, %v4896_v53  ;;  %v2187_v60 = vmul.f32 %v4593_v26, %v4941_v34 }
 0x24a   : > { %v2201_v0 = vadd.f32 %v2185_v58, %v2169_v4  ;;  %v2249_v50 = vsub.f32 %v2217_v63, %v2233_v48  ;;  %v1881_v10 = vadd.f32 %v1865_v54, %v1849_v5  ;;  %v1929_v38 = vsub.f32 %v1897_v28, %v1913_v57  ;;  %v4992_v48 = vpop.f32.mrf.mxu0 }
 0x24b   : > { %v4994_v5 = vpop.f32.mrf.mxu1  ;;  %v1867_v28 = vmul.f32 %v4589_v43, %v4929_v15  ;;  %v1915_v63 = vmul.f32 %v4587_v11, %v4929_v15 }
 0x24c   : > { %3199 = vmatmul.msk.f32.gmra.mxu2 %vm740_vm1, %v5612_v55  ;;  %3215 = vmatmul.msk.f32.gmra.mxu3 %vm740_vm1, %v5612_v55  ;;  %v2297_v17 = vmul.f32 %v2201_v0, %v2201_v0  ;;  %v2313_v24 = vmul.f32 %v2249_v50, %v2249_v50  ;;  %2265 = vst [vmem:[%s4924_s15 + $0x28] sm:$0xff] %v2201_v0 }
 0x24d   : > { %v1977_v33 = vmul.f32 %v1881_v10, %v1881_v10  ;;  %2281 = vst [vmem:[%s4931_s0 + $0x28] sm:$0xff] %v2249_v50  ;;  %v1993_v47 = vmul.f32 %v1929_v38, %v1929_v38  ;;  %v2235_v0 = vmul.f32 %v4591_v37, %v4941_v34 }
 0x24e   : > { %v2329_v19 = vadd.f32 %v2313_v24, %v2297_v17  ;;  %1945 = vst [vmem:[%s4924_s15 + $0x20] sm:$0xff] %v1881_v10 }
 0x24f   : > { %v1517_v46 = vpop.f32.mrf.mxu2  ;;  %v1582_v8 = vpop.f32.mrf.mxu3  ;;  %1961 = vst [vmem:[%s4931_s0 + $0x20] sm:$0xff] %v1929_v38  ;;  %v2009_v53 = vadd.f32 %v1993_v47, %v1977_v33 }
 0x250   : > { %v1850_v54 = vmul.f32 %v4557_v9, %v1517_v46  ;;  %v1898_v3 = vmul.f32 %v4559_v40, %v1517_v46  ;;  %v2170_v57 = vmul.f32 %v4561_v23, %v1582_v8  ;;  %v2218_v58 = vmul.f32 %v4563_v27, %v1582_v8  ;;  %v5613_v9 = vld [vmem:[#allocation12_spill] sm:$0xff] }
 0x251   : > { %2347 = vadd.xlane.f32.xlu0 %v2329_v19  ;;  %2027 = vadd.xlane.f32.xlu1 %v2009_v53  ;;  %v1916_v19 = vmul.f32 %v4619_v51, %v4963_v59 }
 0x252   : > { %v1882_v25 = vadd.f32 %v1866_v21, %v1850_v54  ;;  %v1930_v16 = vsub.f32 %v1898_v3, %v1914_v61  ;;  %v2202_v39 = vadd.f32 %v2186_v2, %v2170_v57  ;;  %v2250_v14 = vsub.f32 %v2218_v58, %v2234_v22  ;;  %v5016_v2 = vpop.f32.mrf.mxu0  ;;  %v5614_v22 = vld [vmem:[#allocation13_spill] sm:$0xff] }
 0x253   : > { %v5025_v46 = vpop.f32.mrf.mxu1  ;;  %v2188_v54 = vmul.f32 %v4625_v35, %v4970_v31  ;;  %v2236_v3 = vmul.f32 %v4623_v18, %v4970_v31 }
 0x254   : > { %3200 = vmatmul.msk.f32.gmra.mxu2 %vm740_vm1, %v5613_v9  ;;  %3216 = vmatmul.msk.f32.gmra.mxu3 %vm740_vm1, %v5613_v9  ;;  %v1978_v40 = vmul.f32 %v1882_v25, %v1882_v25  ;;  %v1994_v23 = vmul.f32 %v1930_v16, %v1930_v16  ;;  %1946 = vst [vmem:[%s4924_s15 + $0x30] sm:$0xff] %v1882_v25 }
 0x255   : > { %v2298_v27 = vmul.f32 %v2202_v39, %v2202_v39  ;;  %1962 = vst [vmem:[%s4931_s0 + $0x30] sm:$0xff] %v1930_v16  ;;  %v2314_v4 = vmul.f32 %v2250_v14, %v2250_v14 }
 0x256   : > { %v2010_v38 = vadd.f32 %v1994_v23, %v1978_v40  ;;  %2266 = vst [vmem:[%s4924_s15 + $0x38] sm:$0xff] %v2202_v39 }
 0x257   : > { %v1520_v50 = vpop.f32.mrf.mxu2  ;;  %v1585_v10 = vpop.f32.mrf.mxu3  ;;  %2282 = vst [vmem:[%s4931_s0 + $0x38] sm:$0xff] %v2250_v14  ;;  %v2330_v15 = vadd.f32 %v2314_v4, %v2298_v27  ;;  %v5615_v27 = vld [vmem:[#allocation14_spill] sm:$0xff] }
 0x258   : > { %v1851_v55 = vmul.f32 %v4587_v11, %v1520_v50  ;;  %v1899_v17 = vmul.f32 %v4589_v43, %v1520_v50  ;;  %v2171_v24 = vmul.f32 %v4591_v37, %v1585_v10  ;;  %v2219_v33 = vmul.f32 %v4593_v26, %v1585_v10  ;;  %v5617_v50 = vld [vmem:[#allocation30_spill] sm:$0xff] }
 0x259   : > { %2029 = vadd.xlane.f32.xlu1 %v2010_v38  ;;  %v1868_v26 = vmul.f32 %v4621_v29, %v4963_v59  ;;  %v2237_v10 = vmul.f32 %v5617_v50, %v4994_v5 }
 0x25a   : > { %v1883_v21 = vadd.f32 %v1867_v28, %v1851_v55  ;;  %v1931_v47 = vsub.f32 %v1899_v17, %v1915_v63  ;;  %v2203_v61 = vadd.f32 %v2187_v60, %v2171_v24  ;;  %v2251_v34 = vsub.f32 %v2219_v33, %v2235_v0  ;;  %v5047_v28 = vpop.f32.mrf.mxu0  ;;  %v5616_v60 = vld [vmem:[#allocation31_spill] sm:$0xff] }
 0x25b   : > { %v1917_v63 = vmul.f32 %v4650_v30, %v4992_v48  ;;  %v2189_v0 = vmul.f32 %v5616_v60, %v4994_v5  ;;  %v5057_v24 = vpop.f32.mrf.mxu1 }
 0x25c   : > { %3201 = vmatmul.msk.f32.gmra.mxu2 %vm740_vm1, %v5614_v22  ;;  %3217 = vmatmul.msk.f32.gmra.mxu3 %vm740_vm1, %v5614_v22  ;;  %v1979_v11 = vmul.f32 %v1883_v21, %v1883_v21  ;;  %v1995_v43 = vmul.f32 %v1931_v47, %v1931_v47  ;;  %1947 = vst [vmem:[%s4924_s15 + $0x40] sm:$0xff] %v1883_v21 }
 0x25d   : > { %v2299_v37 = vmul.f32 %v2203_v61, %v2203_v61  ;;  %1963 = vst [vmem:[%s4931_s0 + $0x40] sm:$0xff] %v1931_v47  ;;  %v2315_v8 = vmul.f32 %v2251_v34, %v2251_v34 }
 0x25e   : > { %v2011_v53 = vadd.f32 %v1995_v43, %v1979_v11  ;;  %2267 = vst [vmem:[%s4924_s15 + $0x48] sm:$0xff] %v2203_v61  ;;  %v5618_v11 = vld [vmem:[#allocation15_spill] sm:$0xff] }
 0x25f   : > { %v1523_v57 = vpop.f32.mrf.mxu2  ;;  %v1588_v58 = vpop.f32.mrf.mxu3  ;;  %2283 = vst [vmem:[%s4931_s0 + $0x48] sm:$0xff] %v2251_v34  ;;  %v2331_v59 = vadd.f32 %v2315_v8, %v2299_v37  ;;  %v1870_v8 = vmul.f32 %v4679_v6, %v5016_v2 }
 0x260   : > { %v1852_v25 = vmul.f32 %v4619_v51, %v1523_v57  ;;  %v1900_v16 = vmul.f32 %v4621_v29, %v1523_v57  ;;  %v2172_v39 = vmul.f32 %v4623_v18, %v1588_v58  ;;  %v2220_v14 = vmul.f32 %v4625_v35, %v1588_v58  ;;  %2031 = vadd.xlane.f32.xlu2 %v2011_v53 }
 0x261   : > { %2349 = vadd.xlane.f32.xlu1 %v2330_v15  ;;  %v1869_v35 = vmul.f32 %v4652_v12, %v4992_v48  ;;  %v2190_v57 = vmul.f32 %v4683_v7, %v5025_v46 }
 0x262   : > { %v2204_v9 = vadd.f32 %v2188_v54, %v2172_v39  ;;  %v2252_v40 = vsub.f32 %v2220_v14, %v2236_v3  ;;  %v1884_v31 = vadd.f32 %v1868_v26, %v1852_v25  ;;  %v1932_v23 = vsub.f32 %v1900_v16, %v1916_v19  ;;  %v1665_v58 = vpop.f32.mrf.mxu0  ;;  %v5619_v39 = vld [vmem:[#allocation32_spill] sm:$0xff] }
 0x263   : > { %v1918_v3 = vmul.f32 %v4677_v1, %v5016_v2  ;;  %v2238_v14 = vmul.f32 %v5619_v39, %v5025_v46  ;;  %v1730_v2 = vpop.f32.mrf.mxu1 }
 0x264   : > { %3202 = vmatmul.msk.f32.gmra.mxu2 %vm740_vm1, %v5615_v27  ;;  %3218 = vmatmul.msk.f32.gmra.mxu3 %vm740_vm1, %v5615_v27  ;;  %v2300_v51 = vmul.f32 %v2204_v9, %v2204_v9  ;;  %v2316_v29 = vmul.f32 %v2252_v40, %v2252_v40  ;;  %2268 = vst [vmem:[%s4924_s15 + $0x58] sm:$0xff] %v2204_v9 }
 0x265   : > { %v1980_v18 = vmul.f32 %v1884_v31, %v1884_v31  ;;  %2284 = vst [vmem:[%s4931_s0 + $0x58] sm:$0xff] %v2252_v40  ;;  %v1996_v4 = vmul.f32 %v1932_v23, %v1932_v23 }
 0x266   : > { %v2332_v17 = vadd.f32 %v2316_v29, %v2300_v51  ;;  %1948 = vst [vmem:[%s4924_s15 + $0x50] sm:$0xff] %v1884_v31 }
 0x267   : > { %v1526_v38 = vpop.f32.mrf.mxu2  ;;  %v1591_v55 = vpop.f32.mrf.mxu3  ;;  %1964 = vst [vmem:[%s4931_s0 + $0x50] sm:$0xff] %v1932_v23  ;;  %v2012_v5 = vadd.f32 %v1996_v4, %v1980_v18  ;;  %v5620_v23 = vld [vmem:[#allocation16_spill] sm:$0xff]  ;;  %v1871_v4 = vmul.f32 %v4706_v62, %v5047_v28 }
 0x268   : > { %v1853_v33 = vmul.f32 %v4650_v30, %v1526_v38  ;;  %v1901_v15 = vmul.f32 %v4652_v12, %v1526_v38  ;;  %v2173_v21 = vmul.f32 %v5617_v50, %v1591_v55  ;;  %v2221_v48 = vmul.f32 %v5616_v60, %v1591_v55  ;;  %2353 = vadd.xlane.f32.xlu0 %v2332_v17  ;;  %v5622_v55 = vld [vmem:[#allocation33_spill] sm:$0xff] }
 0x269   : > { %2351 = vadd.xlane.f32.xlu2 %v2331_v59  ;;  %v2239_v17 = vmul.f32 %v5622_v55, %v5057_v24 }
 0x26a   : > { %v2205_v47 = vadd.f32 %v2189_v0, %v2173_v21  ;;  %v2253_v61 = vsub.f32 %v2221_v48, %v2237_v10  ;;  %v1885_v34 = vadd.f32 %v1869_v35, %v1853_v33  ;;  %v1933_v22 = vsub.f32 %v1901_v15, %v1917_v63  ;;  %v5621_v10 = vld [vmem:[#allocation34_spill] sm:$0xff] }
 0x26b   : > { %v1919_v63 = vmul.f32 %v4704_v56, %v5047_v28  ;;  %v2191_v38 = vmul.f32 %v5621_v10, %v5057_v24  ;;  %v1668_v28 = vpop.f32.mrf.mxu0 }
 0x26c   : > { %3203 = vmatmul.msk.f32.gmra.mxu2 %vm740_vm1, %v5618_v11  ;;  %v2301_v30 = vmul.f32 %v2205_v47, %v2205_v47  ;;  %v2317_v12 = vmul.f32 %v2253_v61, %v2253_v61  ;;  %2269 = vst [vmem:[%s4924_s15 + $0x68] sm:$0xff] %v2205_v47  ;;  %v1981_v43 = vmul.f32 %v1885_v34, %v1885_v34  ;;  %v5623_v47 = vld [vmem:[#allocation17_spill] sm:$0xff] }
 0x26d   : > { %3219 = vmatmul.msk.f32.gmra.mxu3 %vm740_vm1, %v5618_v11  ;;  %2285 = vst [vmem:[%s4931_s0 + $0x68] sm:$0xff] %v2253_v61  ;;  %v1997_v37 = vmul.f32 %v1933_v22, %v1933_v22 }
 0x26e   : > { %v2333_v26 = vadd.f32 %v2317_v12, %v2301_v30  ;;  %1949 = vst [vmem:[%s4924_s15 + $0x60] sm:$0xff] %v1885_v34  ;;  %v1872_v30 = vmul.f32 %v4734_v44, %v1665_v58 }
 0x26f   : > { %v1529_v19 = vpop.f32.mrf.mxu2  ;;  %v2013_v54 = vadd.f32 %v1997_v37, %v1981_v43  ;;  %1965 = vst [vmem:[%s4931_s0 + $0x60] sm:$0xff] %v1933_v22  ;;  %v1594_v16 = vpop.f32.mrf.mxu3  ;;  %v1920_v37 = vmul.f32 %v4732_v42, %v1665_v58 }
 0x270   : > { %v1854_v53 = vmul.f32 %v4677_v1, %v1529_v19  ;;  %v1902_v25 = vmul.f32 %v4679_v6, %v1529_v19  ;;  %2355 = vadd.xlane.f32.xlu1 %v2333_v26  ;;  %v2174_v59 = vmul.f32 %v5619_v39, %v1594_v16  ;;  %v2222_v9 = vmul.f32 %v4683_v7, %v1594_v16  ;;  %v5624_v26 = vld [vmem:[#allocation36_spill] sm:$0xff] }
 0x271   : > { %2033 = vadd.xlane.f32.xlu2 %v2012_v5  ;;  %2035 = vadd.xlane.f32.xlu0 %v2013_v54  ;;  %v1733_v5 = vpop.f32.mrf.mxu1 }
 0x272   : > { %v1886_v40 = vadd.f32 %v1870_v8, %v1854_v53  ;;  %v1934_v1 = vsub.f32 %v1902_v25, %v1918_v3  ;;  %v2206_v31 = vadd.f32 %v2190_v57, %v2174_v59  ;;  %v2254_v6 = vsub.f32 %v2222_v9, %v2238_v14  ;;  %v5625_v57 = vld [vmem:[#allocation35_spill] sm:$0xff] }
 0x273   : > { %v2192_v8 = vmul.f32 %v5624_v26, %v1730_v2  ;;  %v2240_v53 = vmul.f32 %v5625_v57, %v1730_v2  ;;  %v1671_v9 = vpop.f32.mrf.mxu0 }
 0x274   : > { %3204 = vmatmul.msk.f32.gmra.mxu2 %vm740_vm1, %v5620_v23  ;;  %v1982_v27 = vmul.f32 %v1886_v40, %v1886_v40  ;;  %v1998_v51 = vmul.f32 %v1934_v1, %v1934_v1  ;;  %1950 = vst [vmem:[%s4924_s15 + $0x70] sm:$0xff] %v1886_v40  ;;  %v2302_v46 = vmul.f32 %v2206_v31, %v2206_v31 }
 0x275   : > { %3220 = vmatmul.msk.f32.gmra.mxu3 %vm740_vm1, %v5620_v23  ;;  %v2318_v7 = vmul.f32 %v2254_v6, %v2254_v6  ;;  %2270 = vst [vmem:[%s4924_s15 + $0x78] sm:$0xff] %v2206_v31  ;;  %v1873_v23 = vmul.f32 %v4759_v36, %v1668_v28 }
 0x276   : > { %2286 = vst [vmem:[%s4931_s0 + $0x78] sm:$0xff] %v2254_v6  ;;  %v2014_v29 = vadd.f32 %v1998_v51, %v1982_v27 }
 0x277   : > { %v1532_v18 = vpop.f32.mrf.mxu2  ;;  %v2334_v35 = vadd.f32 %v2318_v7, %v2302_v46  ;;  %1966 = vst [vmem:[%s4931_s0 + $0x70] sm:$0xff] %v1934_v1  ;;  %v1597_v50 = vpop.f32.mrf.mxu3  ;;  %v1921_v46 = vmul.f32 %v4757_v41, %v1668_v28  ;;  %v2193_v7 = vmul.f32 %v4763_v20, %v1733_v5 }
 0x278   : > { %v1855_v60 = vmul.f32 %v4704_v56, %v1532_v18  ;;  %v1903_v0 = vmul.f32 %v4706_v62, %v1532_v18  ;;  %2037 = vadd.xlane.f32.xlu1 %v2014_v29  ;;  %v2175_v33 = vmul.f32 %v5622_v55, %v1597_v50  ;;  %v2223_v15 = vmul.f32 %v5621_v10, %v1597_v50 }
 0x279   : > { %2357 = vadd.xlane.f32.xlu2 %v2334_v35  ;;  %v1736_v31 = vpop.f32.mrf.mxu1 }
 0x27a   : > { %v1887_v21 = vadd.f32 %v1871_v4, %v1855_v60  ;;  %v1935_v56 = vsub.f32 %v1903_v0, %v1919_v63  ;;  %v2207_v62 = vadd.f32 %v2191_v38, %v2175_v33  ;;  %v2255_v48 = vsub.f32 %v2223_v15, %v2239_v17  ;;  %v5627_v4 = vld [vmem:[#allocation37_spill] sm:$0xff] }
 0x27b   : > { %v2241_v63 = vmul.f32 %v5627_v4, %v1733_v5  ;;  %v1674_v15 = vpop.f32.mrf.mxu0 }
 0x27c   : > { %1951 = vst [vmem:[%s4924_s15 + $0x80] sm:$0xff] %v1887_v21  ;;  %3205 = vmatmul.msk.f32.gmra.mxu2 %vm740_vm1, %v5623_v47  ;;  %v1983_v61 = vmul.f32 %v1887_v21, %v1887_v21  ;;  %v1999_v34 = vmul.f32 %v1935_v56, %v1935_v56  ;;  %v2303_v24 = vmul.f32 %v2207_v62, %v2207_v62 }
 0x27d   : > { %1967 = vst [vmem:[%s4931_s0 + $0x80] sm:$0xff] %v1935_v56  ;;  %3221 = vmatmul.msk.f32.gmra.mxu3 %vm740_vm1, %v5623_v47  ;;  %v2319_v22 = vmul.f32 %v2255_v48, %v2255_v48  ;;  %v1874_v21 = vmul.f32 %v4786_v52, %v1671_v9  ;;  %v5629_v56 = vld [vmem:[#allocation38_spill] sm:$0xff]  ;;  %v5631_v47 = vld [vmem:[#allocation40_spill] sm:$0xff] }
 0x27e   : > { %2271 = vst [vmem:[%s4924_s15 + $0x88] sm:$0xff] %v2207_v62  ;;  %v2015_v11 = vadd.f32 %v1999_v34, %v1983_v61  ;;  %v1922_v62 = vmul.f32 %v5629_v56, %v1671_v9  ;;  %v2194_v61 = vmul.f32 %v5631_v47, %v1736_v31  ;;  %v5632_v34 = vld [vmem:[#allocation39_spill] sm:$0xff]  ;;  %v5634_v9 = vld [vmem:[#allocation41_spill] sm:$0xff] }
 0x27f   : > { %2287 = vst [vmem:[%s4931_s0 + $0x88] sm:$0xff] %v2255_v48  ;;  %v1535_v12 = vpop.f32.mrf.mxu2  ;;  %v2335_v43 = vadd.f32 %v2319_v22, %v2303_v24  ;;  %v1600_v3 = vpop.f32.mrf.mxu3  ;;  %v2242_v24 = vmul.f32 %v5632_v34, %v1736_v31 }
 0x280   : > { %v1856_v19 = vmul.f32 %v4732_v42, %v1535_v12  ;;  %v1904_v54 = vmul.f32 %v4734_v44, %v1535_v12  ;;  %v2176_v25 = vmul.f32 %v5625_v57, %v1600_v3  ;;  %v2224_v16 = vmul.f32 %v5624_v26, %v1600_v3  ;;  %v5626_v42 = vld [vmem:[#allocation18_spill] sm:$0xff] }
 0x281   : > { %2359 = vadd.xlane.f32.xlu0 %v2335_v43  ;;  %2039 = vadd.xlane.f32.xlu2 %v2015_v11  ;;  %v1739_v22 = vpop.f32.mrf.mxu1 }
 0x282   : > { %v1888_v39 = vadd.f32 %v1872_v30, %v1856_v19  ;;  %v1936_v14 = vsub.f32 %v1904_v54, %v1920_v37  ;;  %v2208_v58 = vadd.f32 %v2192_v8, %v2176_v25  ;;  %v2256_v59 = vsub.f32 %v2224_v16, %v2240_v53 }
 0x283   : > { %v3436_v19 = vmov 0.0  }
 0x284   : > { %1952 = vst [vmem:[%s4924_s15 + $0x90] sm:$0xff] %v1888_v39  ;;  %3206 = vmatmul.msk.f32.gmra.mxu2 %vm740_vm1, %v5626_v42  ;;  %v1984_v44 = vmul.f32 %v1888_v39, %v1888_v39  ;;  %v2000_v40 = vmul.f32 %v1936_v14, %v1936_v14  ;;  %v2304_v2 = vmul.f32 %v2208_v58, %v2208_v58 }
 0x285   : > { %1968 = vst [vmem:[%s4931_s0 + $0x90] sm:$0xff] %v1936_v14  ;;  %3222 = vmatmul.msk.f32.gmra.mxu3 %vm740_vm1, %v5626_v42  ;;  %v2320_v1 = vmul.f32 %v2256_v59, %v2256_v59  ;;  %v1875_v14 = vmul.f32 %v4813_v13, %v1674_v15  ;;  %v1923_v42 = vmul.f32 %v5634_v9, %v1674_v15 }
 0x286   : > { %2272 = vst [vmem:[%s4924_s15 + $0x98] sm:$0xff] %v2208_v58  ;;  %v2016_v6 = vadd.f32 %v2000_v40, %v1984_v44  ;;  %v5635_v44 = vld [vmem:[#allocation43_spill] sm:$0xff] }
 0x287   : > { %2288 = vst [vmem:[%s4931_s0 + $0x98] sm:$0xff] %v2256_v59  ;;  %v1538_v27 = vpop.f32.mrf.mxu2  ;;  %v2336_v51 = vadd.f32 %v2320_v1, %v2304_v2  ;;  %v1603_v35 = vpop.f32.mrf.mxu3  ;;  %v2195_v40 = vmul.f32 %v5635_v44, %v1739_v22 }
 0x288   : > { %v1857_v29 = vmul.f32 %v4757_v41, %v1538_v27  ;;  %v1905_v18 = vmul.f32 %v4759_v36, %v1538_v27  ;;  %v2177_v60 = vmul.f32 %v5627_v4, %v1603_v35  ;;  %v2225_v0 = vmul.f32 %v4763_v20, %v1603_v35  ;;  %v5628_v41 = vld [vmem:[#allocation19_spill] sm:$0xff]  ;;  %2396 = vst.msk [vmem:[%s5150_s28] sm:$0xff] %vm2395_vm2, %v3436_v19  ;;  %v1677_v2 = vpop.f32.mrf.mxu0  ;;  %v5637_v4 = vld [vmem:[#allocation21_spill] sm:$0xff] }
 0x289   : > { %2361 = vadd.xlane.f32.xlu1 %v2336_v51  ;;  %2041 = vadd.xlane.f32.xlu0 %v2016_v6  ;;  %2397 = vst.msk [vmem:[%s5150_s28 + $0x8] sm:$0xff] %vm2395_vm2, %v3436_v19 }
 0x28a   : > { %v1889_v50 = vadd.f32 %v1873_v23, %v1857_v29  ;;  %v1937_v10 = vsub.f32 %v1905_v18, %v1921_v46  ;;  %v2209_v38 = vadd.f32 %v2193_v7, %v2177_v60  ;;  %v2257_v55 = vsub.f32 %v2225_v0, %v2241_v63  ;;  %2398 = vst.msk [vmem:[%s5150_s28 + $0x10] sm:$0xff] %vm2395_vm2, %v3436_v19  ;;  %v5636_v23 = vld [vmem:[#allocation42_spill] sm:$0xff]  ;;  %v1742_v7 = vpop.f32.mrf.mxu1 }
 0x28b   : > { %v2243_v27 = vmul.f32 %v5636_v23, %v1739_v22  ;;  %2399 = vst.msk [vmem:[%s5150_s28 + $0x18] sm:$0xff] %vm2395_vm2, %v3436_v19 }
 0x28c   : > { %1953 = vst [vmem:[%s4924_s15 + $0xa0] sm:$0xff] %v1889_v50  ;;  %3207 = vmatmul.msk.f32.gmra.mxu2 %vm740_vm1, %v5628_v41  ;;  %v1985_v36 = vmul.f32 %v1889_v50, %v1889_v50  ;;  %v2001_v17 = vmul.f32 %v1937_v10, %v1937_v10  ;;  %v2305_v20 = vmul.f32 %v2209_v38, %v2209_v38 }
 0x28d   : > { %1969 = vst [vmem:[%s4931_s0 + $0xa0] sm:$0xff] %v1937_v10  ;;  %3223 = vmatmul.msk.f32.gmra.mxu3 %vm740_vm1, %v5628_v41  ;;  %v2321_v33 = vmul.f32 %v2257_v55, %v2257_v55 }
 0x28e   : > { %2273 = vst [vmem:[%s4924_s15 + $0xa8] sm:$0xff] %v2209_v38  ;;  %v2017_v28 = vadd.f32 %v2001_v17, %v1985_v36  ;;  %v1876_v38 = vmul.f32 %v4840_v49, %v1677_v2  ;;  %v5638_v36 = vld [vmem:[#allocation24_spill] sm:$0xff] }
 0x28f   : > { %2289 = vst [vmem:[%s4931_s0 + $0xa8] sm:$0xff] %v2257_v55  ;;  %v1541_v48 = vpop.f32.mrf.mxu2  ;;  %v2337_v5 = vadd.f32 %v2321_v33, %v2305_v20  ;;  %v1606_v12 = vpop.f32.mrf.mxu3  ;;  %v1924_v17 = vmul.f32 %v5638_v36, %v1677_v2  ;;  %v5639_v20 = vld [vmem:[#allocation44_spill] sm:$0xff] }
 0x290   : > { %v1858_v11 = vmul.f32 %v5629_v56, %v1541_v48  ;;  %v1906_v30 = vmul.f32 %v4786_v52, %v1541_v48  ;;  %v2178_v43 = vmul.f32 %v5632_v34, %v1606_v12  ;;  %v2226_v37 = vmul.f32 %v5631_v47, %v1606_v12  ;;  %v5633_v52 = vld [vmem:[#allocation20_spill] sm:$0xff]  ;;  %2400 = vst.msk [vmem:[%s5150_s28 + $0x20] sm:$0xff] %vm2395_vm2, %v3436_v19  ;;  %v5640_v56 = vld [vmem:[#allocation25_spill] sm:$0xff]  ;;  %v1680_v47 = vpop.f32.mrf.mxu0 }
 0x291   : > { %2363 = vadd.xlane.f32.xlu2 %v2337_v5  ;;  %2043 = vadd.xlane.f32.xlu1 %v2017_v28  ;;  %2401 = vst.msk [vmem:[%s5150_s28 + $0x28] sm:$0xff] %vm2395_vm2, %v3436_v19  ;;  %v2196_v33 = vmul.f32 %v5639_v20, %v1742_v7 }
 0x292   : > { %v1890_v26 = vadd.f32 %v1874_v21, %v1858_v11  ;;  %v1938_v8 = vsub.f32 %v1906_v30, %v1922_v62  ;;  %v2210_v54 = vadd.f32 %v2194_v61, %v2178_v43  ;;  %v2258_v3 = vsub.f32 %v2226_v37, %v2242_v24  ;;  %2402 = vst.msk [vmem:[%s5150_s28 + $0x30] sm:$0xff] %vm2395_vm2, %v3436_v19  ;;  %v1745_v22 = vpop.f32.mrf.mxu1  ;;  %v5641_v11 = vld [vmem:[#allocation22_spill] sm:$0xff] }
 0x293   : > { %v2244_v62 = vmul.f32 %v5640_v56, %v1742_v7  ;;  %2403 = vst.msk [vmem:[%s5150_s28 + $0x38] sm:$0xff] %vm2395_vm2, %v3436_v19 }
 0x294   : > { %1954 = vst [vmem:[%s4924_s15 + $0xb0] sm:$0xff] %v1890_v26  ;;  %3208 = vmatmul.msk.f32.gmra.mxu2 %vm740_vm1, %v5633_v52  ;;  %v1986_v57 = vmul.f32 %v1890_v26, %v1890_v26  ;;  %v2002_v53 = vmul.f32 %v1938_v8, %v1938_v8  ;;  %v2306_v25 = vmul.f32 %v2210_v54, %v2210_v54 }
 0x295   : > { %1970 = vst [vmem:[%s4931_s0 + $0xb0] sm:$0xff] %v1938_v8  ;;  %3224 = vmatmul.msk.f32.gmra.mxu3 %vm740_vm1, %v5633_v52  ;;  %v2322_v16 = vmul.f32 %v2258_v3, %v2258_v3  ;;  %v5642_v8 = vld [vmem:[#allocation27_spill] sm:$0xff] }
 0x296   : > { %2274 = vst [vmem:[%s4924_s15 + $0xb8] sm:$0xff] %v2210_v54  ;;  %v2018_v39 = vadd.f32 %v2002_v53, %v1986_v57  ;;  %v1877_v54 = vmul.f32 %v5642_v8, %v1680_v47  ;;  %v5643_v57 = vld [vmem:[#allocation26_spill] sm:$0xff] }
 0x297   : > { %2290 = vst [vmem:[%s4931_s0 + $0xb8] sm:$0xff] %v2258_v3  ;;  %v1544_v58 = vpop.f32.mrf.mxu2  ;;  %v2338_v59 = vadd.f32 %v2322_v16, %v2306_v25  ;;  %v1609_v6 = vpop.f32.mrf.mxu3  ;;  %v1925_v53 = vmul.f32 %v5643_v57, %v1680_v47  ;;  %v5644_v25 = vld [vmem:[#allocation46_spill] sm:$0xff] }
 0x298   : > { %v1859_v1 = vmul.f32 %v5634_v9, %v1544_v58  ;;  %v1907_v31 = vmul.f32 %v4813_v13, %v1544_v58  ;;  %v2179_v51 = vmul.f32 %v5636_v23, %v1609_v6  ;;  %v2227_v46 = vmul.f32 %v5635_v44, %v1609_v6  ;;  %2404 = vst.msk [vmem:[%s5150_s28 + $0x40] sm:$0xff] %vm2395_vm2, %v3436_v19  ;;  %v1683_v6 = vpop.f32.mrf.mxu0  ;;  %v5646_v23 = vld [vmem:[#allocation23_spill] sm:$0xff] }
 0x299   : > { %2365 = vadd.xlane.f32.xlu0 %v2338_v59  ;;  %2045 = vadd.xlane.f32.xlu2 %v2018_v39  ;;  %2405 = vst.msk [vmem:[%s5150_s28 + $0x48] sm:$0xff] %vm2395_vm2, %v3436_v19  ;;  %v2197_v16 = vmul.f32 %v5644_v25, %v1745_v22  ;;  %v5645_v59 = vld [vmem:[#allocation45_spill] sm:$0xff] }
 0x29a   : > { %v1891_v13 = vadd.f32 %v1875_v14, %v1859_v1  ;;  %v1939_v29 = vsub.f32 %v1907_v31, %v1923_v42  ;;  %v2211_v18 = vadd.f32 %v2195_v40, %v2179_v51  ;;  %v2259_v35 = vsub.f32 %v2227_v46, %v2243_v27  ;;  %2406 = vst.msk [vmem:[%s5150_s28 + $0x50] sm:$0xff] %vm2395_vm2, %v3436_v19 }
 0x29b   : > { %v2245_v9 = vmul.f32 %v5645_v59, %v1745_v22  ;;  %2407 = vst.msk [vmem:[%s5150_s28 + $0x58] sm:$0xff] %vm2395_vm2, %v3436_v19 }
 0x29c   : > { %1955 = vst [vmem:[%s4924_s15 + $0xc0] sm:$0xff] %v1891_v13  ;;  %3209 = vmatmul.msk.f32.gmra.mxu2 %vm740_vm1, %v5637_v4  ;;  %v1987_v63 = vmul.f32 %v1891_v13, %v1891_v13  ;;  %v2003_v60 = vmul.f32 %v1939_v29, %v1939_v29  ;;  %v2307_v0 = vmul.f32 %v2211_v18, %v2211_v18  ;;  %v1748_v13 = vpop.f32.mrf.mxu1 }
 0x29d   : > { %1971 = vst [vmem:[%s4931_s0 + $0xc0] sm:$0xff] %v1939_v29  ;;  %3225 = vmatmul.msk.f32.gmra.mxu3 %vm740_vm1, %v5637_v4  ;;  %v2323_v50 = vmul.f32 %v2259_v35, %v2259_v35 }
 0x29e   : > { %2275 = vst [vmem:[%s4924_s15 + $0xc8] sm:$0xff] %v2211_v18  ;;  %v2019_v10 = vadd.f32 %v2003_v60, %v1987_v63  ;;  %v1878_v18 = vmul.f32 %v4890_v32, %v1683_v6  ;;  %v1926_v63 = vmul.f32 %v4888_v45, %v1683_v6 }
 0x29f   : > { %2291 = vst [vmem:[%s4931_s0 + $0xc8] sm:$0xff] %v2259_v35  ;;  %v1547_v55 = vpop.f32.mrf.mxu2  ;;  %v2339_v41 = vadd.f32 %v2323_v50, %v2307_v0  ;;  %v1612_v21 = vpop.f32.mrf.mxu3 }
 0x2a0   : > { %v1860_v15 = vmul.f32 %v5638_v36, %v1547_v55  ;;  %v1908_v28 = vmul.f32 %v4840_v49, %v1547_v55  ;;  %v2180_v48 = vmul.f32 %v5640_v56, %v1612_v21  ;;  %v2228_v5 = vmul.f32 %v5639_v20, %v1612_v21  ;;  %2408 = vst.msk [vmem:[%s5150_s28 + $0x60] sm:$0xff] %vm2395_vm2, %v3436_v19  ;;  %v5648_v55 = vld [vmem:[#allocation28_spill] sm:$0xff] }
 0x2a1   : > { %2367 = vadd.xlane.f32.xlu1 %v2339_v41  ;;  %2047 = vadd.xlane.f32.xlu0 %v2019_v10  ;;  %2409 = vst.msk [vmem:[%s5150_s28 + $0x68] sm:$0xff] %vm2395_vm2, %v3436_v19  ;;  %v5647_v10 = vld [vmem:[#allocation29_spill] sm:$0xff]  ;;  %v2246_v41 = vmul.f32 %v5648_v55, %v1748_v13 }
 0x2a2   : > { %v1892_v49 = vadd.f32 %v1876_v38, %v1860_v15  ;;  %v1940_v61 = vsub.f32 %v1908_v28, %v1924_v17  ;;  %v2212_v34 = vadd.f32 %v2196_v33, %v2180_v48  ;;  %v2260_v24 = vsub.f32 %v2228_v5, %v2244_v62  ;;  %2410 = vst.msk [vmem:[%s5150_s28 + $0x70] sm:$0xff] %vm2395_vm2, %v3436_v19  ;;  %v2412_v62 = vld [vmem:[%s5150_s28] sm:$0xff] }
 0x2a3   : > { %v2198_v38 = vmul.f32 %v5647_v10, %v1748_v13  ;;  %2411 = vst.msk [vmem:[%s5150_s28 + $0x78] sm:$0xff] %vm2395_vm2, %v3436_v19 }
 0x2a4   : > { %1956 = vst [vmem:[%s4924_s15 + $0xd0] sm:$0xff] %v1892_v49  ;;  %3210 = vmatmul.msk.f32.gmra.mxu2 %vm740_vm1, %v5641_v11  ;;  %v1988_v30 = vmul.f32 %v1892_v49, %v1892_v49  ;;  %v2004_v12 = vmul.f32 %v1940_v61, %v1940_v61  ;;  %v2308_v43 = vmul.f32 %v2212_v34, %v2212_v34 }
 0x2a5   : > { %1972 = vst [vmem:[%s4931_s0 + $0xd0] sm:$0xff] %v1940_v61  ;;  %3226 = vmatmul.msk.f32.gmra.mxu3 %vm740_vm1, %v5641_v11  ;;  %v2324_v37 = vmul.f32 %v2260_v24, %v2260_v24 }
 0x2a6   : > { %2276 = vst [vmem:[%s4924_s15 + $0xd8] sm:$0xff] %v2212_v34  ;;  %v2020_v26 = vadd.f32 %v2004_v12, %v1988_v30 }
 0x2a7   : > { %2292 = vst [vmem:[%s4931_s0 + $0xd8] sm:$0xff] %v2260_v24  ;;  %v1550_v3 = vpop.f32.mrf.mxu2  ;;  %v5229_v52 = vadd.f32 %v2324_v37, %v2308_v43  ;;  %v1615_v58 = vpop.f32.mrf.mxu3 }
 0x2a8   : > { %v1861_v39 = vmul.f32 %v5643_v57, %v1550_v3  ;;  %v1909_v14 = vmul.f32 %v5642_v8, %v1550_v3  ;;  %v2181_v42 = vmul.f32 %v5645_v59, %v1615_v58  ;;  %v2229_v44 = vmul.f32 %v5644_v25, %v1615_v58 }
 0x2a9   : > { %2049 = vadd.xlane.f32.xlu1 %v2020_v26 }
 0x2aa   : > { %v1893_v40 = vadd.f32 %v1877_v54, %v1861_v39  ;;  %v1941_v2 = vsub.f32 %v1909_v14, %v1925_v53  ;;  %v2213_v1 = vadd.f32 %v2197_v16, %v2181_v42  ;;  %v2261_v31 = vsub.f32 %v2229_v44, %v2245_v9 }
 0x2ac   : > { %1957 = vst [vmem:[%s4924_s15 + $0xe0] sm:$0xff] %v1893_v40  ;;  %3211 = vmatmul.msk.f32.gmra.mxu2 %vm740_vm1, %v5646_v23  ;;  %v1989_v27 = vmul.f32 %v1893_v40, %v1893_v40  ;;  %v2005_v51 = vmul.f32 %v1941_v2, %v1941_v2  ;;  %v2309_v46 = vmul.f32 %v2213_v1, %v2213_v1 }
 0x2ad   : > { %1973 = vst [vmem:[%s4931_s0 + $0xe0] sm:$0xff] %v1941_v2  ;;  %3227 = vmatmul.msk.f32.gmra.mxu3 %vm740_vm1, %v5646_v23  ;;  %v2325_v7 = vmul.f32 %v2261_v31, %v2261_v31 }
 0x2ae   : > { %2277 = vst [vmem:[%s4924_s15 + $0xe8] sm:$0xff] %v2213_v1  ;;  %v2021_v29 = vadd.f32 %v2005_v51, %v1989_v27 }
 0x2af   : > { %2293 = vst [vmem:[%s4931_s0 + $0xe8] sm:$0xff] %v2261_v31  ;;  %v1553_v35 = vpop.f32.mrf.mxu2  ;;  %v5259_v4 = vadd.f32 %v2325_v7, %v2309_v46  ;;  %v1618_v50 = vpop.f32.mrf.mxu3 }
 0x2b0   : > { %v1862_v60 = vmul.f32 %v4888_v45, %v1553_v35  ;;  %v1910_v0 = vmul.f32 %v4890_v32, %v1553_v35  ;;  %2051 = vadd.xlane.f32.xlu2 %v2021_v29  ;;  %v2182_v36 = vmul.f32 %v5648_v55, %v1618_v50  ;;  %v2230_v17 = vmul.f32 %v5647_v10, %v1618_v50 }
 0x2b2   : > { %v1894_v32 = vadd.f32 %v1878_v18, %v1862_v60  ;;  %v1942_v45 = vsub.f32 %v1910_v0, %v1926_v63  ;;  %v2214_v20 = vadd.f32 %v2198_v38, %v2182_v36  ;;  %v2262_v33 = vsub.f32 %v2230_v17, %v2246_v41 }
 0x2b3   : > { %v2344_v15 = vpop.xlane.xlu1 %2343 }
 0x2b4   : > { %1958 = vst [vmem:[%s4924_s15 + $0xf0] sm:$0xff] %v1894_v32  ;;  %v1990_v28 = vmul.f32 %v1894_v32, %v1894_v32  ;;  %v2006_v21 = vmul.f32 %v1942_v45, %v1942_v45  ;;  %v2310_v56 = vmul.f32 %v2214_v20, %v2214_v20  ;;  %v2326_v19 = vmul.f32 %v2262_v33, %v2262_v33  ;;  %v2024_v48 = vpop.xlane.xlu0 %2023 }
 0x2b5   : > { %1974 = vst [vmem:[%s4931_s0 + $0xf0] sm:$0xff] %v1942_v45  ;;  %v2375_v47 = vadd.f32 %v2344_v15, %v2024_v48 }
 0x2b6   : > { %2278 = vst [vmem:[%s4924_s15 + $0xf8] sm:$0xff] %v2214_v20  ;;  %v2022_v5 = vadd.f32 %v2006_v21, %v1990_v28  ;;  %v2342_v61 = vadd.f32 %v2326_v19, %v2310_v56 }
 0x2b7   : > { %2294 = vst [vmem:[%s4931_s0 + $0xf8] sm:$0xff] %v2262_v33  ;;  %v2481_v49 = vpop.f32.mrf.mxu2  ;;  %v2566_v34 = vpop.f32.mrf.mxu3  ;;  %v2428_v24 = vadd.f32 %v2412_v62, %v2375_v47 }
 0x2b8   : > { %2529 = vst.msk [vmem:[%s5280_s1] sm:$0xff] %vm517_vm0, %v2481_v49  ;;  %2369 = vadd.xlane.f32.xlu2 %v5229_v52  ;;  %2053 = vadd.xlane.f32.xlu0 %v2022_v5 }
 0x2b9   : > { %2614 = vst.msk [vmem:[%s5288_s24] sm:$0xff] %vm517_vm0, %v2566_v34  ;;  %2373 = vadd.xlane.f32.xlu1 %v2342_v61 }
 0x2ba   : > { %2445 = vst.msk [vmem:[%s5150_s28] sm:$0xff] %vm2395_vm2, %v2428_v24 }
 0x2bb   : > { %v2346_v22 = vpop.xlane.xlu2 %2345 }
 0x2bc   : > { %3351 = shalt.err (!%p3348_p5)
}
 0x2bd   : > { %s3437_s13 = smov 256   ;;  %s3438_s26 = smov 16   ;;  %v2413_v11 = vld [vmem:[%s5150_s28 + $0x8] sm:$0xff]  ;;  %v2026_v30 = vpop.xlane.xlu0 %2025 }
 0x2be   : > { %3250 = dma.vmem_to_hbm [thread:$0]  (%p3539_p4), %s2667_s3, 4096, %s2669_s14, %s2631_s2, %s3437_s13, %s3437_s13, %s3438_s26   ;;  %v2376_v12 = vadd.f32 %v2346_v22, %v2026_v30 }
 0x2bf   : > { %s5649_s4 = sshll.u32 %s3426_s20, 8  ;;  %s2686_s23 = sshll.u32 %s4931_s0, 4  ;;  %v2484_v43 = vpop.f32.mrf.mxu2  ;;  %v2569_v37 = vpop.f32.mrf.mxu3  ;;  %s2687_s23 = int_to_ptr.vmem [resolvable:$true] %s2686_s23 }
 0x2c0   : > { %s2685_s9 = scalar_lea.hbm %s5475_s8, %s5649_s4  ;;  %2530 = vst.msk [vmem:[%s5280_s1 + $0x8] sm:$0xff] %vm517_vm0, %v2484_v43  ;;  %2371 = vadd.xlane.f32.xlu0 %v5259_v4  ;;  %v2429_v26 = vadd.f32 %v2413_v11, %v2376_v12  ;;  %s2636_s2 = scalar_lea.sflag [#allocation5], %s4901_s16 }
 0x2c1   : > { %s2688_s12 = sshll.u32 %s2685_s9, 4  ;;  %2615 = vst.msk [vmem:[%s5288_s24 + $0x8] sm:$0xff] %vm517_vm0, %v2569_v37  ;;  %s3372_s15 = scalar_lea.hbm %s5475_s8, 512  ;;  %s2689_s12 = int_to_ptr.hbm [resolvable:$true] %s2688_s12 }
 0x2c2   : > { %s3366_s20 = sshra.s32 %s2689_s12, 4  ;;  %s3367_s20 = int_to_ptr.hbm [resolvable:$true] %s3366_s20 }
 0x2c3   : > { %s3368_s3 = scalar_lea.hbm %s3367_s20, 256  ;;  %p3373_p10 = scmp.lt.s32.totalorder %s3367_s20, %s5475_s8 }
 0x2c4   : > { %p3369_p6 = scmp.ne.s32.totalorder %s3367_s20, %s3368_s3  ;;  %p3374_p11 = scmp.lt.s32.totalorder %s3372_s15, %s3368_s3 }
 0x2c6   : > { %p3370_p7 = pnand %p3369_p6, %p3539_p4  ;;  %p3375_p12 = por %p3374_p11, %p3373_p10 }
 0x2c8   : > { %p3371_p9 = pneg %p3370_p7 }
 0x2ca   : > { %p3376_p13 = pnand %p3375_p12, %p3371_p9 }
 0x2cc   : > { %3379 = shalt.err (!%p3376_p13)
}
 0x2cd   : > { %3251 = dma.vmem_to_hbm [thread:$0]  (%p3539_p4), %s2687_s23, 4096, %s2689_s12, %s2636_s2, %s3437_s13, %s3437_s13, %s3438_s26   ;;  %v2348_v8 = vpop.xlane.xlu0 %2347  ;;  %v2028_v3 = vpop.xlane.xlu1 %2027 }
 0x2ce   : > { %2446 = vst.msk [vmem:[%s5150_s28 + $0x8] sm:$0xff] %vm2395_vm2, %v2429_v26  ;;  %v2414_v54 = vld [vmem:[%s5150_s28 + $0x10] sm:$0xff]  ;;  %v2377_v52 = vadd.f32 %v2348_v8, %v2028_v3  ;;  %v2487_v57 = vpop.f32.mrf.mxu2  ;;  %v2572_v53 = vpop.f32.mrf.mxu3  ;;  %v2415_v59 = vld [vmem:[%s5150_s28 + $0x18] sm:$0xff]  ;;  %v2416_v31 = vld [vmem:[%s5150_s28 + $0x20] sm:$0xff] }
 0x2cf   : > { %2531 = vst.msk [vmem:[%s5280_s1 + $0x10] sm:$0xff] %vm517_vm0, %v2487_v57  ;;  %v2417_v13 = vld [vmem:[%s5150_s28 + $0x28] sm:$0xff]  ;;  %v2418_v18 = vld [vmem:[%s5150_s28 + $0x30] sm:$0xff]  ;;  %v2419_v41 = vld [vmem:[%s5150_s28 + $0x38] sm:$0xff] }
 0x2d0   : > { %v2430_v25 = vadd.f32 %v2414_v54, %v2377_v52  ;;  %2616 = vst.msk [vmem:[%s5288_s24 + $0x10] sm:$0xff] %vm517_vm0, %v2572_v53  ;;  %v2420_v33 = vld [vmem:[%s5150_s28 + $0x40] sm:$0xff]  ;;  %v2421_v48 = vld [vmem:[%s5150_s28 + $0x48] sm:$0xff]  ;;  %v2422_v22 = vld [vmem:[%s5150_s28 + $0x50] sm:$0xff] }
 0x2d1   : > { %v2423_v8 = vld [vmem:[%s5150_s28 + $0x58] sm:$0xff] }
 0x2d2   : > { %2447 = vst.msk [vmem:[%s5150_s28 + $0x10] sm:$0xff] %vm2395_vm2, %v2430_v25 }
 0x2d3   : > { %v2032_v58 = vpop.xlane.xlu2 %2031 }
 0x2d5   : > { %v2030_v16 = vpop.xlane.xlu1 %2029 }
 0x2d6   : > { %v2490_v39 = vpop.f32.mrf.mxu2  ;;  %v2575_v14 = vpop.f32.mrf.mxu3 }
 0x2d7   : > { %2532 = vst.msk [vmem:[%s5280_s1 + $0x18] sm:$0xff] %vm517_vm0, %v2490_v39 }
 0x2d8   : > { %2617 = vst.msk [vmem:[%s5288_s24 + $0x18] sm:$0xff] %vm517_vm0, %v2575_v14 }
 0x2db   : > { %v2354_v1 = vpop.xlane.xlu0 %2353 }
 0x2dc   : > { %v2352_v6 = vpop.xlane.xlu2 %2351 }
 0x2dd   : > { %v2350_v9 = vpop.xlane.xlu1 %2349  ;;  %v2379_v23 = vadd.f32 %v2352_v6, %v2032_v58  ;;  %v2425_v6 = vld [vmem:[%s5150_s28 + $0x68] sm:$0xff] }
 0x2de   : > { %v2378_v42 = vadd.f32 %v2350_v9, %v2030_v16  ;;  %v2493_v44 = vpop.f32.mrf.mxu2  ;;  %v2578_v40 = vpop.f32.mrf.mxu3  ;;  %v2424_v16 = vld [vmem:[%s5150_s28 + $0x60] sm:$0xff] }
 0x2df   : > { %2533 = vst.msk [vmem:[%s5280_s1 + $0x20] sm:$0xff] %vm517_vm0, %v2493_v44  ;;  %v2432_v27 = vadd.f32 %v2416_v31, %v2379_v23 }
 0x2e0   : > { %v2431_v2 = vadd.f32 %v2415_v59, %v2378_v42  ;;  %2618 = vst.msk [vmem:[%s5288_s24 + $0x20] sm:$0xff] %vm517_vm0, %v2578_v40 }
 0x2e1   : > { %2449 = vst.msk [vmem:[%s5150_s28 + $0x20] sm:$0xff] %vm2395_vm2, %v2432_v27 }
 0x2e2   : > { %2448 = vst.msk [vmem:[%s5150_s28 + $0x18] sm:$0xff] %vm2395_vm2, %v2431_v2 }
 0x2e4   : > { %v2034_v29 = vpop.xlane.xlu2 %2033  ;;  %v2036_v35 = vpop.xlane.xlu0 %2035 }
 0x2e5   : > { %v2356_v7 = vpop.xlane.xlu1 %2355  ;;  %v2380_v4 = vadd.f32 %v2354_v1, %v2034_v29 }
 0x2e6   : > { %v2496_v51 = vpop.f32.mrf.mxu2  ;;  %v2581_v46 = vpop.f32.mrf.mxu3  ;;  %v2381_v63 = vadd.f32 %v2356_v7, %v2036_v35  ;;  %v2427_v7 = vld [vmem:[%s5150_s28 + $0x78] sm:$0xff] }
 0x2e7   : > { %2534 = vst.msk [vmem:[%s5280_s1 + $0x28] sm:$0xff] %vm517_vm0, %v2496_v51  ;;  %v2433_v60 = vadd.f32 %v2417_v13, %v2380_v4 }
 0x2e8   : > { %2619 = vst.msk [vmem:[%s5288_s24 + $0x28] sm:$0xff] %vm517_vm0, %v2581_v46  ;;  %v2434_v0 = vadd.f32 %v2418_v18, %v2381_v63  ;;  %v2426_v63 = vld [vmem:[%s5150_s28 + $0x70] sm:$0xff] }
 0x2e9   : > { %2450 = vst.msk [vmem:[%s5150_s28 + $0x28] sm:$0xff] %vm2395_vm2, %v2433_v60 }
 0x2ea   : > { %2451 = vst.msk [vmem:[%s5150_s28 + $0x30] sm:$0xff] %vm2395_vm2, %v2434_v0 }
 0x2ec   : > { %v2358_v55 = vpop.xlane.xlu2 %2357 }
 0x2ed   : > { %v2038_v38 = vpop.xlane.xlu1 %2037 }
 0x2ee   : > { %v2499_v50 = vpop.f32.mrf.mxu2  ;;  %v2584_v10 = vpop.f32.mrf.mxu3  ;;  %v2382_v36 = vadd.f32 %v2358_v55, %v2038_v38 }
 0x2ef   : > { %2535 = vst.msk [vmem:[%s5280_s1 + $0x30] sm:$0xff] %vm517_vm0, %v2499_v50 }
 0x2f0   : > { %2620 = vst.msk [vmem:[%s5288_s24 + $0x30] sm:$0xff] %vm517_vm0, %v2584_v10  ;;  %v2435_v17 = vadd.f32 %v2419_v41, %v2382_v36 }
 0x2f2   : > { %2452 = vst.msk [vmem:[%s5150_s28 + $0x38] sm:$0xff] %vm2395_vm2, %v2435_v17 }
 0x2f4   : > { %v2360_v20 = vpop.xlane.xlu0 %2359  ;;  %v2040_v15 = vpop.xlane.xlu2 %2039 }
 0x2f5   : > { %v2383_v28 = vadd.f32 %v2360_v20, %v2040_v15 }
 0x2f6   : > { %v2502_v32 = vpop.f32.mrf.mxu2  ;;  %v2587_v45 = vpop.f32.mrf.mxu3 }
 0x2f7   : > { %2536 = vst.msk [vmem:[%s5280_s1 + $0x38] sm:$0xff] %vm517_vm0, %v2502_v32  ;;  %v2436_v21 = vadd.f32 %v2420_v33, %v2383_v28 }
 0x2f8   : > { %2621 = vst.msk [vmem:[%s5288_s24 + $0x38] sm:$0xff] %vm517_vm0, %v2587_v45 }
 0x2f9   : > { %2453 = vst.msk [vmem:[%s5150_s28 + $0x40] sm:$0xff] %vm2395_vm2, %v2436_v21 }
 0x2fc   : > { %v2362_v62 = vpop.xlane.xlu1 %2361  ;;  %v2042_v5 = vpop.xlane.xlu0 %2041 }
 0x2fd   : > { %v2384_v47 = vadd.f32 %v2362_v62, %v2042_v5 }
 0x2fe   : > { %v2505_v56 = vpop.f32.mrf.mxu2  ;;  %v2590_v19 = vpop.f32.mrf.mxu3 }
 0x2ff   : > { %2537 = vst.msk [vmem:[%s5280_s1 + $0x40] sm:$0xff] %vm517_vm0, %v2505_v56  ;;  %v2437_v49 = vadd.f32 %v2421_v48, %v2384_v47 }
 0x300   : > { %2622 = vst.msk [vmem:[%s5288_s24 + $0x40] sm:$0xff] %vm517_vm0, %v2590_v19 }
 0x301   : > { %2454 = vst.msk [vmem:[%s5150_s28 + $0x48] sm:$0xff] %vm2395_vm2, %v2437_v49 }
 0x304   : > { %v2364_v24 = vpop.xlane.xlu2 %2363  ;;  %v2044_v11 = vpop.xlane.xlu1 %2043 }
 0x305   : > { %v2385_v30 = vadd.f32 %v2364_v24, %v2044_v11 }
 0x306   : > { %v2508_v61 = vpop.f32.mrf.mxu2  ;;  %v2593_v34 = vpop.f32.mrf.mxu3 }
 0x307   : > { %2538 = vst.msk [vmem:[%s5280_s1 + $0x48] sm:$0xff] %vm517_vm0, %v2508_v61  ;;  %v2438_v12 = vadd.f32 %v2422_v22, %v2385_v30 }
 0x308   : > { %2623 = vst.msk [vmem:[%s5288_s24 + $0x48] sm:$0xff] %vm517_vm0, %v2593_v34 }
 0x309   : > { %2455 = vst.msk [vmem:[%s5150_s28 + $0x50] sm:$0xff] %vm2395_vm2, %v2438_v12 }
 0x30c   : > { %v2366_v26 = vpop.xlane.xlu0 %2365  ;;  %v2046_v54 = vpop.xlane.xlu2 %2045 }
 0x30d   : > { %v2386_v3 = vadd.f32 %v2366_v26, %v2046_v54 }
 0x30e   : > { %v2511_v43 = vpop.f32.mrf.mxu2  ;;  %v2596_v37 = vpop.f32.mrf.mxu3 }
 0x30f   : > { %2539 = vst.msk [vmem:[%s5280_s1 + $0x50] sm:$0xff] %vm517_vm0, %v2511_v43  ;;  %v2439_v52 = vadd.f32 %v2423_v8, %v2386_v3 }
 0x310   : > { %2624 = vst.msk [vmem:[%s5288_s24 + $0x50] sm:$0xff] %vm517_vm0, %v2596_v37 }
 0x311   : > { %2456 = vst.msk [vmem:[%s5150_s28 + $0x58] sm:$0xff] %vm2395_vm2, %v2439_v52 }
 0x314   : > { %v2368_v25 = vpop.xlane.xlu1 %2367  ;;  %v2048_v39 = vpop.xlane.xlu0 %2047 }
 0x315   : > { %v2387_v14 = vadd.f32 %v2368_v25, %v2048_v39 }
 0x316   : > { %v2514_v57 = vpop.f32.mrf.mxu2  ;;  %v2599_v53 = vpop.f32.mrf.mxu3 }
 0x317   : > { %2540 = vst.msk [vmem:[%s5280_s1 + $0x58] sm:$0xff] %vm517_vm0, %v2514_v57  ;;  %v2440_v58 = vadd.f32 %v2424_v16, %v2387_v14 }
 0x318   : > { %2625 = vst.msk [vmem:[%s5288_s24 + $0x58] sm:$0xff] %vm517_vm0, %v2599_v53 }
 0x319   : > { %2457 = vst.msk [vmem:[%s5150_s28 + $0x60] sm:$0xff] %vm2395_vm2, %v2440_v58 }
 0x31c   : > { %v2050_v2 = vpop.xlane.xlu1 %2049 }
 0x31e   : > { %v2517_v59 = vpop.f32.mrf.mxu2  ;;  %v2602_v9 = vpop.f32.mrf.mxu3 }
 0x31f   : > { %2541 = vst.msk [vmem:[%s5280_s1 + $0x60] sm:$0xff] %vm517_vm0, %v2517_v59 }
 0x320   : > { %2626 = vst.msk [vmem:[%s5288_s24 + $0x60] sm:$0xff] %vm517_vm0, %v2602_v9 }
 0x323   : > { %v2052_v40 = vpop.xlane.xlu2 %2051 }
 0x326   : > { %v2520_v42 = vpop.f32.mrf.mxu2  ;;  %v2605_v44 = vpop.f32.mrf.mxu3 }
 0x327   : > { %2542 = vst.msk [vmem:[%s5280_s1 + $0x68] sm:$0xff] %vm517_vm0, %v2520_v42 }
 0x328   : > { %2627 = vst.msk [vmem:[%s5288_s24 + $0x68] sm:$0xff] %vm517_vm0, %v2605_v44 }
 0x32b   : > { %v2370_v23 = vpop.xlane.xlu2 %2369  ;;  %v2054_v27 = vpop.xlane.xlu0 %2053 }
 0x32c   : > { %v2374_v51 = vpop.xlane.xlu1 %2373  ;;  %v2388_v46 = vadd.f32 %v2370_v23, %v2050_v2 }
 0x32d   : > { %v2390_v13 = vadd.f32 %v2374_v51, %v2054_v27 }
 0x32e   : > { %v2523_v1 = vpop.f32.mrf.mxu2  ;;  %v2608_v31 = vpop.f32.mrf.mxu3  ;;  %v2441_v29 = vadd.f32 %v2425_v6, %v2388_v46 }
 0x32f   : > { %2543 = vst.msk [vmem:[%s5280_s1 + $0x70] sm:$0xff] %vm517_vm0, %v2523_v1  ;;  %v2443_v18 = vadd.f32 %v2427_v7, %v2390_v13 }
 0x330   : > { %2628 = vst.msk [vmem:[%s5288_s24 + $0x70] sm:$0xff] %vm517_vm0, %v2608_v31 }
 0x331   : > { %2458 = vst.msk [vmem:[%s5150_s28 + $0x68] sm:$0xff] %vm2395_vm2, %v2441_v29 }
 0x332   : > { %2460 = vst.msk [vmem:[%s5150_s28 + $0x78] sm:$0xff] %vm2395_vm2, %v2443_v18 }
 0x333   : > { %v2372_v60 = vpop.xlane.xlu0 %2371 }
 0x334   : > { %v2389_v0 = vadd.f32 %v2372_v60, %v2052_v40 }
 0x336   : > { %v2526_v35 = vpop.f32.mrf.mxu2  ;;  %v2611_v4 = vpop.f32.mrf.mxu3  ;;  %v2442_v50 = vadd.f32 %v2426_v63, %v2389_v0 }
 0x337   : > { %2544 = vst.msk [vmem:[%s5280_s1 + $0x78] sm:$0xff] %vm517_vm0, %v2526_v35 }
 0x338   : > { %2629 = vst.msk [vmem:[%s5288_s24 + $0x78] sm:$0xff] %vm517_vm0, %v2611_v4 }
 0x339   : > { %2459 = vst.msk [vmem:[%s5150_s28 + $0x70] sm:$0xff] %vm2395_vm2, %v2442_v50 }
 0x33a PF: > { %p3261_p4 = scmp.ge.s32.totalorder %s3434_s22, 2  ;;  %s2715_s27 = sand.u32 1, %s3414_s17  }
 0x33b   : > { %s2716_s16 = scalar_lea.sflag [#allocation3], %s2715_s27 }
 0x33c   : > { %p3255_p0 = pnand %p3261_p4, %p3546_p8 }
 0x33e   : > { %p3256_p1 = pneg %p3255_p0 }
 0x340   : > { %3405 = dma.done.wait (%p3256_p1), %s2716_s16, 4096  }
 0x341   : > { %3407 = vsyncadd (%p3256_p1), %s2716_s16, 4294963200  ;;  %s2726_s1 = scalar_lea.sflag [#allocation5], %s2715_s27 }
 0x342   : > { %3409 = dma.done.wait (%p3256_p1), %s2726_s1, 4096  }
 0x343   : > { %3411 = vsyncadd (%p3256_p1), %s2726_s1, 4294963200  ;;  %s28_s22 = sadd.s32 1, %s3434_s22   ;;  %s5650_s17 = smov %s3418_s18 }
 0x344   : > { %p25_p2 = scmp.ge.s32.totalorder %s28_s22, 4   ;;  %s5651_s18 = smov %s3422_s19 }
 0x345   : > { %s5652_s19 = smov %s3552_s30  ;;  %s5653_s20 = smov %s3430_s21 }
 0x346   : > { %s5654_s21 = smov %s5656_s25  ;;  %27 = sbr.rel (!%p25_p2) target bundleno = 15 (0xf), region = 150 }
 0x34b   :  { %2756 = vsyncpa [#allocation3], 1 }
 0x34c   :  { %2758 = vsyncpa [#allocation3 + $0x1], 1 }
 0x34d   :  { %2759 = vsyncpa [#allocation5], 1 }
 0x34e   :  { %2761 = vsyncpa [#allocation5 + $0x1], 1 }

</bundles_post_ra>
